<compile_context>
chip_gen: v6e
topology: v6e:2x2x1
jax: 0.10.0
libtpu: 0.0.40
codegen_flags: <defaults>
</compile_context>

<pallas_src>
import numpy as np

import jax
import jax.numpy as jnp
from jax.experimental import pallas as pl
from jax.experimental.pallas import tpu as pltpu

BATCH_SIZE = 4
KERNEL = 5

# Geometry forced by the module (CIFAR 32x32x3 input, 16*5*5 flatten).
H0, W0, C0 = 32, 32, 3          # input
C1, H1, W1 = 6, 28, 28          # conv1 output
HP1, WP1 = 14, 14               # pool1 output
C2, H2, W2 = 16, 10, 10         # conv2 output
HP2, WP2 = 5, 5                 # pool2 output
L1, L2, L3 = 120, 84, 10        # fc sizes

PAR = 128                               # lane offset separating even/odd width parity
N1 = PAR + WP1 * C1                     # 212 conv1 matmul output lanes
N2 = PAR + WP2 * C2                     # 208 conv2 matmul output lanes
M1_ROWS = (BATCH_SIZE - 1) * H0 + H1                  # 124 conv1 LHS/output rows
PD1_ROWS = M1_ROWS - 1                                # 123 row-pooled conv1 rows (dilated)
M2_ROWS = (BATCH_SIZE - 1) * H0 + 2 * (H2 - 1) + 1    # 115 conv2 LHS/output rows
PD2_ROWS = M2_ROWS - 2                                # 113 row-pooled conv2 rows (dilated)


# ----------------------------------------------------------------------------
# The single fused Pallas kernel (whole batch, everything VMEM-resident).
#   Activation rows are b*H0 + h (batch stacked into matmul M).
#   Conv output lanes: even output-width parity in [0, W/2*C), odd parity in
#   [PAR, PAR + W/2*C)  ->  column pool = max of two aligned lane slices.
# ----------------------------------------------------------------------------
def _lenet_kernel(x_ref, m1_ref, b1_ref, m2_ref, b2_ref, sel_ref,
                  w1_ref, bf1_ref, w2_ref, bf2_ref, w3_ref, bf3_ref, o_ref):
    bf16 = jnp.bfloat16

    def mm(a, b):
        return jnp.dot(a, b, preferred_element_type=jnp.float32)

    # ---- conv1 + bias + ReLU: 5 Toeplitz matmuls for the whole batch --------
    acc1 = None
    for dy in range(KERNEL):
        lhs = x_ref[dy:dy + M1_ROWS, :].astype(bf16)            # (124, 96)
        t = mm(lhs, m1_ref[dy])                                 # (124, 212) f32
        acc1 = t if acc1 is None else acc1 + t
    y1 = jnp.maximum(acc1 + b1_ref[...], 0.0)

    # ---- 2x2 max-pool #1 on the VPU ------------------------------------------
    # column pool: max of the two (128-aligned) parity halves  -> (124, 84)
    zc1 = jnp.maximum(y1[:, :WP1 * C1], y1[:, PAR:PAR + WP1 * C1])
    # row pool: max of adjacent rows; valid pooled rows sit at b*32 + 2*i
    p1 = jnp.maximum(zc1[0:PD1_ROWS, :], zc1[1:PD1_ROWS + 1, :])   # (123, 84)

    # ---- conv2 + bias + ReLU: 5 Toeplitz matmuls for the whole batch --------
    # LHS rows are the (row-dilated) pooled rows; garbage rows only feed
    # garbage output rows, which are never read downstream.
    acc2 = None
    for dy in range(KERNEL):
        lhs = p1[2 * dy:2 * dy + M2_ROWS, :].astype(bf16)       # (115, 84)
        t = mm(lhs, m2_ref[dy])                                 # (115, 208) f32
        acc2 = t if acc2 is None else acc2 + t
    y2 = jnp.maximum(acc2 + b2_ref[...], 0.0)

    # ---- 2x2 max-pool #2 on the VPU ------------------------------------------
    zc2 = jnp.maximum(y2[:, :WP2 * C2], y2[:, PAR:PAR + WP2 * C2])   # (115, 80)
    p2 = jnp.maximum(zc2[0:PD2_ROWS, :], zc2[2:PD2_ROWS + 2, :])     # (113, 80)

    # ---- gather the 20 valid pooled rows (grouped by h, batch-contiguous) ---
    g = mm(sel_ref[...], p2.astype(bf16)).astype(bf16)          # (HP2*B, 80)

    # ---- fc1 + ReLU (batched over the 4 images), fc2 + ReLU, fc3 ------------
    accf = None
    for h in range(HP2):
        t = mm(g[h * BATCH_SIZE:(h + 1) * BATCH_SIZE, :], w1_ref[h])  # (4,120)
        accf = t if accf is None else accf + t
    z1 = jnp.maximum(accf + bf1_ref[...], 0.0).astype(bf16)           # (4,120)
    z2 = jnp.maximum(mm(z1, w2_ref[...]) + bf2_ref[...], 0.0).astype(bf16)  # (4,84)
    o_ref[...] = mm(z2, w3_ref[...]) + bf3_ref[...]                   # (4,10) f32


# ----------------------------------------------------------------------------
# One-time host-side weight repacking (hoisted out of the per-call path).
# ----------------------------------------------------------------------------
def _conv1_toeplitz(w):
    # m[dy, ci*W0 + w_in, lane(ow, co)] = w[co, ci, dy, w_in - ow]
    # lane(ow, co) = (ow % 2) * PAR + (ow // 2) * C1 + co    (parity-split)
    m = np.zeros((KERNEL, C0 * W0, N1), np.float32)
    for dy in range(KERNEL):
        for dx in range(KERNEL):
            for ci in range(C0):
                for ow in range(W1):
                    base = (ow % 2) * PAR + (ow // 2) * C1
                    m[dy, ci * W0 + ow + dx, base:base + C1] = w[:, ci, dy, dx]
    return m


def _conv2_toeplitz(w):
    # K lanes are pool1's compact layout (wp*C1 + ci); output lanes parity-split.
    m = np.zeros((KERNEL, WP1 * C1, N2), np.float32)
    for dy in range(KERNEL):
        for dx in range(KERNEL):
            for ci in range(C1):
                for ow in range(W2):
                    wp = ow + dx
                    base = (ow % 2) * PAR + (ow // 2) * C2
                    m[dy, wp * C1 + ci, base:base + C2] = w[:, ci, dy, dx]
    return m


def _parity_bias(bias, w_out):
    c = bias.shape[0]
    out = np.zeros((1, PAR + (w_out // 2) * c), np.float32)
    for ow in range(w_out):
        base = (ow % 2) * PAR + (ow // 2) * c
        out[0, base:base + c] = bias
    return out


def _fc_gather_select():
    # s[h*B + b, b*H0 + 4*h] = 1 : picks pooled-conv2 row (image b, height h)
    s = np.zeros((HP2 * BATCH_SIZE, PD2_ROWS), np.float32)
    for h in range(HP2):
        for b in range(BATCH_SIZE):
            s[h * BATCH_SIZE + b, b * H0 + 4 * h] = 1.0
    return s


def prepare_params(params):
    """One-time packing of torch-layout params into kernel-friendly layouts."""
    p = {k: np.asarray(v, np.float32) for k, v in params.items()}
    bf16 = jnp.bfloat16
    # fc1 weight permuted so lane (w*16 + co) at pooled row h hits torch flat
    # index co*25 + h*5 + w (matches torch's NCHW x.view(B, -1)).
    w1h = np.transpose(p["fc1_w"].reshape(L1, C2, HP2, WP2),
                       (2, 3, 1, 0)).reshape(HP2, WP2 * C2, L1)
    packed = {
        "m1": jnp.asarray(_conv1_toeplitz(p["conv1_w"]), bf16),
        "b1": jnp.asarray(_parity_bias(p["conv1_b"], W1), jnp.float32),
        "m2": jnp.asarray(_conv2_toeplitz(p["conv2_w"]), bf16),
        "b2": jnp.asarray(_parity_bias(p["conv2_b"], W2), jnp.float32),
        "sel": jnp.asarray(_fc_gather_select(), bf16),
        "w1h": jnp.asarray(w1h, bf16),
        "bf1": jnp.asarray(p["fc1_b"][None, :], jnp.float32),
        "w2": jnp.asarray(p["fc2_w"].T, bf16),
        "bf2": jnp.asarray(p["fc2_b"][None, :], jnp.float32),
        "w3": jnp.asarray(p["fc3_w"].T, bf16),
        "bf3": jnp.asarray(p["fc3_b"][None, :], jnp.float32),
    }
    return packed


# ----------------------------------------------------------------------------
# Forward pass: exactly one pallas_call, no grid, everything in VMEM.
# ----------------------------------------------------------------------------
@jax.jit
def net_forward(x_nchw, packed):
    # Repack to rows = b*H0 + h, lanes = ci*W0 + w (folds cin into the MXU K dim).
    x_p = jnp.transpose(x_nchw, (0, 2, 1, 3)).reshape(BATCH_SIZE * H0, C0 * W0)
    vmem = lambda: pl.BlockSpec(memory_space=pltpu.MemorySpace.VMEM)
    return pl.pallas_call(
        _lenet_kernel,
        out_shape=jax.ShapeDtypeStruct((BATCH_SIZE, L3), jnp.float32),
        in_specs=[vmem() for _ in range(12)],
        out_specs=vmem(),
    )(x_p, packed["m1"], packed["b1"], packed["m2"], packed["b2"],
      packed["sel"], packed["w1h"], packed["bf1"], packed["w2"],
      packed["bf2"], packed["w3"], packed["bf3"])


# ----------------------------------------------------------------------------
# Deterministic torch-style parameter init + pure-JAX reference for checking.
# ----------------------------------------------------------------------------
def init_params(key, kernel=KERNEL):
    keys = jax.random.split(key, 10)

    def uniform(k, shape, fan_in):
        bound = 1.0 / np.sqrt(float(fan_in))
        return jax.random.uniform(k, shape, jnp.float32, -bound, bound)

    return {
        "conv1_w": uniform(keys[0], (6, 3, kernel, kernel), 3 * kernel * kernel),
        "conv1_b": uniform(keys[1], (6,), 3 * kernel * kernel),
        "conv2_w": uniform(keys[2], (16, 6, kernel, kernel), 6 * kernel * kernel),
        "conv2_b": uniform(keys[3], (16,), 6 * kernel * kernel),
        "fc1_w": uniform(keys[4], (120, 16 * 5 * 5), 16 * 5 * 5),   # torch (out, in)
        "fc1_b": uniform(keys[5], (120,), 16 * 5 * 5),
        "fc2_w": uniform(keys[6], (84, 120), 120),
        "fc2_b": uniform(keys[7], (84,), 120),
        "fc3_w": uniform(keys[8], (10, 84), 84),
        "fc3_b": uniform(keys[9], (10,), 84),
    }


def reference_forward(x_nchw, params):
    def conv(x, w, b):
        y = jax.lax.conv_general_dilated(
            x, w, (1, 1), "VALID", dimension_numbers=("NCHW", "OIHW", "NCHW"))
        return jax.nn.relu(y + b[None, :, None, None])

    def pool(x):
        b, c, h, w = x.shape
        return x.reshape(b, c, h // 2, 2, w // 2, 2).max(axis=(3, 5))

    y = pool(conv(x_nchw, params["conv1_w"], params["conv1_b"]))
    y = pool(conv(y, params["conv2_w"], params["conv2_b"]))
    y = y.reshape(BATCH_SIZE, -1)                         # NCHW flatten, like torch
    y = jax.nn.relu(y @ params["fc1_w"].T + params["fc1_b"])
    y = jax.nn.relu(y @ params["fc2_w"].T + params["fc2_b"])
    return y @ params["fc3_w"].T + params["fc3_b"]


if __name__ == "__main__":
    key = jax.random.PRNGKey(0)
    k_x, k_p = jax.random.split(key)
    # Geometry is pinned by the module (16*5*5 flatten only works for 32x32x3).
    x = jax.random.normal(k_x, (BATCH_SIZE, 3, 32, 32), dtype=jnp.float32)
    params = init_params(k_p)
    packed = prepare_params(params)          # one-time weight repacking

    out = jax.block_until_ready(net_forward(x, packed))
    assert out.shape == (BATCH_SIZE, 10), out.shape

    with jax.default_matmul_precision("float32"):
        ref = jax.block_until_ready(reference_forward(x, params))
    np.testing.assert_allclose(np.asarray(out), np.asarray(ref), rtol=5e-2, atol=5e-2)

    print("KERNEL_OK")
</pallas_src>

<mosaic_0001>
module attributes {stable_mosaic.version = 11 : i64} {
  func.func @_lenet_kernel(%arg0: memref<128x96xf32, #tpu.memory_space<vmem>>, %arg1: memref<5x96x212xbf16, #tpu.memory_space<vmem>>, %arg2: memref<1x212xf32, #tpu.memory_space<vmem>>, %arg3: memref<5x84x208xbf16, #tpu.memory_space<vmem>>, %arg4: memref<1x208xf32, #tpu.memory_space<vmem>>, %arg5: memref<20x113xbf16, #tpu.memory_space<vmem>>, %arg6: memref<5x80x120xbf16, #tpu.memory_space<vmem>>, %arg7: memref<1x120xf32, #tpu.memory_space<vmem>>, %arg8: memref<120x84xbf16, #tpu.memory_space<vmem>>, %arg9: memref<1x84xf32, #tpu.memory_space<vmem>>, %arg10: memref<84x10xbf16, #tpu.memory_space<vmem>>, %arg11: memref<1x10xf32, #tpu.memory_space<vmem>>, %arg12: memref<4x10xf32, #tpu.memory_space<vmem>>) attributes {dimension_semantics = [], scalar_prefetch = 0 : i64, scratch_operands = 0 : i64, tpu.core_type = #tpu.core_type<tc>} {
    %c0 = arith.constant 0 : index
    %c0_0 = arith.constant 0 : index
    %0 = vector.load %arg0[%c0, %c0_0] : memref<128x96xf32, #tpu.memory_space<vmem>>, vector<124x96xf32>
    %1 = arith.truncf %0 : vector<124x96xf32> to vector<124x96xbf16>
    %c0_1 = arith.constant 0 : index
    %c0_2 = arith.constant 0 : index
    %c0_3 = arith.constant 0 : index
    %2 = vector.load %arg1[%c0_1, %c0_2, %c0_3] : memref<5x96x212xbf16, #tpu.memory_space<vmem>>, vector<1x96x212xbf16>
    %3 = vector.shape_cast %2 : vector<1x96x212xbf16> to vector<96x212xbf16>
    %cst = arith.constant dense<0.000000e+00> : vector<124x212xf32>
    %4 = tpu.matmul %1, %3, %cst {dimension_numbers = #tpu.dot_dimension_numbers<[1], [0], [0], [1], [0, 0, 1, 1], [], []>} : vector<124x96xbf16>, vector<96x212xbf16>, vector<124x212xf32> -> vector<124x212xf32>
    %c1 = arith.constant 1 : index
    %c0_4 = arith.constant 0 : index
    %5 = vector.load %arg0[%c1, %c0_4] : memref<128x96xf32, #tpu.memory_space<vmem>>, vector<124x96xf32>
    %6 = arith.truncf %5 : vector<124x96xf32> to vector<124x96xbf16>
    %c1_5 = arith.constant 1 : index
    %c0_6 = arith.constant 0 : index
    %c0_7 = arith.constant 0 : index
    %7 = vector.load %arg1[%c1_5, %c0_6, %c0_7] : memref<5x96x212xbf16, #tpu.memory_space<vmem>>, vector<1x96x212xbf16>
    %8 = vector.shape_cast %7 : vector<1x96x212xbf16> to vector<96x212xbf16>
    %cst_8 = arith.constant dense<0.000000e+00> : vector<124x212xf32>
    %9 = tpu.matmul %6, %8, %cst_8 {dimension_numbers = #tpu.dot_dimension_numbers<[1], [0], [0], [1], [0, 0, 1, 1], [], []>} : vector<124x96xbf16>, vector<96x212xbf16>, vector<124x212xf32> -> vector<124x212xf32>
    %10 = arith.addf %4, %9 : vector<124x212xf32>
    %c2 = arith.constant 2 : index
    %c0_9 = arith.constant 0 : index
    %11 = vector.load %arg0[%c2, %c0_9] : memref<128x96xf32, #tpu.memory_space<vmem>>, vector<124x96xf32>
    %12 = arith.truncf %11 : vector<124x96xf32> to vector<124x96xbf16>
    %c2_10 = arith.constant 2 : index
    %c0_11 = arith.constant 0 : index
    %c0_12 = arith.constant 0 : index
    %13 = vector.load %arg1[%c2_10, %c0_11, %c0_12] : memref<5x96x212xbf16, #tpu.memory_space<vmem>>, vector<1x96x212xbf16>
    %14 = vector.shape_cast %13 : vector<1x96x212xbf16> to vector<96x212xbf16>
    %cst_13 = arith.constant dense<0.000000e+00> : vector<124x212xf32>
    %15 = tpu.matmul %12, %14, %cst_13 {dimension_numbers = #tpu.dot_dimension_numbers<[1], [0], [0], [1], [0, 0, 1, 1], [], []>} : vector<124x96xbf16>, vector<96x212xbf16>, vector<124x212xf32> -> vector<124x212xf32>
    %16 = arith.addf %10, %15 : vector<124x212xf32>
    %c3 = arith.constant 3 : index
    %c0_14 = arith.constant 0 : index
    %17 = vector.load %arg0[%c3, %c0_14] : memref<128x96xf32, #tpu.memory_space<vmem>>, vector<124x96xf32>
    %18 = arith.truncf %17 : vector<124x96xf32> to vector<124x96xbf16>
    %c3_15 = arith.constant 3 : index
    %c0_16 = arith.constant 0 : index
    %c0_17 = arith.constant 0 : index
    %19 = vector.load %arg1[%c3_15, %c0_16, %c0_17] : memref<5x96x212xbf16, #tpu.memory_space<vmem>>, vector<1x96x212xbf16>
    %20 = vector.shape_cast %19 : vector<1x96x212xbf16> to vector<96x212xbf16>
    %cst_18 = arith.constant dense<0.000000e+00> : vector<124x212xf32>
    %21 = tpu.matmul %18, %20, %cst_18 {dimension_numbers = #tpu.dot_dimension_numbers<[1], [0], [0], [1], [0, 0, 1, 1], [], []>} : vector<124x96xbf16>, vector<96x212xbf16>, vector<124x212xf32> -> vector<124x212xf32>
    %22 = arith.addf %16, %21 : vector<124x212xf32>
    %c4 = arith.constant 4 : index
    %c0_19 = arith.constant 0 : index
    %23 = vector.load %arg0[%c4, %c0_19] : memref<128x96xf32, #tpu.memory_space<vmem>>, vector<124x96xf32>
    %24 = arith.truncf %23 : vector<124x96xf32> to vector<124x96xbf16>
    %c4_20 = arith.constant 4 : index
    %c0_21 = arith.constant 0 : index
    %c0_22 = arith.constant 0 : index
    %25 = vector.load %arg1[%c4_20, %c0_21, %c0_22] : memref<5x96x212xbf16, #tpu.memory_space<vmem>>, vector<1x96x212xbf16>
    %26 = vector.shape_cast %25 : vector<1x96x212xbf16> to vector<96x212xbf16>
    %cst_23 = arith.constant dense<0.000000e+00> : vector<124x212xf32>
    %27 = tpu.matmul %24, %26, %cst_23 {dimension_numbers = #tpu.dot_dimension_numbers<[1], [0], [0], [1], [0, 0, 1, 1], [], []>} : vector<124x96xbf16>, vector<96x212xbf16>, vector<124x212xf32> -> vector<124x212xf32>
    %28 = arith.addf %22, %27 : vector<124x212xf32>
    %c0_24 = arith.constant 0 : index
    %c0_25 = arith.constant 0 : index
    %29 = vector.load %arg2[%c0_24, %c0_25] : memref<1x212xf32, #tpu.memory_space<vmem>>, vector<1x212xf32>
    %30 = vector.broadcast %29 : vector<1x212xf32> to vector<124x212xf32>
    %31 = arith.addf %28, %30 : vector<124x212xf32>
    %cst_26 = arith.constant 0.000000e+00 : f32
    %32 = vector.broadcast %cst_26 : f32 to vector<124x212xf32>
    %33 = arith.maximumf %31, %32 : vector<124x212xf32>
    %34 = vector.extract_strided_slice %33 {offsets = [0, 0], sizes = [124, 84], strides = [1, 1]} : vector<124x212xf32> to vector<124x84xf32>
    %35 = vector.extract_strided_slice %33 {offsets = [0, 128], sizes = [124, 84], strides = [1, 1]} : vector<124x212xf32> to vector<124x84xf32>
    %36 = arith.maximumf %34, %35 : vector<124x84xf32>
    %37 = vector.extract_strided_slice %36 {offsets = [0, 0], sizes = [123, 84], strides = [1, 1]} : vector<124x84xf32> to vector<123x84xf32>
    %38 = vector.extract_strided_slice %36 {offsets = [1, 0], sizes = [123, 84], strides = [1, 1]} : vector<124x84xf32> to vector<123x84xf32>
    %39 = arith.maximumf %37, %38 : vector<123x84xf32>
    %40 = vector.extract_strided_slice %39 {offsets = [0, 0], sizes = [115, 84], strides = [1, 1]} : vector<123x84xf32> to vector<115x84xf32>
    %41 = arith.truncf %40 : vector<115x84xf32> to vector<115x84xbf16>
    %c0_27 = arith.constant 0 : index
    %c0_28 = arith.constant 0 : index
    %c0_29 = arith.constant 0 : index
    %42 = vector.load %arg3[%c0_27, %c0_28, %c0_29] : memref<5x84x208xbf16, #tpu.memory_space<vmem>>, vector<1x84x208xbf16>
    %43 = vector.shape_cast %42 : vector<1x84x208xbf16> to vector<84x208xbf16>
    %cst_30 = arith.constant dense<0.000000e+00> : vector<115x208xf32>
    %44 = tpu.matmul %41, %43, %cst_30 {dimension_numbers = #tpu.dot_dimension_numbers<[1], [0], [0], [1], [0, 0, 1, 1], [], []>} : vector<115x84xbf16>, vector<84x208xbf16>, vector<115x208xf32> -> vector<115x208xf32>
    %45 = vector.extract_strided_slice %39 {offsets = [2, 0], sizes = [115, 84], strides = [1, 1]} : vector<123x84xf32> to vector<115x84xf32>
    %46 = arith.truncf %45 : vector<115x84xf32> to vector<115x84xbf16>
    %c1_31 = arith.constant 1 : index
    %c0_32 = arith.constant 0 : index
    %c0_33 = arith.constant 0 : index
    %47 = vector.load %arg3[%c1_31, %c0_32, %c0_33] : memref<5x84x208xbf16, #tpu.memory_space<vmem>>, vector<1x84x208xbf16>
    %48 = vector.shape_cast %47 : vector<1x84x208xbf16> to vector<84x208xbf16>
    %cst_34 = arith.constant dense<0.000000e+00> : vector<115x208xf32>
    %49 = tpu.matmul %46, %48, %cst_34 {dimension_numbers = #tpu.dot_dimension_numbers<[1], [0], [0], [1], [0, 0, 1, 1], [], []>} : vector<115x84xbf16>, vector<84x208xbf16>, vector<115x208xf32> -> vector<115x208xf32>
    %50 = arith.addf %44, %49 : vector<115x208xf32>
    %51 = vector.extract_strided_slice %39 {offsets = [4, 0], sizes = [115, 84], strides = [1, 1]} : vector<123x84xf32> to vector<115x84xf32>
    %52 = arith.truncf %51 : vector<115x84xf32> to vector<115x84xbf16>
    %c2_35 = arith.constant 2 : index
    %c0_36 = arith.constant 0 : index
    %c0_37 = arith.constant 0 : index
    %53 = vector.load %arg3[%c2_35, %c0_36, %c0_37] : memref<5x84x208xbf16, #tpu.memory_space<vmem>>, vector<1x84x208xbf16>
    %54 = vector.shape_cast %53 : vector<1x84x208xbf16> to vector<84x208xbf16>
    %cst_38 = arith.constant dense<0.000000e+00> : vector<115x208xf32>
    %55 = tpu.matmul %52, %54, %cst_38 {dimension_numbers = #tpu.dot_dimension_numbers<[1], [0], [0], [1], [0, 0, 1, 1], [], []>} : vector<115x84xbf16>, vector<84x208xbf16>, vector<115x208xf32> -> vector<115x208xf32>
    %56 = arith.addf %50, %55 : vector<115x208xf32>
    %57 = vector.extract_strided_slice %39 {offsets = [6, 0], sizes = [115, 84], strides = [1, 1]} : vector<123x84xf32> to vector<115x84xf32>
    %58 = arith.truncf %57 : vector<115x84xf32> to vector<115x84xbf16>
    %c3_39 = arith.constant 3 : index
    %c0_40 = arith.constant 0 : index
    %c0_41 = arith.constant 0 : index
    %59 = vector.load %arg3[%c3_39, %c0_40, %c0_41] : memref<5x84x208xbf16, #tpu.memory_space<vmem>>, vector<1x84x208xbf16>
    %60 = vector.shape_cast %59 : vector<1x84x208xbf16> to vector<84x208xbf16>
    %cst_42 = arith.constant dense<0.000000e+00> : vector<115x208xf32>
    %61 = tpu.matmul %58, %60, %cst_42 {dimension_numbers = #tpu.dot_dimension_numbers<[1], [0], [0], [1], [0, 0, 1, 1], [], []>} : vector<115x84xbf16>, vector<84x208xbf16>, vector<115x208xf32> -> vector<115x208xf32>
    %62 = arith.addf %56, %61 : vector<115x208xf32>
    %63 = vector.extract_strided_slice %39 {offsets = [8, 0], sizes = [115, 84], strides = [1, 1]} : vector<123x84xf32> to vector<115x84xf32>
    %64 = arith.truncf %63 : vector<115x84xf32> to vector<115x84xbf16>
    %c4_43 = arith.constant 4 : index
    %c0_44 = arith.constant 0 : index
    %c0_45 = arith.constant 0 : index
    %65 = vector.load %arg3[%c4_43, %c0_44, %c0_45] : memref<5x84x208xbf16, #tpu.memory_space<vmem>>, vector<1x84x208xbf16>
    %66 = vector.shape_cast %65 : vector<1x84x208xbf16> to vector<84x208xbf16>
    %cst_46 = arith.constant dense<0.000000e+00> : vector<115x208xf32>
    %67 = tpu.matmul %64, %66, %cst_46 {dimension_numbers = #tpu.dot_dimension_numbers<[1], [0], [0], [1], [0, 0, 1, 1], [], []>} : vector<115x84xbf16>, vector<84x208xbf16>, vector<115x208xf32> -> vector<115x208xf32>
    %68 = arith.addf %62, %67 : vector<115x208xf32>
    %c0_47 = arith.constant 0 : index
    %c0_48 = arith.constant 0 : index
    %69 = vector.load %arg4[%c0_47, %c0_48] : memref<1x208xf32, #tpu.memory_space<vmem>>, vector<1x208xf32>
    %70 = vector.broadcast %69 : vector<1x208xf32> to vector<115x208xf32>
    %71 = arith.addf %68, %70 : vector<115x208xf32>
    %cst_49 = arith.constant 0.000000e+00 : f32
    %72 = vector.broadcast %cst_49 : f32 to vector<115x208xf32>
    %73 = arith.maximumf %71, %72 : vector<115x208xf32>
    %74 = vector.extract_strided_slice %73 {offsets = [0, 0], sizes = [115, 80], strides = [1, 1]} : vector<115x208xf32> to vector<115x80xf32>
    %75 = vector.extract_strided_slice %73 {offsets = [0, 128], sizes = [115, 80], strides = [1, 1]} : vector<115x208xf32> to vector<115x80xf32>
    %76 = arith.maximumf %74, %75 : vector<115x80xf32>
    %77 = vector.extract_strided_slice %76 {offsets = [0, 0], sizes = [113, 80], strides = [1, 1]} : vector<115x80xf32> to vector<113x80xf32>
    %78 = vector.extract_strided_slice %76 {offsets = [2, 0], sizes = [113, 80], strides = [1, 1]} : vector<115x80xf32> to vector<113x80xf32>
    %79 = arith.maximumf %77, %78 : vector<113x80xf32>
    %c0_50 = arith.constant 0 : index
    %c0_51 = arith.constant 0 : index
    %80 = vector.load %arg5[%c0_50, %c0_51] : memref<20x113xbf16, #tpu.memory_space<vmem>>, vector<20x113xbf16>
    %81 = arith.truncf %79 : vector<113x80xf32> to vector<113x80xbf16>
    %cst_52 = arith.constant dense<0.000000e+00> : vector<20x80xf32>
    %82 = tpu.matmul %80, %81, %cst_52 {dimension_numbers = #tpu.dot_dimension_numbers<[1], [0], [0], [1], [0, 0, 1, 1], [], []>} : vector<20x113xbf16>, vector<113x80xbf16>, vector<20x80xf32> -> vector<20x80xf32>
    %83 = arith.truncf %82 : vector<20x80xf32> to vector<20x80xbf16>
    %84 = vector.extract_strided_slice %83 {offsets = [0, 0], sizes = [4, 80], strides = [1, 1]} : vector<20x80xbf16> to vector<4x80xbf16>
    %c0_53 = arith.constant 0 : index
    %c0_54 = arith.constant 0 : index
    %c0_55 = arith.constant 0 : index
    %85 = vector.load %arg6[%c0_53, %c0_54, %c0_55] : memref<5x80x120xbf16, #tpu.memory_space<vmem>>, vector<1x80x120xbf16>
    %86 = vector.shape_cast %85 : vector<1x80x120xbf16> to vector<80x120xbf16>
    %cst_56 = arith.constant dense<0.000000e+00> : vector<4x120xf32>
    %87 = tpu.matmul %84, %86, %cst_56 {dimension_numbers = #tpu.dot_dimension_numbers<[1], [0], [0], [1], [0, 0, 1, 1], [], []>} : vector<4x80xbf16>, vector<80x120xbf16>, vector<4x120xf32> -> vector<4x120xf32>
    %88 = vector.extract_strided_slice %83 {offsets = [4, 0], sizes = [4, 80], strides = [1, 1]} : vector<20x80xbf16> to vector<4x80xbf16>
    %c1_57 = arith.constant 1 : index
    %c0_58 = arith.constant 0 : index
    %c0_59 = arith.constant 0 : index
    %89 = vector.load %arg6[%c1_57, %c0_58, %c0_59] : memref<5x80x120xbf16, #tpu.memory_space<vmem>>, vector<1x80x120xbf16>
    %90 = vector.shape_cast %89 : vector<1x80x120xbf16> to vector<80x120xbf16>
    %cst_60 = arith.constant dense<0.000000e+00> : vector<4x120xf32>
    %91 = tpu.matmul %88, %90, %cst_60 {dimension_numbers = #tpu.dot_dimension_numbers<[1], [0], [0], [1], [0, 0, 1, 1], [], []>} : vector<4x80xbf16>, vector<80x120xbf16>, vector<4x120xf32> -> vector<4x120xf32>
    %92 = arith.addf %87, %91 : vector<4x120xf32>
    %93 = vector.extract_strided_slice %83 {offsets = [8, 0], sizes = [4, 80], strides = [1, 1]} : vector<20x80xbf16> to vector<4x80xbf16>
    %c2_61 = arith.constant 2 : index
    %c0_62 = arith.constant 0 : index
    %c0_63 = arith.constant 0 : index
    %94 = vector.load %arg6[%c2_61, %c0_62, %c0_63] : memref<5x80x120xbf16, #tpu.memory_space<vmem>>, vector<1x80x120xbf16>
    %95 = vector.shape_cast %94 : vector<1x80x120xbf16> to vector<80x120xbf16>
    %cst_64 = arith.constant dense<0.000000e+00> : vector<4x120xf32>
    %96 = tpu.matmul %93, %95, %cst_64 {dimension_numbers = #tpu.dot_dimension_numbers<[1], [0], [0], [1], [0, 0, 1, 1], [], []>} : vector<4x80xbf16>, vector<80x120xbf16>, vector<4x120xf32> -> vector<4x120xf32>
    %97 = arith.addf %92, %96 : vector<4x120xf32>
    %98 = vector.extract_strided_slice %83 {offsets = [12, 0], sizes = [4, 80], strides = [1, 1]} : vector<20x80xbf16> to vector<4x80xbf16>
    %c3_65 = arith.constant 3 : index
    %c0_66 = arith.constant 0 : index
    %c0_67 = arith.constant 0 : index
    %99 = vector.load %arg6[%c3_65, %c0_66, %c0_67] : memref<5x80x120xbf16, #tpu.memory_space<vmem>>, vector<1x80x120xbf16>
    %100 = vector.shape_cast %99 : vector<1x80x120xbf16> to vector<80x120xbf16>
    %cst_68 = arith.constant dense<0.000000e+00> : vector<4x120xf32>
    %101 = tpu.matmul %98, %100, %cst_68 {dimension_numbers = #tpu.dot_dimension_numbers<[1], [0], [0], [1], [0, 0, 1, 1], [], []>} : vector<4x80xbf16>, vector<80x120xbf16>, vector<4x120xf32> -> vector<4x120xf32>
    %102 = arith.addf %97, %101 : vector<4x120xf32>
    %103 = vector.extract_strided_slice %83 {offsets = [16, 0], sizes = [4, 80], strides = [1, 1]} : vector<20x80xbf16> to vector<4x80xbf16>
    %c4_69 = arith.constant 4 : index
    %c0_70 = arith.constant 0 : index
    %c0_71 = arith.constant 0 : index
    %104 = vector.load %arg6[%c4_69, %c0_70, %c0_71] : memref<5x80x120xbf16, #tpu.memory_space<vmem>>, vector<1x80x120xbf16>
    %105 = vector.shape_cast %104 : vector<1x80x120xbf16> to vector<80x120xbf16>
    %cst_72 = arith.constant dense<0.000000e+00> : vector<4x120xf32>
    %106 = tpu.matmul %103, %105, %cst_72 {dimension_numbers = #tpu.dot_dimension_numbers<[1], [0], [0], [1], [0, 0, 1, 1], [], []>} : vector<4x80xbf16>, vector<80x120xbf16>, vector<4x120xf32> -> vector<4x120xf32>
    %107 = arith.addf %102, %106 : vector<4x120xf32>
    %c0_73 = arith.constant 0 : index
    %c0_74 = arith.constant 0 : index
    %108 = vector.load %arg7[%c0_73, %c0_74] : memref<1x120xf32, #tpu.memory_space<vmem>>, vector<1x120xf32>
    %109 = vector.broadcast %108 : vector<1x120xf32> to vector<4x120xf32>
    %110 = arith.addf %107, %109 : vector<4x120xf32>
    %cst_75 = arith.constant 0.000000e+00 : f32
    %111 = vector.broadcast %cst_75 : f32 to vector<4x120xf32>
    %112 = arith.maximumf %110, %111 : vector<4x120xf32>
    %113 = arith.truncf %112 : vector<4x120xf32> to vector<4x120xbf16>
    %c0_76 = arith.constant 0 : index
    %c0_77 = arith.constant 0 : index
    %114 = vector.load %arg8[%c0_76, %c0_77] : memref<120x84xbf16, #tpu.memory_space<vmem>>, vector<120x84xbf16>
    %cst_78 = arith.constant dense<0.000000e+00> : vector<4x84xf32>
    %115 = tpu.matmul %113, %114, %cst_78 {dimension_numbers = #tpu.dot_dimension_numbers<[1], [0], [0], [1], [0, 0, 1, 1], [], []>} : vector<4x120xbf16>, vector<120x84xbf16>, vector<4x84xf32> -> vector<4x84xf32>
    %c0_79 = arith.constant 0 : index
    %c0_80 = arith.constant 0 : index
    %116 = vector.load %arg9[%c0_79, %c0_80] : memref<1x84xf32, #tpu.memory_space<vmem>>, vector<1x84xf32>
    %117 = vector.broadcast %116 : vector<1x84xf32> to vector<4x84xf32>
    %118 = arith.addf %115, %117 : vector<4x84xf32>
    %cst_81 = arith.constant 0.000000e+00 : f32
    %119 = vector.broadcast %cst_81 : f32 to vector<4x84xf32>
    %120 = arith.maximumf %118, %119 : vector<4x84xf32>
    %121 = arith.truncf %120 : vector<4x84xf32> to vector<4x84xbf16>
    %c0_82 = arith.constant 0 : index
    %c0_83 = arith.constant 0 : index
    %122 = vector.load %arg10[%c0_82, %c0_83] : memref<84x10xbf16, #tpu.memory_space<vmem>>, vector<84x10xbf16>
    %cst_84 = arith.constant dense<0.000000e+00> : vector<4x10xf32>
    %123 = tpu.matmul %121, %122, %cst_84 {dimension_numbers = #tpu.dot_dimension_numbers<[1], [0], [0], [1], [0, 0, 1, 1], [], []>} : vector<4x84xbf16>, vector<84x10xbf16>, vector<4x10xf32> -> vector<4x10xf32>
    %c0_85 = arith.constant 0 : index
    %c0_86 = arith.constant 0 : index
    %124 = vector.load %arg11[%c0_85, %c0_86] : memref<1x10xf32, #tpu.memory_space<vmem>>, vector<1x10xf32>
    %125 = vector.broadcast %124 : vector<1x10xf32> to vector<4x10xf32>
    %126 = arith.addf %123, %125 : vector<4x10xf32>
    %c0_87 = arith.constant 0 : index
    %c0_88 = arith.constant 0 : index
    %127 = vector.load %arg12[%c0_87, %c0_88] : memref<4x10xf32, #tpu.memory_space<vmem>>, vector<4x10xf32>
    tpu.vector_store %arg12[%c0_87, %c0_88], %126 {strides = array<i32>} : memref<4x10xf32, #tpu.memory_space<vmem>>, vector<4x10xf32>,
    return
  }
}

</mosaic_0001>

<bundles_post_ra>
// kernel: net_forward.1
= control target key start
LH: loop header
LB: loop body
LE: loop exit
PB: predicated region body
PF: predicated region fallthrough
CT: control target
= control target key end

     0   :  { %v6396_v2 = vmov 0   ;;  %vm176_vm0 = vcmask 785408   ;;  %s6383_s0 = inlined_call_operand.vmem [shape: f32[128,96], index: 0, kind: input, shape index: {}]   ;;  %s6384_s1 = inlined_call_operand.vmem [shape: bf16[5,96,212], index: 1, kind: input, shape index: {}]   ;;  %s6385_s2 = inlined_call_operand.vmem [shape: f32[1,212], index: 2, kind: input, shape index: {}]   ;;  %s6386_s3 = inlined_call_operand.vmem [shape: bf16[5,84,208], index: 3, kind: input, shape index: {}]   ;;  %s6387_s4 = inlined_call_operand.vmem [shape: f32[1,208], index: 4, kind: input, shape index: {}]   ;;  %s6388_s5 = inlined_call_operand.vmem [shape: bf16[20,113], index: 5, kind: input, shape index: {}]   ;;  %s6389_s6 = inlined_call_operand.vmem [shape: bf16[5,80,120], index: 6, kind: input, shape index: {}]   ;;  %s6390_s7 = inlined_call_operand.vmem [shape: f32[1,120], index: 7, kind: input, shape index: {}]   ;;  %s6391_s8 = inlined_call_operand.vmem [shape: bf16[120,84], index: 8, kind: input, shape index: {}]   ;;  %s6392_s9 = inlined_call_operand.vmem [shape: f32[1,84], index: 9, kind: input, shape index: {}]   ;;  %s6393_s10 = inlined_call_operand.vmem [shape: bf16[84,10], index: 10, kind: input, shape index: {}]   ;;  %s6394_s11 = inlined_call_operand.vmem [shape: f32[1,10], index: 11, kind: input, shape index: {}]   ;;  %s6395_s12 = inlined_call_operand.hbm [shape: f32[4,10], index: 12, kind: output, shape index: {}]  }
   0x1   :  { %v4173_v0 = vld [vmem:[%s6384_s1 + $0xb4] ss:$8 sps:$4 sm:$0xff]   ;;  %233 = vmatprep.mubr.bf16.mxu0 %v6396_v2  ;;  %430 = vmatprep.mubr.bf16.mxu1 %v6396_v2  ;;  %v4177_v3 = vld [vmem:[%s6384_s1 + $0xb0] ss:$8 sps:$4 sm:$0xff]   ;;  %v4179_v5 = vld [vmem:[%s6384_s1 + $0xa4] ss:$8 sps:$4 sm:$0xff]  }
   0x2   :  { %v4175_v1 = vld [vmem:[%s6384_s1 + $0x54] ss:$8 sps:$4 sm:$0xff]   ;;  %205 = vmatprep.subr.bf16.mxu0 %v4173_v0  ;;  %v4178_v4 = vld [vmem:[%s6384_s1 + $0x50] ss:$8 sps:$4 sm:$0xff]   ;;  %v4181_v6 = vld [vmem:[%s6384_s1 + $0x44] ss:$8 sps:$4 sm:$0xff]  }
   0x3   :  { %402 = vmatprep.subr.bf16.mxu1 %v4175_v1  ;;  %206 = vmatpush1.bf16.msra.mxu0 %v4177_v3  ;;  %v4183_v7 = vld [vmem:[%s6384_s1 + $0xa0] ss:$8 sps:$4 sm:$0xff]   ;;  %v4185_v9 = vld [vmem:[%s6384_s1 + $0x94] ss:$8 sps:$4 sm:$0xff]   ;;  %v4189_v11 = vld [vmem:[%s6384_s1 + $0x90] ss:$8 sps:$4 sm:$0xff]  }
   0x4   :  { %403 = vmatpush1.bf16.msra.mxu1 %v4178_v4  ;;  %207 = vmatprep.subr.bf16.mxu0 %v4179_v5  ;;  %v4184_v8 = vld [vmem:[%s6384_s1 + $0x40] ss:$8 sps:$4 sm:$0xff]   ;;  %v4187_v10 = vld [vmem:[%s6384_s1 + $0x34] ss:$8 sps:$4 sm:$0xff]   ;;  %v4190_v12 = vld [vmem:[%s6384_s1 + $0x30] ss:$8 sps:$4 sm:$0xff]  }
   0x5   :  { %404 = vmatprep.subr.bf16.mxu1 %v4181_v6  ;;  %v4191_v13 = vld [vmem:[%s6384_s1 + $0x84] ss:$8 sps:$4 sm:$0xff]   ;;  %v4195_v15 = vld [vmem:[%s6384_s1 + $0x80] ss:$8 sps:$4 sm:$0xff]   ;;  %v4197_v17 = vld [vmem:[%s6384_s1 + $0x74] ss:$8 sps:$4 sm:$0xff]  }
   0x6   :  { %v4193_v14 = vld [vmem:[%s6384_s1 + $0x24] ss:$8 sps:$4 sm:$0xff]   ;;  %v4196_v16 = vld [vmem:[%s6384_s1 + $0x20] ss:$8 sps:$4 sm:$0xff]   ;;  %v4199_v18 = vld [vmem:[%s6384_s1 + $0x14] ss:$8 sps:$4 sm:$0xff]  }
   0x7   :  { %208 = vmatpush1.bf16.msra.mxu0 %v4183_v7  ;;  %v4201_v19 = vld [vmem:[%s6384_s1 + $0x70] ss:$8 sps:$4 sm:$0xff]   ;;  %v4203_v21 = vld [vmem:[%s6384_s1 + $0x64] ss:$8 sps:$4 sm:$0xff]   ;;  %v4207_v23 = vld [vmem:[%s6384_s1 + $0x60] ss:$8 sps:$4 sm:$0xff]  }
   0x8   :  { %405 = vmatpush1.bf16.msra.mxu1 %v4184_v8  ;;  %209 = vmatprep.subr.bf16.mxu0 %v4185_v9  ;;  %v4202_v20 = vld [vmem:[%s6384_s1 + $0x10] ss:$8 sps:$4 sm:$0xff]   ;;  %v4205_v22 = vld [vmem:[%s6384_s1 + $0x4] ss:$8 sps:$4 sm:$0xff]   ;;  %v4208_v24 = vld [vmem:[%s6384_s1] ss:$8 sps:$4 sm:$0xff]  }
   0x9   :  { %406 = vmatprep.subr.bf16.mxu1 %v4187_v10  ;;  %v79_v25 = vld [vmem:[%s6383_s0 + $0x1] sm:$0xff]  ;;  %v80_v26 = vld [vmem:[%s6383_s0 + $0x9] sm:$0xff]  ;;  %v4211_v31 = vld [vmem:[%s6384_s1 + $0x114] ss:$8 sps:$4 sm:$0xff]  }
   0xa   :  { %v43_v27 = vld [vmem:[%s6383_s0] sm:$0xff]  ;;  %v44_v28 = vld [vmem:[%s6383_s0 + $0x8] sm:$0xff]  ;;  %v95_v29 = vpack.c.bf16 %v80_v26, %v79_v25  ;;  %v4209_v32 = vld [vmem:[%s6384_s1 + $0x110] ss:$8 sps:$4 sm:$0xff]  }
   0xb   :  { %210 = vmatpush1.bf16.msra.mxu0 %v4189_v11  ;;  %v59_v30 = vpack.c.bf16 %v44_v28, %v43_v27  ;;  %v81_v33 = vld [vmem:[%s6383_s0 + $0x11] sm:$0xff]  ;;  %v82_v34 = vld [vmem:[%s6383_s0 + $0x19] sm:$0xff]  ;;  %v4217_v38 = vld [vmem:[%s6384_s1 + $0x104] ss:$8 sps:$4 sm:$0xff]  }
   0xc   :  { %407 = vmatpush1.bf16.msra.mxu1 %v4190_v12  ;;  %211 = vmatprep.subr.bf16.mxu0 %v4191_v13  ;;  %v4212_v35 = vld [vmem:[%s6384_s1 + $0x170] ss:$8 sps:$4 sm:$0xff]   ;;  %v4214_v36 = vld [vmem:[%s6384_s1 + $0x174] ss:$8 sps:$4 sm:$0xff]   ;;  %v4215_v40 = vld [vmem:[%s6384_s1 + $0x100] ss:$8 sps:$4 sm:$0xff]   ;;  %v96_v43 = vpack.c.bf16 %v82_v34, %v81_v33 }
   0xd   :  { %408 = vmatprep.subr.bf16.mxu1 %v4193_v14  ;;  %v45_v37 = vld [vmem:[%s6383_s0 + $0x10] sm:$0xff]  ;;  %v46_v39 = vld [vmem:[%s6383_s0 + $0x18] sm:$0xff]  ;;  %v4220_v41 = vld [vmem:[%s6384_s1 + $0x164] ss:$8 sps:$4 sm:$0xff]  }
   0xe   :  { %v4218_v42 = vld [vmem:[%s6384_s1 + $0x160] ss:$8 sps:$4 sm:$0xff]   ;;  %v60_v44 = vpack.c.bf16 %v46_v39, %v45_v37  ;;  %v4223_v45 = vld [vmem:[%s6384_s1 + $0xf4] ss:$8 sps:$4 sm:$0xff]   ;;  %v4221_v46 = vld [vmem:[%s6384_s1 + $0xf0] ss:$8 sps:$4 sm:$0xff]  }
   0xf   :  { %212 = vmatpush1.bf16.msra.mxu0 %v4195_v15  ;;  %v4226_v47 = vld [vmem:[%s6384_s1 + $0x154] ss:$8 sps:$4 sm:$0xff]   ;;  %v4224_v48 = vld [vmem:[%s6384_s1 + $0x150] ss:$8 sps:$4 sm:$0xff]   ;;  %v4229_v49 = vld [vmem:[%s6384_s1 + $0xe4] ss:$8 sps:$4 sm:$0xff]  }
  0x10   :  { %409 = vmatpush1.bf16.msra.mxu1 %v4196_v16  ;;  %213 = vmatprep.subr.bf16.mxu0 %v4197_v17  ;;  %v83_v50 = vld [vmem:[%s6383_s0 + $0x21] sm:$0xff]  ;;  %v84_v52 = vld [vmem:[%s6383_s0 + $0x29] sm:$0xff]  ;;  %v4235_v57 = vld [vmem:[%s6384_s1 + $0xd4] ss:$8 sps:$4 sm:$0xff]  }
  0x11   :  { %410 = vmatprep.subr.bf16.mxu1 %v4199_v18  ;;  %v4232_v51 = vld [vmem:[%s6384_s1 + $0x144] ss:$8 sps:$4 sm:$0xff]   ;;  %v4227_v55 = vld [vmem:[%s6384_s1 + $0xe0] ss:$8 sps:$4 sm:$0xff]   ;;  %v97_v58 = vpack.c.bf16 %v84_v52, %v83_v50  ;;  %v4233_v60 = vld [vmem:[%s6384_s1 + $0xd0] ss:$8 sps:$4 sm:$0xff]  }
  0x12   :  { %v47_v53 = vld [vmem:[%s6383_s0 + $0x20] sm:$0xff]  ;;  %v48_v54 = vld [vmem:[%s6383_s0 + $0x28] sm:$0xff]  ;;  %v4238_v61 = vld [vmem:[%s6384_s1 + $0x134] ss:$8 sps:$4 sm:$0xff]  }
  0x13   :  { %214 = vmatpush1.bf16.msra.mxu0 %v4201_v19  ;;  %v4230_v56 = vld [vmem:[%s6384_s1 + $0x140] ss:$8 sps:$4 sm:$0xff]   ;;  %v61_v59 = vpack.c.bf16 %v48_v54, %v47_v53  ;;  %v4236_v62 = vld [vmem:[%s6384_s1 + $0x130] ss:$8 sps:$4 sm:$0xff]   ;;  %v4241_v63 = vld [vmem:[%s6384_s1 + $0xc4] ss:$8 sps:$4 sm:$0xff]  }
  0x14   :  { %411 = vmatpush1.bf16.msra.mxu1 %v4202_v20  ;;  %215 = vmatprep.subr.bf16.mxu0 %v4203_v21  ;;  %v85_v0 = vld [vmem:[%s6383_s0 + $0x31] sm:$0xff]  ;;  %v4244_v1 = vld [vmem:[%s6384_s1 + $0x124] ss:$8 sps:$4 sm:$0xff]   ;;  %v86_v3 = vld [vmem:[%s6383_s0 + $0x39] sm:$0xff] }
  0x15   :  { %412 = vmatprep.subr.bf16.mxu1 %v4205_v22  ;;  %v49_v4 = vld [vmem:[%s6383_s0 + $0x30] sm:$0xff]  ;;  %v50_v5 = vld [vmem:[%s6383_s0 + $0x38] sm:$0xff]  ;;  %v4239_v6 = vld [vmem:[%s6384_s1 + $0xc0] ss:$8 sps:$4 sm:$0xff]   ;;  %v98_v8 = vpack.c.bf16 %v86_v3, %v85_v0 }
  0x16   :  { %v4242_v7 = vld [vmem:[%s6384_s1 + $0x120] ss:$8 sps:$4 sm:$0xff]   ;;  %v62_v9 = vpack.c.bf16 %v50_v5, %v49_v4  ;;  %v4247_v10 = vld [vmem:[%s6384_s1 + $0x1d4] ss:$8 sps:$4 sm:$0xff]   ;;  %v4256_v52 = vld [vmem:[%s6384_s1 + $0x1a4] ss:$8 sps:$4 sm:$0xff]  }
  0x17   :  { %216 = vmatpush1.bf16.msra.mxu0 %v4207_v23  ;;  %v87_v11 = vld [vmem:[%s6383_s0 + $0x41] sm:$0xff]  ;;  %v88_v12 = vld [vmem:[%s6383_s0 + $0x49] sm:$0xff]  ;;  %v89_v17 = vld [vmem:[%s6383_s0 + $0x51] sm:$0xff] }
  0x18   :  { %413 = vmatpush1.bf16.msra.mxu1 %v4208_v24  ;;  %636 = vmatprep.subr.bf16.mxu0 %v4211_v31  ;;  %v51_v13 = vld [vmem:[%s6383_s0 + $0x40] sm:$0xff]  ;;  %v52_v14 = vld [vmem:[%s6383_s0 + $0x48] sm:$0xff]  ;;  %v99_v15 = vpack.c.bf16 %v88_v12, %v87_v11  ;;  %v53_v19 = vld [vmem:[%s6383_s0 + $0x50] sm:$0xff] }
  0x19   :  { %902 = vmatprep.subr.bf16.mxu1 %v4214_v36  ;;  %v63_v16 = vpack.c.bf16 %v52_v14, %v51_v13  ;;  %v90_v18 = vld [vmem:[%s6383_s0 + $0x59] sm:$0xff]  ;;  %v91_v23 = vld [vmem:[%s6383_s0 + $0x61] sm:$0xff]  ;;  %v92_v24 = vld [vmem:[%s6383_s0 + $0x69] sm:$0xff] }
  0x1a   :  { %3621 = vmatmul.mubr.msk.bf16.vlgmr.msra.gmra.mxu0 %vm176_vm0, %v95_v29  ;;  %v54_v20 = vld [vmem:[%s6383_s0 + $0x58] sm:$0xff]  ;;  %v100_v21 = vpack.c.bf16 %v90_v18, %v89_v17  ;;  %v55_v25 = vld [vmem:[%s6383_s0 + $0x60] sm:$0xff]  ;;  %v56_v26 = vld [vmem:[%s6383_s0 + $0x68] sm:$0xff]  ;;  %v101_v27 = vpack.c.bf16 %v92_v24, %v91_v23 }
  0x1b   :  { %3641 = vmatmul.mubr.msk.bf16.vlgmr.msra.gmra.mxu1 %vm176_vm0, %v59_v30  ;;  %243 = vmatprep.mubr.bf16.mxu0 %v6396_v2  ;;  %v64_v22 = vpack.c.bf16 %v54_v20, %v53_v19  ;;  %v65_v28 = vpack.c.bf16 %v56_v26, %v55_v25  ;;  %v93_v29 = vld [vmem:[%s6383_s0 + $0x71] sm:$0xff]  ;;  %v94_v30 = vld [vmem:[%s6383_s0 + $0x79] sm:$0xf]  ;;  %v777_v37 = vld [vmem:[%s6383_s0 + $0x3] sm:$0xff] }
  0x1c   :  { %440 = vmatprep.mubr.bf16.mxu1 %v6396_v2  ;;  %637 = vmatpush1.bf16.msra.mxu0 %v4209_v32  ;;  %v57_v31 = vld [vmem:[%s6383_s0 + $0x70] sm:$0xff]  ;;  %v58_v32 = vld [vmem:[%s6383_s0 + $0x78] sm:$0xf]  ;;  %v102_v33 = vpack.c.bf16 %v94_v30, %v93_v29  ;;  %v515_v53 = vld [vmem:[%s6383_s0 + $0x22] sm:$0xff] }
  0x1d   :  { %638 = vmatprep.subr.bf16.mxu0 %v4217_v38  ;;  %903 = vmatpush1.bf16.msra.mxu1 %v4212_v35  ;;  %v66_v34 = vpack.c.bf16 %v58_v32, %v57_v31  ;;  %v511_v35 = vld [vmem:[%s6383_s0 + $0x2] sm:$0xff]  ;;  %v512_v36 = vld [vmem:[%s6383_s0 + $0xa] sm:$0xff]  ;;  %v518_v0 = vld [vmem:[%s6383_s0 + $0x3a] sm:$0xff] }
  0x1e   :  { %904 = vmatprep.subr.bf16.mxu1 %v4220_v41  ;;  %v778_v38 = vld [vmem:[%s6383_s0 + $0xb] sm:$0xff]  ;;  %v527_v39 = vpack.c.bf16 %v512_v36, %v511_v35  ;;  %v784_v3 = vld [vmem:[%s6383_s0 + $0x3b] sm:$0xff] }
  0x1f   :  { %v4245_v41 = vld [vmem:[%s6384_s1 + $0x1d0] ss:$8 sps:$4 sm:$0xff]   ;;  %v4260_v4 = vld [vmem:[%s6384_s1 + $0x180] ss:$8 sps:$4 sm:$0xff]  }
  0x20   :  { %639 = vmatpush1.bf16.msra.mxu0 %v4215_v40  ;;  %v793_v40 = vpack.c.bf16 %v778_v38, %v777_v37  ;;  %v516_v54 = vld [vmem:[%s6383_s0 + $0x2a] sm:$0xff] }
  0x21   :  { %905 = vmatpush1.bf16.msra.mxu1 %v4218_v42  ;;  %640 = vmatprep.subr.bf16.mxu0 %v4223_v45  ;;  %v4250_v42 = vld [vmem:[%s6384_s1 + $0x1c4] ss:$8 sps:$4 sm:$0xff]   ;;  %v779_v45 = vld [vmem:[%s6383_s0 + $0x13] sm:$0xff] }
  0x22   :  { %3622 = vmatmul.mubr.msk.bf16.gmra.mxu0 %vm176_vm0, %v96_v43  ;;  %906 = vmatprep.subr.bf16.mxu1 %v4226_v47  ;;  %v513_v43 = vld [vmem:[%s6383_s0 + $0x12] sm:$0xff]  ;;  %v4248_v47 = vld [vmem:[%s6384_s1 + $0x1c0] ss:$8 sps:$4 sm:$0xff]  }
  0x23   :  { %3642 = vmatmul.mubr.msk.bf16.gmra.mxu1 %vm176_vm0, %v60_v44  ;;  %253 = vmatprep.mubr.bf16.mxu0 %v6396_v2  ;;  %v514_v44 = vld [vmem:[%s6383_s0 + $0x1a] sm:$0xff] }
  0x24   :  { %450 = vmatprep.mubr.bf16.mxu1 %v6396_v2  ;;  %641 = vmatpush1.bf16.msra.mxu0 %v4221_v46  ;;  %v780_v46 = vld [vmem:[%s6383_s0 + $0x1b] sm:$0xff] }
  0x25   :  { %907 = vmatpush1.bf16.msra.mxu1 %v4224_v48  ;;  %642 = vmatprep.subr.bf16.mxu0 %v4229_v49  ;;  %v4253_v48 = vld [vmem:[%s6384_s1 + $0x1b4] ss:$8 sps:$4 sm:$0xff]   ;;  %v528_v49 = vpack.c.bf16 %v514_v44, %v513_v43  ;;  %v794_v50 = vpack.c.bf16 %v780_v46, %v779_v45 }
  0x26   :  { %908 = vmatprep.subr.bf16.mxu1 %v4232_v51  ;;  %v4251_v51 = vld [vmem:[%s6384_s1 + $0x1b0] ss:$8 sps:$4 sm:$0xff]  }
  0x28   :  { %643 = vmatpush1.bf16.msra.mxu0 %v4227_v55  ;;  %v781_v55 = vld [vmem:[%s6383_s0 + $0x23] sm:$0xff] }
  0x29   :  { %909 = vmatpush1.bf16.msra.mxu1 %v4230_v56  ;;  %644 = vmatprep.subr.bf16.mxu0 %v4235_v57  ;;  %v782_v56 = vld [vmem:[%s6383_s0 + $0x2b] sm:$0xff] }
  0x2a   :  { %3623 = vmatmul.mubr.msk.bf16.gmra.mxu0 %vm176_vm0, %v97_v58  ;;  %910 = vmatprep.subr.bf16.mxu1 %v4238_v61  ;;  %v4254_v57 = vld [vmem:[%s6384_s1 + $0x1a0] ss:$8 sps:$4 sm:$0xff]   ;;  %v4259_v58 = vld [vmem:[%s6384_s1 + $0x194] ss:$8 sps:$4 sm:$0xff]   ;;  %v4257_v61 = vld [vmem:[%s6384_s1 + $0x190] ss:$8 sps:$4 sm:$0xff]  }
  0x2b   :  { %3643 = vmatmul.mubr.msk.bf16.gmra.mxu1 %vm176_vm0, %v61_v59  ;;  %263 = vmatprep.mubr.bf16.mxu0 %v6396_v2  ;;  %v529_v59 = vpack.c.bf16 %v516_v54, %v515_v53 }
  0x2c   :  { %460 = vmatprep.mubr.bf16.mxu1 %v6396_v2  ;;  %645 = vmatpush1.bf16.msra.mxu0 %v4233_v60  ;;  %v795_v60 = vpack.c.bf16 %v782_v56, %v781_v55 }
  0x2d   :  { %911 = vmatpush1.bf16.msra.mxu1 %v4236_v62  ;;  %646 = vmatprep.subr.bf16.mxu0 %v4241_v63  ;;  %v4262_v62 = vld [vmem:[%s6384_s1 + $0x184] ss:$8 sps:$4 sm:$0xff]   ;;  %v517_v63 = vld [vmem:[%s6383_s0 + $0x32] sm:$0xff] }
  0x2e   :  { %912 = vmatprep.subr.bf16.mxu1 %v4244_v1  ;;  %v783_v1 = vld [vmem:[%s6383_s0 + $0x33] sm:$0xff] }
  0x30   :  { %647 = vmatpush1.bf16.msra.mxu0 %v4239_v6 }
  0x31   :  { %913 = vmatpush1.bf16.msra.mxu1 %v4242_v7  ;;  %1168 = vmatprep.subr.bf16.mxu0 %v4247_v10 }
  0x32   :  { %3624 = vmatmul.mubr.msk.bf16.gmra.mxu0 %vm176_vm0, %v98_v8 }
  0x33   :  { %3644 = vmatmul.mubr.msk.bf16.gmra.mxu1 %vm176_vm0, %v62_v9  ;;  %273 = vmatprep.mubr.bf16.mxu0 %v6396_v2 }
  0x34   :  { %470 = vmatprep.mubr.bf16.mxu1 %v6396_v2 }
  0x3a   :  { %3625 = vmatmul.mubr.msk.bf16.gmra.mxu0 %vm176_vm0, %v99_v15 }
  0x3b   :  { %3645 = vmatmul.mubr.msk.bf16.gmra.mxu1 %vm176_vm0, %v63_v16  ;;  %283 = vmatprep.mubr.bf16.mxu0 %v6396_v2 }
  0x3c   :  { %480 = vmatprep.mubr.bf16.mxu1 %v6396_v2 }
  0x42   :  { %3626 = vmatmul.mubr.msk.bf16.gmra.mxu0 %vm176_vm0, %v100_v21 }
  0x43   :  { %3646 = vmatmul.mubr.msk.bf16.gmra.mxu1 %vm176_vm0, %v64_v22  ;;  %293 = vmatprep.mubr.bf16.mxu0 %v6396_v2 }
  0x44   :  { %490 = vmatprep.mubr.bf16.mxu1 %v6396_v2 }
  0x4a   :  { %3627 = vmatmul.mubr.msk.bf16.gmra.mxu0 %vm176_vm0, %v101_v27 }
  0x4b   :  { %3647 = vmatmul.mubr.msk.bf16.gmra.mxu1 %vm176_vm0, %v65_v28  ;;  %303 = vmatprep.mubr.bf16.mxu0 %v6396_v2 }
  0x4c   :  { %500 = vmatprep.mubr.bf16.mxu1 %v6396_v2 }
  0x52   :  { %3628 = vmatmul.mubr.msk.bf16.gmra.mxu0 %vm176_vm0, %v102_v33 }
  0x53   :  { %3648 = vmatmul.mubr.msk.bf16.gmra.mxu1 %vm176_vm0, %v66_v34  ;;  %664 = vmatprep.mubr.bf16.mxu0 %v6396_v2 }
  0x54   :  { %930 = vmatprep.mubr.bf16.mxu1 %v6396_v2 }
  0x5a   :  { %3673 = vmatmul.mubr.msk.bf16.vlgmr.msra.gmra.mxu0 %vm176_vm0, %v527_v39 }
  0x5b   :  { %3705 = vmatmul.mubr.msk.bf16.vlgmr.msra.gmra.mxu1 %vm176_vm0, %v793_v40  ;;  %674 = vmatprep.mubr.bf16.mxu0 %v6396_v2 }
  0x5c   :  { %940 = vmatprep.mubr.bf16.mxu1 %v6396_v2  ;;  %1169 = vmatpush1.bf16.msra.mxu0 %v4245_v41 }
  0x5d   :  { %1170 = vmatprep.subr.bf16.mxu0 %v4250_v42 }
  0x60   :  { %1171 = vmatpush1.bf16.msra.mxu0 %v4248_v47 }
  0x61   :  { %1172 = vmatprep.subr.bf16.mxu0 %v4253_v48 }
  0x62   :  { %3674 = vmatmul.mubr.msk.bf16.gmra.mxu0 %vm176_vm0, %v528_v49 }
  0x63   :  { %3706 = vmatmul.mubr.msk.bf16.gmra.mxu1 %vm176_vm0, %v794_v50  ;;  %684 = vmatprep.mubr.bf16.mxu0 %v6396_v2 }
  0x64   :  { %950 = vmatprep.mubr.bf16.mxu1 %v6396_v2  ;;  %1173 = vmatpush1.bf16.msra.mxu0 %v4251_v51 }
  0x65   :  { %1174 = vmatprep.subr.bf16.mxu0 %v4256_v52 }
  0x68   :  { %1175 = vmatpush1.bf16.msra.mxu0 %v4254_v57 }
  0x69   :  { %1176 = vmatprep.subr.bf16.mxu0 %v4259_v58 }
  0x6a   :  { %3675 = vmatmul.mubr.msk.bf16.gmra.mxu0 %vm176_vm0, %v529_v59 }
  0x6b   :  { %3707 = vmatmul.mubr.msk.bf16.gmra.mxu1 %vm176_vm0, %v795_v60  ;;  %694 = vmatprep.mubr.bf16.mxu0 %v6396_v2 }
  0x6c   :  { %960 = vmatprep.mubr.bf16.mxu1 %v6396_v2  ;;  %1177 = vmatpush1.bf16.msra.mxu0 %v4257_v61 }
  0x6d   :  { %17 = vsyncpa [#allocation3], 0  ;;  %1178 = vmatprep.subr.bf16.mxu0 %v4262_v62  ;;  %v530_v5 = vpack.c.bf16 %v518_v0, %v517_v63  ;;  %v796_v6 = vpack.c.bf16 %v784_v3, %v783_v1  ;;  %v519_v7 = vld [vmem:[%s6383_s0 + $0x42] sm:$0xff]  ;;  %v520_v8 = vld [vmem:[%s6383_s0 + $0x4a] sm:$0xff]  ;;  %vm1616_vm1 = vcmask 1041408   ;;  %vm1417_vm2 = vcmask 1046528  }
  0x6e   :  { %v785_v9 = vld [vmem:[%s6383_s0 + $0x43] sm:$0xff]  ;;  %v786_v10 = vld [vmem:[%s6383_s0 + $0x4b] sm:$0xff]  ;;  %v531_v11 = vpack.c.bf16 %v520_v8, %v519_v7  ;;  %v522_v14 = vld [vmem:[%s6383_s0 + $0x5a] sm:$0xff]  ;;  %vm1591_vm3 = vcmask 687104   ;;  %vm2198_vm4 = vcmask 1044480   ;;  %vm1942_vm5 = vcmask 1045504  }
  0x6f   :  { %v797_v12 = vpack.c.bf16 %v786_v10, %v785_v9  ;;  %v521_v13 = vld [vmem:[%s6383_s0 + $0x52] sm:$0xff]  ;;  %v788_v16 = vld [vmem:[%s6383_s0 + $0x5b] sm:$0xff]  ;;  %v524_v20 = vld [vmem:[%s6383_s0 + $0x6a] sm:$0xff]  ;;  %vm2867_vm6 = vcmask 924672   ;;  %vm2874_vm7 = vcmask 1040384   ;;  %vm4413_vm8 = vmmov 0  }
  0x70   :  { %1179 = vmatpush1.bf16.msra.mxu0 %v4260_v4  ;;  %v787_v15 = vld [vmem:[%s6383_s0 + $0x53] sm:$0xff]  ;;  %v532_v17 = vpack.c.bf16 %v522_v14, %v521_v13  ;;  %v523_v19 = vld [vmem:[%s6383_s0 + $0x62] sm:$0xff]  ;;  %v790_v22 = vld [vmem:[%s6383_s0 + $0x6b] sm:$0xff]  ;;  %vm2983_vm9 = vcmask 654336   ;;  %vm3438_vm10 = vcmask 1043456   ;;  %vm3434_vm11 = vcmask 982016  }
  0x71   :  { %v798_v18 = vpack.c.bf16 %v788_v16, %v787_v15  ;;  %v789_v21 = vld [vmem:[%s6383_s0 + $0x63] sm:$0xff]  ;;  %v533_v23 = vpack.c.bf16 %v524_v20, %v523_v19  ;;  %v525_v25 = vld [vmem:[%s6383_s0 + $0x72] sm:$0xff]  ;;  %v526_v26 = vld [vmem:[%s6383_s0 + $0x7a] sm:$0xf]  ;;  %s4414_s27 = smov [#allocation2]   ;;  %vm3581_vm12 = vcmask 76800  }
  0x72   :  { %3676 = vmatmul.mubr.msk.bf16.gmra.mxu0 %vm176_vm0, %v530_v5  ;;  %v799_v24 = vpack.c.bf16 %v790_v22, %v789_v21  ;;  %v791_v27 = vld [vmem:[%s6383_s0 + $0x73] sm:$0xff]  ;;  %v792_v28 = vld [vmem:[%s6383_s0 + $0x7b] sm:$0xf]  ;;  %v534_v29 = vpack.c.bf16 %v526_v26, %v525_v25  ;;  %v1043_v31 = vld [vmem:[%s6383_s0 + $0x4] sm:$0xff] }
  0x73   :  { %3708 = vmatmul.mubr.msk.bf16.gmra.mxu1 %vm176_vm0, %v796_v6  ;;  %704 = vmatprep.mubr.bf16.mxu0 %v6396_v2  ;;  %v800_v30 = vpack.c.bf16 %v792_v28, %v791_v27  ;;  %v1044_v32 = vld [vmem:[%s6383_s0 + $0xc] sm:$0xff]  ;;  %v1045_v34 = vld [vmem:[%s6383_s0 + $0x14] sm:$0xff]  ;;  %v1046_v35 = vld [vmem:[%s6383_s0 + $0x1c] sm:$0xff] }
  0x74   :  { %970 = vmatprep.mubr.bf16.mxu1 %v6396_v2  ;;  %v1059_v33 = vpack.c.bf16 %v1044_v32, %v1043_v31  ;;  %v1060_v36 = vpack.c.bf16 %v1046_v35, %v1045_v34  ;;  %v1047_v37 = vld [vmem:[%s6383_s0 + $0x24] sm:$0xff]  ;;  %v1048_v38 = vld [vmem:[%s6383_s0 + $0x2c] sm:$0xff]  ;;  %v1049_v40 = vld [vmem:[%s6383_s0 + $0x34] sm:$0xff] }
  0x75   :  { %v1061_v39 = vpack.c.bf16 %v1048_v38, %v1047_v37  ;;  %v1050_v41 = vld [vmem:[%s6383_s0 + $0x3c] sm:$0xff]  ;;  %v1051_v43 = vld [vmem:[%s6383_s0 + $0x44] sm:$0xff]  ;;  %v1052_v44 = vld [vmem:[%s6383_s0 + $0x4c] sm:$0xff] }
  0x76   :  { %v1062_v42 = vpack.c.bf16 %v1050_v41, %v1049_v40  ;;  %v1063_v45 = vpack.c.bf16 %v1052_v44, %v1051_v43  ;;  %v1053_v46 = vld [vmem:[%s6383_s0 + $0x54] sm:$0xff]  ;;  %v1054_v47 = vld [vmem:[%s6383_s0 + $0x5c] sm:$0xff]  ;;  %v1055_v49 = vld [vmem:[%s6383_s0 + $0x64] sm:$0xff] }
  0x77   :  { %v1064_v48 = vpack.c.bf16 %v1054_v47, %v1053_v46  ;;  %v1056_v50 = vld [vmem:[%s6383_s0 + $0x6c] sm:$0xff]  ;;  %v1057_v52 = vld [vmem:[%s6383_s0 + $0x74] sm:$0xff]  ;;  %v1058_v53 = vld [vmem:[%s6383_s0 + $0x7c] sm:$0xf] }
  0x78   :  { %v1065_v51 = vpack.c.bf16 %v1056_v50, %v1055_v49  ;;  %v1066_v54 = vpack.c.bf16 %v1058_v53, %v1057_v52  ;;  %v1499_v55 = vld [vmem:[%s6386_s3 + $0x50] sm:$0x33]  ;;  %v4269_v4 = vld [vmem:[%s6386_s3 + $0x44] ss:$8 sps:$4 sm:$0xff]   ;;  %v4267_v6 = vld [vmem:[%s6386_s3 + $0x40] ss:$8 sps:$4 sm:$0xff]  }
  0x79   :  { %v3788_v58 = vcombine.high %v1499_v55, %v1499_v55  ;;  %v3787_v59 = vcombine.low %v1499_v55, %v1499_v55  ;;  %v3755_v15 = vld [vmem:[%s6386_s3 + $0xa8] sm:$0x33]  ;;  %v4278_v28 = vld [vmem:[%s6386_s3 + $0x9c] ss:$8 sps:$4 sm:$0xff]   ;;  %v4279_v34 = vld [vmem:[%s6386_s3 + $0x10] ss:$8 sps:$4 sm:$0xff]  }
  0x7a   :  { %3677 = vmatmul.mubr.msk.bf16.gmra.mxu0 %vm176_vm0, %v531_v11  ;;  %v4272_v11 = vld [vmem:[%s6386_s3 + $0x34] ss:$8 sps:$4 sm:$0xff]   ;;  %v3767_v16 = vcombine.high %v3755_v15, %v3755_v15  ;;  %v4275_v20 = vld [vmem:[%s6386_s3 + $0x24] ss:$8 sps:$4 sm:$0xff]   ;;  %v4285_v43 = vld [vmem:[%s6386_s3] ss:$8 sps:$4 sm:$0xff]  }
  0x7b   :  { %3709 = vmatmul.mubr.msk.bf16.gmra.mxu1 %vm176_vm0, %v797_v12  ;;  %714 = vmatprep.mubr.bf16.mxu0 %v6396_v2  ;;  %v1814_v63 = vsel %vm1616_vm1, %v3787_v59, 0  ;;  %v4270_v12 = vld [vmem:[%s6386_s3 + $0x30] ss:$8 sps:$4 sm:$0xff]   ;;  %v4281_v31 = vld [vmem:[%s6386_s3 + $0x14] ss:$8 sps:$4 sm:$0xff]  }
  0x7c   :  { %980 = vmatprep.mubr.bf16.mxu1 %v6396_v2  ;;  %3789 = vmatprep.subr.msk.bf16.mxu0 %vm1616_vm1, %v3788_v58  ;;  %v4284_v37 = vld [vmem:[%s6386_s3 + $0x8c] ss:$8 sps:$4 sm:$0xff]   ;;  %v4290_v46 = vld [vmem:[%s6386_s3 + $0x7c] ss:$8 sps:$4 sm:$0xff]   ;;  %v4291_v55 = vld [vmem:[%s6386_s3 + $0x68] ss:$8 sps:$4 sm:$0xff]  }
  0x7d   :  { %3768 = vmatprep.subr.msk.bf16.mxu1 %vm1616_vm1, %v3767_v16  ;;  %v4287_v40 = vld [vmem:[%s6386_s3 + $0x4] ss:$8 sps:$4 sm:$0xff]  }
  0x7e   :  { %v4293_v53 = vld [vmem:[%s6386_s3 + $0x6c] ss:$8 sps:$4 sm:$0xff]  }
  0x82   :  { %3678 = vmatmul.mubr.msk.bf16.gmra.mxu0 %vm176_vm0, %v532_v17  ;;  %v3766_v17 = vcombine.low %v3755_v15, %v3755_v15 }
  0x83   :  { %3710 = vmatmul.mubr.msk.bf16.gmra.mxu1 %vm176_vm0, %v798_v18  ;;  %724 = vmatprep.mubr.bf16.mxu0 %v6396_v2 }
  0x84   :  { %990 = vmatprep.mubr.bf16.mxu1 %v6396_v2  ;;  %v1618_v22 = vsel %vm1616_vm1, %v3766_v17, 0 }
  0x85   :  { %1628 = vmatpush1.bf16.msra.mxu1 %v1618_v22 }
  0x86   :  { %1629 = vmatprep.subr.bf16.mxu1 %v4278_v28 }
  0x8a   :  { %3679 = vmatmul.mubr.msk.bf16.gmra.mxu0 %vm176_vm0, %v533_v23  ;;  %v4273_v23 = vld [vmem:[%s6386_s3 + $0x20] ss:$8 sps:$4 sm:$0xff]  }
  0x8b   :  { %3711 = vmatmul.mubr.msk.bf16.gmra.mxu1 %vm176_vm0, %v799_v24  ;;  %734 = vmatprep.mubr.bf16.mxu0 %v6396_v2 }
  0x8c   :  { %1000 = vmatprep.mubr.bf16.mxu1 %v6396_v2 }
  0x92   :  { %3680 = vmatmul.mubr.msk.bf16.gmra.mxu0 %vm176_vm0, %v534_v29 }
  0x93   :  { %3712 = vmatmul.mubr.msk.bf16.gmra.mxu1 %vm176_vm0, %v800_v30  ;;  %1196 = vmatprep.mubr.bf16.mxu0 %v6396_v2  ;;  %v4276_v30 = vld [vmem:[%s6386_s3 + $0x98] ss:$8 sps:$4 sm:$0xff]  }
  0x94   :  { %1655 = vmatprep.mubr.bf16.mxu1 %v6396_v2  ;;  %1630 = vmatpush1.bf16.msra.mxu1 %v4276_v30 }
  0x95   :  { %1631 = vmatprep.subr.bf16.mxu1 %v4284_v37 }
  0x9a   :  { %3737 = vmatmul.mubr.msk.bf16.vlgmr.msra.gmra.mxu0 %vm176_vm0, %v1059_v33 }
  0x9b   :  { %1206 = vmatprep.mubr.bf16.mxu0 %v6396_v2  ;;  %1824 = vmatpush1.bf16.msra.mxu0 %v1814_v63  ;;  %v4294_v63 = vld [vmem:[%s6386_s3 + $0x58] ss:$8 sps:$4 sm:$0xff]  }
  0x9c   :  { %1825 = vmatprep.subr.bf16.mxu0 %v4269_v4 }
  0x9f   :  { %1826 = vmatpush1.bf16.msra.mxu0 %v4267_v6 }
  0xa0   :  { %1827 = vmatprep.subr.bf16.mxu0 %v4272_v11 }
  0xa2   :  { %3738 = vmatmul.mubr.msk.bf16.gmra.mxu0 %vm176_vm0, %v1060_v36 }
  0xa3   :  { %1216 = vmatprep.mubr.bf16.mxu0 %v6396_v2  ;;  %1828 = vmatpush1.bf16.msra.mxu0 %v4270_v12 }
  0xa4   :  { %1829 = vmatprep.subr.bf16.mxu0 %v4275_v20 }
  0xa7   :  { %1830 = vmatpush1.bf16.msra.mxu0 %v4273_v23 }
  0xa8   :  { %1831 = vmatprep.subr.bf16.mxu0 %v4281_v31 }
  0xaa   :  { %3739 = vmatmul.mubr.msk.bf16.gmra.mxu0 %vm176_vm0, %v1061_v39  ;;  %v4282_v39 = vld [vmem:[%s6386_s3 + $0x88] ss:$8 sps:$4 sm:$0xff]  }
  0xab   :  { %1226 = vmatprep.mubr.bf16.mxu0 %v6396_v2  ;;  %1832 = vmatpush1.bf16.msra.mxu0 %v4279_v34 }
  0xac   :  { %1632 = vmatpush1.bf16.msra.mxu1 %v4282_v39  ;;  %1833 = vmatprep.subr.bf16.mxu0 %v4287_v40 }
  0xad   :  { %1633 = vmatprep.subr.bf16.mxu1 %v4290_v46 }
  0xaf   :  { %1834 = vmatpush1.bf16.msra.mxu0 %v4285_v43 }
  0xb2   :  { %3740 = vmatmul.mubr.msk.bf16.gmra.mxu0 %vm176_vm0, %v1062_v42 }
  0xb3   :  { %1236 = vmatprep.mubr.bf16.mxu0 %v6396_v2 }
  0xba   :  { %3741 = vmatmul.mubr.msk.bf16.gmra.mxu0 %vm176_vm0, %v1063_v45 }
  0xbb   :  { %1246 = vmatprep.mubr.bf16.mxu0 %v6396_v2 }
  0xc2   :  { %3742 = vmatmul.mubr.msk.bf16.gmra.mxu0 %vm176_vm0, %v1064_v48  ;;  %v4288_v48 = vld [vmem:[%s6386_s3 + $0x78] ss:$8 sps:$4 sm:$0xff]  }
  0xc3   :  { %1256 = vmatprep.mubr.bf16.mxu0 %v6396_v2  ;;  %1634 = vmatpush1.bf16.msra.mxu1 %v4288_v48 }
  0xc4   :  { %1635 = vmatprep.subr.bf16.mxu1 %v4293_v53 }
  0xc7   :  { %1636 = vmatpush1.bf16.msra.mxu1 %v4291_v55 }
  0xca   :  { %3743 = vmatmul.mubr.msk.bf16.gmra.mxu0 %vm176_vm0, %v1065_v51 }
  0xcb   :  { %1266 = vmatprep.mubr.bf16.mxu0 %v6396_v2 }
  0xd2   :  { %3744 = vmatmul.mubr.msk.bf16.gmra.mxu0 %vm176_vm0, %v1066_v54 }
  0xd3   :  { %1851 = vmatprep.mubr.bf16.mxu0 %v6396_v2 }
  0xda   :  { %v235_v56 = vpop.f32.mrf.mxu0 }
  0xdb   :  { %v432_v57 = vpop.f32.mrf.mxu1 }
  0xdc   :  { %v4985_v60 = vadd.f32 %v432_v57, %v235_v56  ;;  %v237_v61 = vpop.f32.mrf.mxu0 }
  0xdd   :  { %v434_v62 = vpop.f32.mrf.mxu1 }
  0xde   :  { %v4989_v0 = vadd.f32 %v434_v62, %v237_v61  ;;  %v239_v1 = vpop.f32.mrf.mxu0  ;;  %v4296_v61 = vld [vmem:[%s6386_s3 + $0x5c] ss:$8 sps:$4 sm:$0xff]  }
  0xdf   :  { %v436_v3 = vpop.f32.mrf.mxu1  ;;  %1637 = vmatprep.subr.bf16.mxu1 %v4296_v61 }
  0xe0   :  { %v4994_v5 = vadd.f32 %v436_v3, %v239_v1  ;;  %v4999_v7 = vpop.f32.mrf.mxu0  ;;  %1638 = vmatpush1.bf16.msra.mxu1 %v4294_v63 }
  0xe1   :  { %v5001_v8 = vpop.f32.mrf.mxu1 }
  0xe2   :  { %v5003_v9 = vpop.f32.mrf.mxu0 }
  0xe3   :  { %v5005_v10 = vpop.f32.mrf.mxu1 }
  0xe4   :  { %v5013_v13 = vpop.f32.mrf.mxu0 }
  0xe5   :  { %v5015_v14 = vpop.f32.mrf.mxu1 }
  0xe6   :  { %v249_v18 = vpop.f32.mrf.mxu0 }
  0xe7   :  { %v446_v19 = vpop.f32.mrf.mxu1 }
  0xe8   :  { %v5023_v21 = vadd.f32 %v446_v19, %v249_v18  ;;  %v5030_v24 = vpop.f32.mrf.mxu0 }
  0xe9   :  { %v5032_v25 = vpop.f32.mrf.mxu1 }
  0xea   :  { %v255_v26 = vpop.f32.mrf.mxu0 }
  0xeb   :  { %v452_v27 = vpop.f32.mrf.mxu1 }
  0xec   :  { %v5037_v29 = vadd.f32 %v452_v27, %v255_v26  ;;  %v5045_v32 = vpop.f32.mrf.mxu0 }
  0xed   :  { %v5047_v33 = vpop.f32.mrf.mxu1 }
  0xee   :  { %v259_v35 = vpop.f32.mrf.mxu0 }
  0xef   :  { %v456_v36 = vpop.f32.mrf.mxu1 }
  0xf0   :  { %v5055_v38 = vadd.f32 %v456_v36, %v259_v35  ;;  %v5063_v41 = vpop.f32.mrf.mxu0 }
  0xf1   :  { %v5065_v42 = vpop.f32.mrf.mxu1 }
  0xf2   :  { %v265_v44 = vpop.f32.mrf.mxu0 }
  0xf3   :  { %v462_v45 = vpop.f32.mrf.mxu1 }
  0xf4   :  { %v5073_v47 = vadd.f32 %v462_v45, %v265_v44  ;;  %v5078_v49 = vpop.f32.mrf.mxu0 }
  0xf5   :  { %v5080_v50 = vpop.f32.mrf.mxu1 }
  0xf6   :  { %v269_v51 = vpop.f32.mrf.mxu0 }
  0xf7   :  { %v466_v52 = vpop.f32.mrf.mxu1 }
  0xf8   :  { %v5085_v54 = vadd.f32 %v466_v52, %v269_v51  ;;  %v5090_v56 = vpop.f32.mrf.mxu0 }
  0xf9   :  { %v5092_v57 = vpop.f32.mrf.mxu1 }
  0xfa   :  { %v275_v58 = vpop.f32.mrf.mxu0 }
  0xfb   :  { %v472_v59 = vpop.f32.mrf.mxu1 }
  0xfc   :  { %v5097_v62 = vadd.f32 %v472_v59, %v275_v58  ;;  %v5102_v1 = vpop.f32.mrf.mxu0 }
  0xfd   :  { %v5104_v3 = vpop.f32.mrf.mxu1 }
  0xfe   :  { %v279_v4 = vpop.f32.mrf.mxu0 }
  0xff   :  { %v476_v6 = vpop.f32.mrf.mxu1 }
 0x100   :  { %v5106_v11 = vadd.f32 %v476_v6, %v279_v4  ;;  %v5108_v12 = vpop.f32.mrf.mxu0 }
 0x101   :  { %v5110_v15 = vpop.f32.mrf.mxu1 }
 0x102   :  { %v285_v16 = vpop.f32.mrf.mxu0 }
 0x103   :  { %v482_v17 = vpop.f32.mrf.mxu1 }
 0x104   :  { %v5112_v18 = vadd.f32 %v482_v17, %v285_v16  ;;  %v5114_v19 = vpop.f32.mrf.mxu0  ;;  %v5156_v16 = vld [vmem:[%s6386_s3 + $0x158] sm:$0x33] }
 0x105   :  { %v5116_v20 = vpop.f32.mrf.mxu1 }
 0x106   :  { %v289_v22 = vpop.f32.mrf.mxu0 }
 0x107   :  { %v486_v23 = vpop.f32.mrf.mxu1 }
 0x108   :  { %v5118_v26 = vadd.f32 %v486_v23, %v289_v22  ;;  %v5120_v27 = vpop.f32.mrf.mxu0  ;;  %v3852_v23 = vcombine.high %v5156_v16, %v5156_v16 }
 0x109   :  { %v5122_v28 = vpop.f32.mrf.mxu1 }
 0x10a   :  { %v295_v30 = vpop.f32.mrf.mxu0  ;;  %3853 = vmatprep.subr.msk.bf16.mxu0 %vm1616_vm1, %v3852_v23 }
 0x10b   :  { %v492_v31 = vpop.f32.mrf.mxu1 }
 0x10c   :  { %v5124_v34 = vadd.f32 %v492_v31, %v295_v30  ;;  %v5126_v35 = vpop.f32.mrf.mxu0 }
 0x10d   :  { %v5128_v36 = vpop.f32.mrf.mxu1 }
 0x10e   :  { %v299_v37 = vpop.f32.mrf.mxu0 }
 0x10f   :  { %v496_v39 = vpop.f32.mrf.mxu1 }
 0x110   :  { %v5130_v40 = vadd.f32 %v496_v39, %v299_v37  ;;  %v5132_v43 = vpop.f32.mrf.mxu0 }
 0x111   :  { %v5134_v44 = vpop.f32.mrf.mxu1 }
 0x112   :  { %v305_v45 = vpop.f32.mrf.mxu0 }
 0x113   :  { %v502_v46 = vpop.f32.mrf.mxu1 }
 0x114   :  { %v5136_v48 = vadd.f32 %v502_v46, %v305_v45  ;;  %v5138_v51 = vpop.f32.mrf.mxu0 }
 0x115   :  { %6399 = vst [vmem:[#allocation5_spill] sm:$0xff] %v5138_v51  ;;  %v5140_v52 = vpop.f32.mrf.mxu1 }
 0x116   :  { %6400 = vst [vmem:[#allocation6_spill] sm:$0xff] %v5140_v52  ;;  %v309_v53 = vpop.f32.mrf.mxu0 }
 0x117   :  { %v506_v55 = vpop.f32.mrf.mxu1 }
 0x118   :  { %v5142_v58 = vadd.f32 %v506_v55, %v309_v53  ;;  %v5144_v59 = vpop.f32.mrf.mxu0 }
 0x119   :  { %6401 = vst [vmem:[#allocation7_spill] sm:$0xff] %v5144_v59  ;;  %v5146_v61 = vpop.f32.mrf.mxu1 }
 0x11a   :  { %6402 = vst [vmem:[#allocation8_spill] sm:$0xff] %v5146_v61  ;;  %v666_v63 = vpop.f32.mrf.mxu0 }
 0x11b   :  { %v5148_v4 = vpop.f32.mrf.mxu1  ;;  %v5151_v6 = vadd.f32 %v666_v63, %v4985_v60 }
 0x11c   :  { %v668_v17 = vpop.f32.mrf.mxu0 }
 0x11d   :  { %v5158_v22 = vpop.f32.mrf.mxu1  ;;  %v5163_v30 = vadd.f32 %v668_v17, %v4989_v0 }
 0x11e   :  { %v670_v31 = vpop.f32.mrf.mxu0 }
 0x11f   :  { %v5165_v37 = vpop.f32.mrf.mxu1  ;;  %v5169_v60 = vadd.f32 %v670_v31, %v4994_v5  ;;  %v5188_v5 = vld [vmem:[%s6386_s3 + $0x100] sm:$0x33] }
 0x120   :  { %v5171_v39 = vpop.f32.mrf.mxu0  ;;  %6405 = vst [vmem:[#allocation11_spill] sm:$0xff] %v5188_v5  ;;  %v3820_v31 = vcombine.high %v5188_v5, %v5188_v5 }
 0x121   :  { %v5173_v45 = vpop.f32.mrf.mxu1 }
 0x122   :  { %v5175_v46 = vpop.f32.mrf.mxu0  ;;  %3821 = vmatprep.subr.msk.bf16.mxu1 %vm1616_vm1, %v3820_v31 }
 0x123   :  { %v5177_v53 = vpop.f32.mrf.mxu1 }
 0x124   :  { %v5179_v55 = vpop.f32.mrf.mxu0 }
 0x125   :  { %v5181_v0 = vpop.f32.mrf.mxu1 }
 0x126   :  { %6403 = vst [vmem:[#allocation9_spill] sm:$0xff] %v5181_v0  ;;  %v680_v63 = vpop.f32.mrf.mxu0 }
 0x127   :  { %v5183_v17 = vpop.f32.mrf.mxu1  ;;  %v5191_v23 = vadd.f32 %v680_v63, %v5023_v21 }
 0x128   :  { %6404 = vst [vmem:[#allocation10_spill] sm:$0xff] %v5183_v17  ;;  %v5195_v2 = vpop.f32.mrf.mxu0 }
 0x129   :  { %6406 = vst [vmem:[#allocation12_spill] sm:$0xff] %v5191_v23  ;;  %v5197_v61 = vpop.f32.mrf.mxu1 }
 0x12a   :  { %6407 = vst [vmem:[#allocation13_spill] sm:$0xff] %v5197_v61  ;;  %v686_v59 = vpop.f32.mrf.mxu0 }
 0x12b   :  { %v5201_v17 = vadd.f32 %v686_v59, %v5037_v29  ;;  %v5203_v52 = vpop.f32.mrf.mxu1 }
 0x12c   :  { %6409 = vst [vmem:[#allocation15_spill] sm:$0xff] %v5203_v52  ;;  %v5205_v51 = vpop.f32.mrf.mxu0 }
 0x12d   :  { %6408 = vst [vmem:[#allocation14_spill] sm:$0xff] %v5201_v17  ;;  %v5210_v63 = vpop.f32.mrf.mxu1 }
 0x12e   :  { %v690_v0 = vpop.f32.mrf.mxu0  ;;  %6411 = vst [vmem:[#allocation17_spill] sm:$0xff] %v5210_v63 }
 0x12f   :  { %v5208_v21 = vadd.f32 %v690_v0, %v5055_v38  ;;  %v5214_v61 = vpop.f32.mrf.mxu1 }
 0x130   :  { %v5212_v23 = vpop.f32.mrf.mxu0  ;;  %6412 = vst [vmem:[#allocation18_spill] sm:$0xff] %v5214_v61 }
 0x131   :  { %6410 = vst [vmem:[#allocation16_spill] sm:$0xff] %v5208_v21  ;;  %v5221_v52 = vpop.f32.mrf.mxu1 }
 0x132   :  { %v696_v5 = vpop.f32.mrf.mxu0  ;;  %6414 = vst [vmem:[#allocation20_spill] sm:$0xff] %v5221_v52 }
 0x133   :  { %v5217_v31 = vadd.f32 %v696_v5, %v5073_v47  ;;  %v5228_v21 = vpop.f32.mrf.mxu1 }
 0x134   :  { %v5219_v29 = vpop.f32.mrf.mxu0 }
 0x135   :  { %6413 = vst [vmem:[#allocation19_spill] sm:$0xff] %v5217_v31  ;;  %v5235_v5 = vpop.f32.mrf.mxu1 }
 0x136   :  { %v700_v59 = vpop.f32.mrf.mxu0 }
 0x137   :  { %v5224_v17 = vadd.f32 %v700_v59, %v5085_v54  ;;  %v5242_v59 = vpop.f32.mrf.mxu1 }
 0x138   :  { %v5226_v38 = vpop.f32.mrf.mxu0 }
 0x139   :  { %6415 = vst [vmem:[#allocation21_spill] sm:$0xff] %v5224_v17  ;;  %6416 = vst [vmem:[#allocation22_spill] sm:$0xff] %v5226_v38 }
 0x13a   :  { %v706_v0 = vpop.f32.mrf.mxu0 }
 0x13b   :  { %v5231_v63 = vadd.f32 %v706_v0, %v5097_v62  ;;  %v5249_v0 = vpop.f32.mrf.mxu1 }
 0x13c   :  { %v5233_v61 = vpop.f32.mrf.mxu0  ;;  %6423 = vst [vmem:[#allocation29_spill] sm:$0xff] %v5249_v0 }
 0x13d   :  { %6417 = vst [vmem:[#allocation23_spill] sm:$0xff] %v5231_v63  ;;  %6418 = vst [vmem:[#allocation24_spill] sm:$0xff] %v5233_v61 }
 0x13e   :  { %v710_v47 = vpop.f32.mrf.mxu0 }
 0x13f   :  { %v5238_v31 = vadd.f32 %v710_v47, %v5106_v11  ;;  %v5256_v47 = vpop.f32.mrf.mxu1 }
 0x140   :  { %v5240_v52 = vpop.f32.mrf.mxu0 }
 0x141   :  { %6419 = vst [vmem:[#allocation25_spill] sm:$0xff] %v5238_v31  ;;  %6420 = vst [vmem:[#allocation26_spill] sm:$0xff] %v5240_v52 }
 0x142   :  { %v716_v54 = vpop.f32.mrf.mxu0 }
 0x143   :  { %v5245_v17 = vadd.f32 %v716_v54, %v5112_v18  ;;  %v1311_v18 = vlaneseq }
 0x144   :  { %v5247_v38 = vpop.f32.mrf.mxu0 }
 0x145   :  { %6421 = vst [vmem:[#allocation27_spill] sm:$0xff] %v5245_v17  ;;  %6422 = vst [vmem:[#allocation28_spill] sm:$0xff] %v5247_v38  ;;  %v5263_v17 = vpop.f32.mrf.mxu1 }
 0x146   :  { %v720_v62 = vpop.f32.mrf.mxu0 }
 0x147   :  { %v5252_v63 = vadd.f32 %v720_v62, %v5118_v26  ;;  %v5270_v26 = vshrl.u32 %v1311_v18, 7 }
 0x148   :  { %v5254_v61 = vpop.f32.mrf.mxu0 }
 0x149   :  { %6424 = vst [vmem:[#allocation30_spill] sm:$0xff] %v5252_v63  ;;  %6425 = vst [vmem:[#allocation31_spill] sm:$0xff] %v5254_v61  ;;  %v5272_v63 = vpop.f32.mrf.mxu1 }
 0x14a   :  { %v726_v11 = vpop.f32.mrf.mxu0 }
 0x14b   :  { %v5259_v31 = vadd.f32 %v726_v11, %v5124_v34  ;;  %v1313_v11 = vsub.s32 0, %v5270_v26 }
 0x14c   :  { %v5261_v52 = vpop.f32.mrf.mxu0 }
 0x14d   :  { %6426 = vst [vmem:[#allocation32_spill] sm:$0xff] %v5259_v31  ;;  %6427 = vst [vmem:[#allocation33_spill] sm:$0xff] %v5261_v52 }
 0x14e   :  { %v730_v54 = vpop.f32.mrf.mxu0 }
 0x14f   :  { %v5266_v38 = vadd.f32 %v730_v54, %v5130_v40  ;;  %v1309_v40 = vld [vmem:[%s6385_s2] sm:$0x3]  ;;  %v5283_v54 = vpop.f32.mrf.mxu1 }
 0x150   :  { %v5268_v0 = vpop.f32.mrf.mxu0 }
 0x151   :  { %6428 = vst [vmem:[#allocation34_spill] sm:$0xff] %v5266_v38  ;;  %6429 = vst [vmem:[#allocation35_spill] sm:$0xff] %v5268_v0  ;;  %v5304_v38 = vpop.f32.mrf.mxu1 }
 0x152   :  { %v736_v62 = vpop.f32.mrf.mxu0 }
 0x153   :  { %v5275_v61 = vadd.f32 %v736_v62, %v5136_v48  ;;  %v439_v48 = vadd.f32 %v5001_v8, %v4999_v7  ;;  %v1011_v62 = vadd.f32 %v5148_v4, %v5151_v6  ;;  %v6433_v7 = vsub.s32 1, %v5270_v26 }
 0x154   :  { %v5277_v34 = vpop.f32.mrf.mxu0  ;;  %v445_v4 = vadd.f32 %v5015_v14, %v5013_v13  ;;  %v449_v6 = vadd.f32 %v5032_v25, %v5030_v24  ;;  %v465_v13 = vadd.f32 %v5080_v50, %v5078_v49  ;;  %v469_v14 = vadd.f32 %v5092_v57, %v5090_v56 }
 0x155   :  { %6430 = vst [vmem:[#allocation36_spill] sm:$0xff] %v5275_v61  ;;  %6431 = vst [vmem:[#allocation37_spill] sm:$0xff] %v5277_v34  ;;  %v5297_v61 = vrot.slane %v1309_v40, %v1313_v11  ;;  %v443_v34 = vadd.f32 %v5005_v10, %v5003_v9  ;;  %v5308_v8 = vrot.slane %v1309_v40, %v6433_v7  ;;  %v6441_v7 = vld [vmem:[#allocation10_spill] sm:$0xff] }
 0x156   :  { %v740_v31 = vpop.f32.mrf.mxu0  ;;  %v455_v9 = vadd.f32 %v5047_v33, %v5045_v32  ;;  %v5328_v24 = vadd.f32 %v5104_v3, %v5102_v1  ;;  %v5332_v25 = vadd.f32 %v5110_v15, %v5108_v12  ;;  %v5341_v56 = vadd.f32 %v5116_v20, %v5114_v19 }
 0x157   :  { %v5286_v18 = vadd.f32 %v740_v31, %v5142_v58  ;;  %v1012_v58 = vadd.f32 %v5158_v22, %v5163_v30  ;;  %v748_v31 = vadd.f32 %v5171_v39, %v439_v48  ;;  %v749_v10 = vadd.f32 %v5175_v46, %v443_v34  ;;  %v6435_v46 = vld [vmem:[#allocation9_spill] sm:$0xff] }
 0x158   :  { %v5289_v0 = vpop.f32.mrf.mxu0  ;;  %v459_v30 = vadd.f32 %v5065_v42, %v5063_v41  ;;  %v750_v41 = vadd.f32 %v5179_v55, %v445_v4  ;;  %v5336_v42 = vpop.f32.mrf.mxu1  ;;  %v5345_v57 = vadd.f32 %v5122_v28, %v5120_v27  ;;  %v5349_v1 = vadd.f32 %v5128_v36, %v5126_v35  ;;  %v6434_v35 = vld [vmem:[#allocation11_spill] sm:$0xff] }
 0x159   :  { %6432 = vst [vmem:[#allocation38_spill] sm:$0xff] %v5286_v18  ;;  %v1014_v33 = vadd.f32 %v5173_v45, %v748_v31  ;;  %v1015_v3 = vadd.f32 %v5177_v53, %v749_v10  ;;  %v5355_v19 = vadd.f32 %v5134_v44, %v5132_v43  ;;  %v752_v20 = vadd.f32 %v5195_v2, %v449_v6  ;;  %v6436_v43 = vld [vmem:[#allocation5_spill] sm:$0xff]  ;;  %v6437_v44 = vld [vmem:[#allocation6_spill] sm:$0xff]  ;;  %v6438_v2 = vld [vmem:[#allocation7_spill] sm:$0xff] }
 0x15a   :  { %v1198_v52 = vpop.f32.mrf.mxu0  ;;  %v3851_v28 = vcombine.low %v5156_v16, %v5156_v16  ;;  %v3819_v36 = vcombine.low %v6434_v35, %v6434_v35  ;;  %v1016_v53 = vadd.f32 %v6435_v46, %v750_v41  ;;  %v5363_v55 = vpop.f32.mrf.mxu1  ;;  %v6440_v16 = vld [vmem:[#allocation12_spill] sm:$0xff]  ;;  %v754_v6 = vadd.f32 %v5205_v51, %v455_v9 }
 0x15b   :  { %v1277_v18 = vadd.f32 %v1198_v52, %v1011_v62  ;;  %v1013_v52 = vadd.f32 %v5165_v37, %v5169_v60  ;;  %v5370_v62 = vadd.f32 %v6437_v44, %v6436_v43  ;;  %v1017_v4 = vadd.f32 %v6441_v7, %v6440_v16  ;;  %v6448_v43 = vld [vmem:[#allocation20_spill] sm:$0xff]  ;;  %v6450_v16 = vld [vmem:[#allocation22_spill] sm:$0xff] }
 0x15c   :  { %v1200_v22 = vpop.f32.mrf.mxu0  ;;  %v756_v41 = vadd.f32 %v5212_v23, %v459_v30  ;;  %v5389_v51 = vpop.f32.mrf.mxu1  ;;  %v760_v7 = vadd.f32 %v6450_v16, %v469_v14 }
 0x15d   :  { %v1321_v39 = vadd.f32 %v5297_v61, %v1277_v18  ;;  %v1278_v40 = vadd.f32 %v1200_v22, %v1012_v58  ;;  %v6439_v58 = vld [vmem:[#allocation8_spill] sm:$0xff] }
 0x15e   :  { %v1202_v32 = vpop.f32.mrf.mxu0  ;;  %v5374_v31 = vadd.f32 %v6439_v58, %v6438_v2  ;;  %v1022_v44 = vadd.f32 %v6448_v43, %v756_v41  ;;  %v6449_v2 = vld [vmem:[#allocation19_spill] sm:$0xff] }
 0x15f   :  { %v1322_v49 = vadd.f32 %v5308_v8, %v1278_v40  ;;  %v1279_v50 = vadd.f32 %v1202_v32, %v1013_v52  ;;  %v1353_v15 = vmax.f32 %v1321_v39, 0.0  ;;  %v6442_v32 = vld [vmem:[#allocation13_spill] sm:$0xff]  ;;  %v1023_v58 = vadd.f32 %v5228_v21, %v6449_v2 }
 0x160   :  { %v1204_v12 = vpop.f32.mrf.mxu0 }
 0x161   :  { %v1354_v37 = vmax.f32 %v1322_v49, 0.0  ;;  %v1323_v60 = vadd.f32 %v5297_v61, %v1279_v50  ;;  %v1280_v45 = vadd.f32 %v1204_v12, %v1014_v33  ;;  %v1018_v33 = vadd.f32 %v6442_v32, %v752_v20 }
 0x162   :  { %v1208_v27 = vpop.f32.mrf.mxu0  ;;  %v5383_v50 = vsel %vm1616_vm1, %v3851_v28, 0  ;;  %v758_v12 = vadd.f32 %v5219_v29, %v465_v13  ;;  %v6446_v13 = vld [vmem:[#allocation16_spill] sm:$0xff] }
 0x163   :  { %v5365_v34 = vmax.f32 %v1353_v15, %v1354_v37  ;;  %v1324_v18 = vadd.f32 %v5308_v8, %v1280_v45  ;;  %v1281_v48 = vadd.f32 %v1208_v27, %v1015_v3  ;;  %v1355_v22 = vmax.f32 %v1323_v60, 0.0  ;;  %v6443_v60 = vld [vmem:[#allocation14_spill] sm:$0xff]  ;;  %v6444_v45 = vld [vmem:[#allocation15_spill] sm:$0xff]  ;;  %v6445_v27 = vld [vmem:[#allocation17_spill] sm:$0xff] }
 0x164   :  { %v1210_v10 = vpop.f32.mrf.mxu0  ;;  %v5386_v3 = vsel %vm1616_vm1, %v3819_v36, 0  ;;  %v1019_v20 = vadd.f32 %v6444_v45, %v6443_v60  ;;  %v1020_v23 = vadd.f32 %v6445_v27, %v754_v6  ;;  %v1024_v6 = vadd.f32 %v5235_v5, %v758_v12  ;;  %v6453_v60 = vld [vmem:[#allocation29_spill] sm:$0xff]  ;;  %v6454_v27 = vld [vmem:[#allocation23_spill] sm:$0xff] }
 0x165   :  { %v1356_v52 = vmax.f32 %v1324_v18, 0.0  ;;  %v1325_v39 = vadd.f32 %v5297_v61, %v1281_v48  ;;  %v1282_v40 = vadd.f32 %v1210_v10, %v1016_v53  ;;  %v1418_v30 = vrot.slane %v5365_v34, 1  ;;  %v6447_v18 = vld [vmem:[#allocation18_spill] sm:$0xff]  ;;  %v5404_v10 = vpop.f32.mrf.mxu1 }
 0x166   :  { %v1212_v49 = vpop.f32.mrf.mxu0  ;;  %v1021_v48 = vadd.f32 %v6447_v18, %v6446_v13  ;;  %v5416_v45 = vadd.f32 %v6453_v60, %v760_v7 }
 0x167   :  { %v1386_v9 = vmax.f32 %v1355_v22, %v1356_v52  ;;  %v1326_v15 = vadd.f32 %v5308_v8, %v1282_v40  ;;  %v1283_v37 = vadd.f32 %v1212_v49, %v1017_v4  ;;  %v1357_v28 = vmax.f32 %v1325_v39, 0.0  ;;  %v6451_v40 = vld [vmem:[#allocation21_spill] sm:$0xff] }
 0x168   :  { %v1214_v35 = vpop.f32.mrf.mxu0  ;;  %v5410_v32 = vadd.f32 %v5242_v59, %v6451_v40  ;;  %v6455_v59 = vld [vmem:[#allocation26_spill] sm:$0xff] }
 0x169   :  { %v1419_v46 = vrot.slane %v1386_v9, 1  ;;  %v1358_v36 = vmax.f32 %v1326_v15, 0.0  ;;  %v1327_v53 = vadd.f32 %v5297_v61, %v1283_v37  ;;  %v1284_v29 = vadd.f32 %v1214_v35, %v1018_v33  ;;  %v6452_v33 = vld [vmem:[#allocation24_spill] sm:$0xff]  ;;  %v4303_v40 = vld [vmem:[%s6386_s3 + $0x14c] ss:$8 sps:$4 sm:$0xff]  }
 0x16a   :  { %v1218_v4 = vpop.f32.mrf.mxu0  ;;  %v762_v41 = vadd.f32 %v6452_v33, %v5328_v24  ;;  %v6459_v33 = vld [vmem:[#allocation27_spill] sm:$0xff] }
 0x16b   :  { %v1420_v22 = vsel %vm1417_vm2, %v1418_v30, %v1419_v46  ;;  %v1387_v52 = vmax.f32 %v1357_v28, %v1358_v36  ;;  %v1328_v39 = vadd.f32 %v5308_v8, %v1284_v29  ;;  %v1285_v14 = vadd.f32 %v1218_v4, %v1019_v20  ;;  %v6457_v4 = vld [vmem:[#allocation25_spill] sm:$0xff] }
 0x16c   :  { %v1465_v21 = vmax.f32 %v5365_v34, %v1420_v22  ;;  %v1220_v49 = vpop.f32.mrf.mxu0  ;;  %v1359_v5 = vmax.f32 %v1327_v53, 0.0  ;;  %v5420_v30 = vadd.f32 %v5256_v47, %v6454_v27  ;;  %v764_v28 = vadd.f32 %v6455_v59, %v5332_v25  ;;  %v994_v34 = vpop.f32.mrf.mxu1  ;;  %v6456_v47 = vld [vmem:[#allocation28_spill] sm:$0xff] }
 0x16d   :  { %v1421_v15 = vrot.slane %v1387_v52, 1  ;;  %v1360_v12 = vmax.f32 %v1328_v39, 0.0  ;;  %v1286_v37 = vadd.f32 %v1220_v49, %v1020_v23  ;;  %v1329_v24 = vadd.f32 %v5297_v61, %v1285_v14 }
 0x16e   :  { %v1222_v35 = vpop.f32.mrf.mxu0  ;;  %v5430_v29 = vadd.f32 %v5263_v17, %v762_v41  ;;  %v766_v13 = vadd.f32 %v6456_v47, %v5341_v56  ;;  %v5440_v22 = vadd.f32 %v5272_v63, %v6457_v4  ;;  %v5443_v17 = vadd.f32 %v5283_v54, %v764_v28  ;;  %v996_v63 = vpop.f32.mrf.mxu1 }
 0x16f   :  { %v1422_v20 = vsel %vm1417_vm2, %v1419_v46, %v1421_v15  ;;  %v5426_v36 = vmax.f32 %v1359_v5, %v1360_v12  ;;  %v1330_v23 = vadd.f32 %v5308_v8, %v1286_v37  ;;  %v1287_v53 = vadd.f32 %v1222_v35, %v1021_v48  ;;  %v6458_v48 = vld [vmem:[#allocation31_spill] sm:$0xff] }
 0x170   :  { %v5434_v18 = vmax.f32 %v1386_v9, %v1422_v20  ;;  %v1361_v25 = vmax.f32 %v1329_v24, 0.0  ;;  %v1224_v43 = vpop.f32.mrf.mxu0  ;;  %v768_v56 = vadd.f32 %v6458_v48, %v5345_v57  ;;  %v5461_v57 = vadd.f32 %v5336_v42, %v766_v13  ;;  %v4301_v42 = vld [vmem:[%s6386_s3 + $0x148] ss:$8 sps:$4 sm:$0xff]   ;;  %v6463_v24 = vld [vmem:[#allocation35_spill] sm:$0xff] }
 0x171   :  { %v1423_v2 = vrot.slane %v5426_v36, 1  ;;  %v1362_v16 = vmax.f32 %v1330_v23, 0.0  ;;  %v1331_v46 = vadd.f32 %v5297_v61, %v1287_v53  ;;  %v1288_v7 = vadd.f32 %v1224_v43, %v1022_v44  ;;  %v6464_v23 = vld [vmem:[#allocation32_spill] sm:$0xff] }
 0x172   :  { %v5448_v9 = vpack.c.bf16 %v5434_v18, %v1465_v21  ;;  %v1228_v39 = vpop.f32.mrf.mxu0  ;;  %v5455_v44 = vadd.f32 %v5304_v38, %v6459_v33  ;;  %v6460_v21 = vld [vmem:[#allocation33_spill] sm:$0xff]  ;;  %v772_v35 = vadd.f32 %v6463_v24, %v5355_v19  ;;  %v5491_v53 = vadd.f32 %v5404_v10, %v6464_v23  ;;  %v4312_v23 = vld [vmem:[%s6386_s3 + $0xf4] ss:$8 sps:$4 sm:$0xff]  }
 0x173   :  { %v5457_v41 = vmax.f32 %v1361_v25, %v1362_v16  ;;  %v1332_v54 = vadd.f32 %v5308_v8, %v1288_v7  ;;  %v1289_v14 = vadd.f32 %v1228_v39, %v1023_v58  ;;  %v770_v49 = vadd.f32 %v6460_v21, %v5349_v1  ;;  %v6462_v1 = vld [vmem:[#allocation30_spill] sm:$0xff] }
 0x174   :  { %v1363_v5 = vmax.f32 %v1331_v46, 0.0  ;;  %v1230_v12 = vpop.f32.mrf.mxu0  ;;  %3790 = vmatmul.mubr.msk.bf16.vlgmr.msra.gmra.mxu0 %vm1591_vm3, %v5448_v9  ;;  %v1424_v38 = vsel %vm1417_vm2, %v1421_v15, %v1423_v2  ;;  %v6461_v58 = vmov 0   ;;  %v5477_v28 = vadd.f32 %v5363_v55, %v6462_v1  ;;  %v998_v55 = vpop.f32.mrf.mxu1 }
 0x175   :  { %v1425_v37 = vrot.slane %v5457_v41, 1  ;;  %v1364_v60 = vmax.f32 %v1332_v54, 0.0  ;;  %v1333_v27 = vadd.f32 %v5297_v61, %v1289_v14  ;;  %v1290_v59 = vadd.f32 %v1230_v12, %v1024_v6  ;;  %1861 = vmatprep.mubr.bf16.mxu0 %v6461_v58  ;;  %2304 = vmatpush1.bf16.msra.mxu0 %v5383_v50  ;;  %v4306_v50 = vld [vmem:[%s6386_s3 + $0x13c] ss:$8 sps:$4 sm:$0xff]  }
 0x176   :  { %v5480_v15 = vadd.f32 %v5389_v51, %v768_v56  ;;  %v1232_v6 = vpop.f32.mrf.mxu0  ;;  %v5484_v20 = vmax.f32 %v1387_v52, %v1424_v38  ;;  %2305 = vmatprep.subr.bf16.mxu0 %v4303_v40  ;;  %v5497_v19 = vadd.f32 %v994_v34, %v770_v49  ;;  %v6465_v34 = vld [vmem:[#allocation34_spill] sm:$0xff]  ;;  %v5511_v56 = vadd.f32 %v998_v55, %v772_v35 }
 0x177   :  { %v5493_v47 = vmax.f32 %v1363_v5, %v1364_v60  ;;  %v1334_v51 = vadd.f32 %v5308_v8, %v1290_v59  ;;  %v1291_v13 = vadd.f32 %v1232_v6, %v5410_v32  ;;  %v1365_v52 = vmax.f32 %v1333_v27, 0.0  ;;  %v4304_v32 = vld [vmem:[%s6386_s3 + $0x138] ss:$8 sps:$4 sm:$0xff]  }
 0x178   :  { %v1234_v25 = vpop.f32.mrf.mxu0  ;;  %v1426_v43 = vsel %vm1417_vm2, %v1423_v2, %v1425_v37  ;;  %v2440_v16 = vpack.c.bf16 %v5484_v20, %v5434_v18  ;;  %v5509_v48 = vadd.f32 %v996_v63, %v6465_v34  ;;  %v1521_v40 = vrot.slane %v5448_v9, 1 }
 0x179   :  { %v1427_v10 = vrot.slane %v5493_v47, 1  ;;  %v1366_v46 = vmax.f32 %v1334_v51, 0.0  ;;  %v1335_v7 = vadd.f32 %v5297_v61, %v1291_v13  ;;  %v1292_v4 = vadd.f32 %v1234_v25, %v5416_v45  ;;  %2306 = vmatpush1.bf16.msra.mxu0 %v4301_v42  ;;  %v4309_v45 = vld [vmem:[%s6386_s3 + $0x12c] ss:$8 sps:$4 sm:$0xff]   ;;  %v1002_v25 = vpop.f32.mrf.mxu1 }
 0x17a   :  { %v1238_v2 = vpop.f32.mrf.mxu0  ;;  %v5514_v39 = vmax.f32 %v5426_v36, %v1426_v43  ;;  %2307 = vmatprep.subr.bf16.mxu0 %v4306_v50  ;;  %v2199_v14 = vrot.slane %v5448_v9, 3  ;;  %v1943_v12 = vrot.slane %v5448_v9, 2 }
 0x17b   :  { %v5520_v33 = vmax.f32 %v1365_v52, %v1366_v46  ;;  %v1336_v54 = vadd.f32 %v5308_v8, %v1292_v4  ;;  %v1293_v63 = vadd.f32 %v1238_v2, %v5420_v30  ;;  %v1367_v21 = vmax.f32 %v1335_v7, 0.0  ;;  %v4307_v30 = vld [vmem:[%s6386_s3 + $0x128] ss:$8 sps:$4 sm:$0xff]  }
 0x17c   :  { %v1240_v49 = vpop.f32.mrf.mxu0  ;;  %v5527_v36 = vpack.c.bf16 %v5514_v39, %v5484_v20  ;;  %v1428_v5 = vsel %vm1417_vm2, %v1425_v37, %v1427_v10 }
 0x17d   :  { %v1429_v38 = vrot.slane %v5520_v33, 1  ;;  %v1368_v60 = vmax.f32 %v1336_v54, 0.0  ;;  %v1337_v27 = vadd.f32 %v5297_v61, %v1293_v63  ;;  %v1294_v59 = vadd.f32 %v1240_v49, %v5430_v29  ;;  %2308 = vmatpush1.bf16.msra.mxu0 %v4304_v32  ;;  %v6466_v32 = vld [vmem:[#allocation37_spill] sm:$0xff] }
 0x17e   :  { %3791 = vmatmul.mubr.msk.bf16.gmra.mxu0 %vm1591_vm3, %v5527_v36  ;;  %v2200_v42 = vrot.slane %v5527_v36, 3  ;;  %v1242_v37 = vpop.f32.mrf.mxu0  ;;  %v1522_v9 = vrot.slane %v5527_v36, 1  ;;  %v5542_v1 = vmax.f32 %v5457_v41, %v1428_v5  ;;  %2309 = vmatprep.subr.bf16.mxu0 %v4309_v45  ;;  %v1944_v24 = vrot.slane %v5527_v36, 2  ;;  %v4315_v41 = vld [vmem:[%s6386_s3 + $0x11c] ss:$8 sps:$4 sm:$0xff]  }
 0x17f   :  { %v5545_v29 = vmax.f32 %v1367_v21, %v1368_v60  ;;  %v1369_v35 = vmax.f32 %v1337_v27, 0.0  ;;  %v1338_v6 = vadd.f32 %v5308_v8, %v1294_v59  ;;  %v1295_v50 = vadd.f32 %v1242_v37, %v5440_v22  ;;  %1871 = vmatprep.mubr.bf16.mxu0 %v6461_v58  ;;  %v1004_v60 = vpop.f32.mrf.mxu1 }
 0x180   :  { %v1523_v55 = vsel %vm1417_vm2, %v1521_v40, %v1522_v9  ;;  %v1244_v51 = vpop.f32.mrf.mxu0  ;;  %v1430_v13 = vsel %vm1417_vm2, %v1427_v10, %v1429_v38  ;;  %v2441_v22 = vpack.c.bf16 %v5542_v1, %v5514_v39  ;;  %v5565_v52 = vsel %vm2198_vm4, %v2199_v14, %v2200_v42  ;;  %v4313_v10 = vld [vmem:[%s6386_s3 + $0x118] ss:$8 sps:$4 sm:$0xff]  }
 0x181   :  { %v1431_v43 = vrot.slane %v5545_v29, 1  ;;  %v1370_v46 = vmax.f32 %v1338_v6, 0.0  ;;  %v1339_v7 = vadd.f32 %v5297_v61, %v1295_v50  ;;  %3769 = vmatmul.mubr.msk.bf16.vlgmr.msra.gmra.mxu1 %vm1591_vm3, %v1523_v55  ;;  %v1296_v4 = vadd.f32 %v1244_v51, %v5443_v17  ;;  %2310 = vmatpush1.bf16.msra.mxu0 %v4307_v30  ;;  %v4310_v17 = vld [vmem:[%s6386_s3 + $0xf0] ss:$8 sps:$4 sm:$0xff]  }
 0x182   :  { %v774_v34 = vadd.f32 %v6466_v32, %v5370_v62  ;;  %v1248_v2 = vpop.f32.mrf.mxu0  ;;  %v5577_v40 = vmax.f32 %v5493_v47, %v1430_v13  ;;  %1665 = vmatprep.mubr.bf16.mxu1 %v6461_v58  ;;  %2048 = vmatpush1.bf16.msra.mxu1 %v5386_v3  ;;  %v5587_v45 = vsel %vm1942_vm5, %v1943_v12, %v1944_v24  ;;  %v4318_v3 = vld [vmem:[%s6386_s3 + $0xe4] ss:$8 sps:$4 sm:$0xff]   ;;  %v6467_v47 = vld [vmem:[#allocation36_spill] sm:$0xff]  ;;  %v1006_v32 = vpop.f32.mrf.mxu1 }
 0x183   :  { %v1393_v54 = vmax.f32 %v1369_v35, %v1370_v46  ;;  %v1340_v62 = vadd.f32 %v5308_v8, %v1296_v4  ;;  %v1297_v63 = vadd.f32 %v1248_v2, %v5455_v44  ;;  %2049 = vmatprep.subr.bf16.mxu1 %v4312_v23  ;;  %2311 = vmatprep.subr.bf16.mxu0 %v4315_v41  ;;  %v1371_v21 = vmax.f32 %v1339_v7, 0.0  ;;  %v4321_v44 = vld [vmem:[%s6386_s3 + $0x10c] ss:$8 sps:$4 sm:$0xff]   ;;  %v4319_v35 = vld [vmem:[%s6386_s3 + $0x108] ss:$8 sps:$4 sm:$0xff]  }
 0x184   :  { %v5595_v14 = vadd.f32 %v1002_v25, %v6467_v47  ;;  %v1250_v49 = vpop.f32.mrf.mxu0  ;;  %v5599_v5 = vpack.c.bf16 %v5577_v40, %v5542_v1  ;;  %v1432_v12 = vsel %vm1417_vm2, %v1429_v38, %v1431_v43  ;;  %v4316_v23 = vld [vmem:[%s6386_s3 + $0xe0] ss:$8 sps:$4 sm:$0xff]  }
 0x185   :  { %v1433_v27 = vrot.slane %v1393_v54, 1  ;;  %v1372_v59 = vmax.f32 %v1340_v62, 0.0  ;;  %v1341_v30 = vadd.f32 %v5297_v61, %v1297_v63  ;;  %v1298_v37 = vadd.f32 %v1250_v49, %v5461_v57  ;;  %2312 = vmatpush1.bf16.msra.mxu0 %v4313_v10  ;;  %v6468_v49 = vld [vmem:[#allocation38_spill] sm:$0xff] }
 0x186   :  { %3792 = vmatmul.mubr.msk.bf16.gmra.mxu0 %vm1591_vm3, %v5599_v5  ;;  %v1252_v38 = vpop.f32.mrf.mxu0  ;;  %v1524_v6 = vrot.slane %v5599_v5, 1  ;;  %v5614_v50 = vmax.f32 %v5520_v33, %v1432_v12  ;;  %2050 = vmatpush1.bf16.msra.mxu1 %v4310_v17  ;;  %v2202_v57 = vrot.slane %v5599_v5, 3  ;;  %v1946_v41 = vrot.slane %v5599_v5, 2  ;;  %v4324_v33 = vld [vmem:[%s6386_s3 + $0xd4] ss:$8 sps:$4 sm:$0xff]  }
 0x187   :  { %v1394_v55 = vmax.f32 %v1371_v21, %v1372_v59  ;;  %v1373_v51 = vmax.f32 %v1341_v30, 0.0  ;;  %v1342_v13 = vadd.f32 %v5308_v8, %v1298_v37  ;;  %v1299_v25 = vadd.f32 %v1252_v38, %v5477_v28  ;;  %1881 = vmatprep.mubr.bf16.mxu0 %v6461_v58  ;;  %2051 = vmatprep.subr.bf16.mxu1 %v4318_v3  ;;  %v4325_v38 = vld [vmem:[%s6386_s3 + $0xc0] ss:$8 sps:$4 sm:$0xff]  }
 0x188   :  { %v1525_v46 = vsel %vm1417_vm2, %v1522_v9, %v1524_v6  ;;  %v1254_v7 = vpop.f32.mrf.mxu0  ;;  %v1434_v4 = vsel %vm1417_vm2, %v1431_v43, %v1433_v27  ;;  %v2442_v10 = vpack.c.bf16 %v5614_v50, %v5577_v40  ;;  %2313 = vmatprep.subr.bf16.mxu0 %v4321_v44  ;;  %v5640_v28 = vsel %vm2198_vm4, %v2200_v42, %v2202_v57  ;;  %v4322_v42 = vld [vmem:[%s6386_s3 + $0xd0] ss:$8 sps:$4 sm:$0xff]  }
 0x189   :  { %v1435_v2 = vrot.slane %v1394_v55, 1  ;;  %v1374_v17 = vmax.f32 %v1342_v13, 0.0  ;;  %v1343_v62 = vadd.f32 %v5297_v61, %v1299_v25  ;;  %3770 = vmatmul.mubr.msk.bf16.gmra.mxu1 %vm1591_vm3, %v1525_v46  ;;  %v1300_v9 = vadd.f32 %v1254_v7, %v5480_v15  ;;  %2314 = vmatpush1.bf16.msra.mxu0 %v4319_v35  ;;  %v4330_v46 = vld [vmem:[%s6386_s3 + $0xb4] ss:$8 sps:$4 sm:$0xff]  }
 0x18a   :  { %v5645_v43 = vadd.f32 %v1004_v60, %v774_v34  ;;  %v1258_v63 = vpop.f32.mrf.mxu0  ;;  %v5648_v3 = vmax.f32 %v5545_v29, %v1434_v4  ;;  %1675 = vmatprep.mubr.bf16.mxu1 %v6461_v58  ;;  %2052 = vmatpush1.bf16.msra.mxu1 %v4316_v23  ;;  %v5659_v15 = vsel %vm1942_vm5, %v1944_v24, %v1946_v41  ;;  %v5699_v7 = vld [vmem:[%s6386_s3 + $0x1b0] sm:$0x33] }
 0x18b   :  { %v776_v34 = vadd.f32 %v5289_v0, %v5374_v31  ;;  %v1436_v29 = vsel %vm1417_vm2, %v1433_v27, %v1435_v2  ;;  %v1395_v47 = vmax.f32 %v1373_v51, %v1374_v17  ;;  %v1344_v21 = vadd.f32 %v5308_v8, %v1300_v9  ;;  %2053 = vmatprep.subr.bf16.mxu1 %v4324_v33  ;;  %v4327_v0 = vld [vmem:[%s6386_s3 + $0xc4] ss:$8 sps:$4 sm:$0xff]   ;;  %v1008_v51 = vpop.f32.mrf.mxu1 }
 0x18c   :  { %v5666_v12 = vadd.f32 %v1006_v32, %v6468_v49  ;;  %v5668_v44 = vmax.f32 %v1393_v54, %v1436_v29  ;;  %v1301_v60 = vadd.f32 %v1258_v63, %v5491_v53  ;;  %v1260_v36 = vpop.f32.mrf.mxu0  ;;  %v5673_v24 = vpack.c.bf16 %v5648_v3, %v5614_v50 }
 0x18d   :  { %v1437_v31 = vrot.slane %v1395_v47, 1  ;;  %v1375_v27 = vmax.f32 %v1343_v62, 0.0  ;;  %v1376_v59 = vmax.f32 %v1344_v21, 0.0  ;;  %v1302_v30 = vadd.f32 %v1260_v36, %v5497_v19 }
 0x18e   :  { %v1345_v37 = vadd.f32 %v5297_v61, %v1301_v60  ;;  %3793 = vmatmul.mubr.msk.bf16.gmra.mxu0 %vm1591_vm3, %v5673_v24  ;;  %v2443_v53 = vpack.c.bf16 %v5668_v44, %v5648_v3  ;;  %v1262_v54 = vpop.f32.mrf.mxu0  ;;  %v1526_v35 = vrot.slane %v5673_v24, 1  ;;  %2054 = vmatpush1.bf16.msra.mxu1 %v4322_v42  ;;  %v2204_v23 = vrot.slane %v5673_v24, 3 }
 0x18f   :  { %v1438_v19 = vsel %vm1417_vm2, %v1435_v2, %v1437_v31  ;;  %v1396_v13 = vmax.f32 %v1375_v27, %v1376_v59  ;;  %v1346_v25 = vadd.f32 %v5308_v8, %v1302_v30  ;;  %v1303_v33 = vadd.f32 %v1262_v54, %v5509_v48  ;;  %1891 = vmatprep.mubr.bf16.mxu0 %v6461_v58 }
 0x190   :  { %v5701_v4 = vmax.f32 %v1394_v55, %v1438_v19  ;;  %v1377_v32 = vmax.f32 %v1345_v37, 0.0  ;;  %v1527_v2 = vsel %vm1417_vm2, %v1524_v6, %v1526_v35  ;;  %v1264_v17 = vpop.f32.mrf.mxu0  ;;  %2055 = vmatprep.subr.bf16.mxu1 %v4327_v0  ;;  %v5709_v48 = vsel %vm2198_vm4, %v2202_v57, %v2204_v23  ;;  %v4328_v57 = vld [vmem:[%s6386_s3 + $0xb0] ss:$8 sps:$4 sm:$0xff]  }
 0x191   :  { %v1439_v62 = vrot.slane %v1396_v13, 1  ;;  %v1378_v9 = vmax.f32 %v1346_v25, 0.0  ;;  %v1347_v63 = vadd.f32 %v5297_v61, %v1303_v33  ;;  %3771 = vmatmul.mubr.msk.bf16.gmra.mxu1 %vm1591_vm3, %v1527_v2  ;;  %v1304_v55 = vadd.f32 %v1264_v17, %v5511_v56 }
 0x192   :  { %v1042_v42 = vadd.f32 %v1008_v51, %v776_v34  ;;  %v1268_v29 = vpop.f32.mrf.mxu0  ;;  %v1485_v6 = vpack.c.bf16 %v5701_v4, %v5668_v44  ;;  %1685 = vmatprep.mubr.bf16.mxu1 %v6461_v58  ;;  %2056 = vmatpush1.bf16.msra.mxu1 %v4325_v38  ;;  %v1948_v21 = vrot.slane %v5673_v24, 2  ;;  %v3884_v49 = vcombine.high %v5699_v7, %v5699_v7 }
 0x193   :  { %v1440_v60 = vsel %vm1417_vm2, %v1437_v31, %v1439_v62  ;;  %v1397_v56 = vmax.f32 %v1377_v32, %v1378_v9  ;;  %v1379_v34 = vmax.f32 %v1347_v63, 0.0  ;;  %v1348_v36 = vadd.f32 %v5308_v8, %v1304_v55  ;;  %2057 = vmatprep.subr.bf16.mxu1 %v4330_v46 }
 0x194   :  { %v5725_v0 = vmax.f32 %v1395_v47, %v1440_v60  ;;  %v1305_v27 = vadd.f32 %v1268_v29, %v5595_v14  ;;  %v1270_v59 = vpop.f32.mrf.mxu0  ;;  %v1528_v30 = vrot.slane %v1485_v6, 1  ;;  %v2206_v37 = vrot.slane %v1485_v6, 3 }
 0x195   :  { %v1441_v54 = vrot.slane %v1397_v56, 1  ;;  %v1380_v38 = vmax.f32 %v1348_v36, 0.0  ;;  %v1306_v24 = vadd.f32 %v1270_v59, %v5645_v43  ;;  %v5732_v31 = vsel %vm1942_vm5, %v1946_v41, %v1948_v21 }
 0x196   :  { %v1349_v51 = vadd.f32 %v5297_v61, %v1305_v27  ;;  %3794 = vmatmul.mubr.msk.bf16.gmra.mxu0 %vm1591_vm3, %v1485_v6  ;;  %v1272_v47 = vpop.f32.mrf.mxu0  ;;  %v1529_v19 = vsel %vm1417_vm2, %v1526_v35, %v1528_v30  ;;  %2058 = vmatpush1.bf16.msra.mxu1 %v4328_v57  ;;  %v5738_v14 = vsel %vm2198_vm4, %v2204_v23, %v2206_v37  ;;  %v1950_v25 = vrot.slane %v1485_v6, 2 }
 0x197   :  { %v1442_v33 = vsel %vm1417_vm2, %v1439_v62, %v1441_v54  ;;  %v1398_v43 = vmax.f32 %v1379_v34, %v1380_v38  ;;  %v1350_v5 = vadd.f32 %v5308_v8, %v1306_v24  ;;  %v1307_v41 = vadd.f32 %v1272_v47, %v5666_v12  ;;  %1901 = vmatprep.mubr.bf16.mxu0 %v6461_v58 }
 0x198   :  { %v5744_v46 = vmax.f32 %v1396_v13, %v1442_v33  ;;  %v1381_v32 = vmax.f32 %v1349_v51, 0.0  ;;  %v1274_v2 = vpop.f32.mrf.mxu0  ;;  %v5747_v35 = vsel %vm1942_vm5, %v1948_v21, %v1950_v25  ;;  %3885 = vmatprep.subr.msk.bf16.mxu1 %vm1616_vm1, %v3884_v49  ;;  %v2444_v23 = vpack.c.bf16 %v5725_v0, %v5701_v4 }
 0x199   :  { %v1443_v17 = vrot.slane %v1398_v43, 1  ;;  %v1382_v62 = vmax.f32 %v1350_v5, 0.0  ;;  %v1351_v9 = vadd.f32 %v5297_v61, %v1307_v41  ;;  %3772 = vmatmul.mubr.msk.bf16.gmra.mxu1 %vm1591_vm3, %v1529_v19  ;;  %v1308_v12 = vadd.f32 %v1274_v2, %v1042_v42 }
 0x19a   :  { %v1486_v13 = vpack.c.bf16 %v5744_v46, %v5725_v0  ;;  %1695 = vmatprep.mubr.bf16.mxu1 %v6461_v58 }
 0x19b   :  { %v1444_v63 = vsel %vm1417_vm2, %v1441_v54, %v1443_v17  ;;  %v1399_v55 = vmax.f32 %v1381_v32, %v1382_v62  ;;  %v1352_v29 = vadd.f32 %v5308_v8, %v1308_v12  ;;  %v1383_v61 = vmax.f32 %v1351_v9, 0.0 }
 0x19c   :  { %v5759_v6 = vmax.f32 %v1397_v56, %v1444_v63  ;;  %v1530_v57 = vrot.slane %v1486_v13, 1  ;;  %v2208_v21 = vrot.slane %v1486_v13, 3  ;;  %v1952_v49 = vrot.slane %v1486_v13, 2 }
 0x19d   :  { %v1445_v60 = vrot.slane %v1399_v55, 1  ;;  %v1384_v34 = vmax.f32 %v1352_v29, 0.0 }
 0x19e   :  { %3795 = vmatmul.mubr.msk.bf16.gmra.mxu0 %vm1591_vm3, %v1486_v13  ;;  %v1531_v42 = vsel %vm1417_vm2, %v1528_v30, %v1530_v57  ;;  %v5764_v36 = vsel %vm2198_vm4, %v2206_v37, %v2208_v21  ;;  %v5767_v27 = vsel %vm1942_vm5, %v1950_v25, %v1952_v49  ;;  %v2445_v8 = vpack.c.bf16 %v5759_v6, %v5744_v46 }
 0x19f   :  { %v1446_v56 = vsel %vm1417_vm2, %v1443_v17, %v1445_v60  ;;  %v1400_v59 = vmax.f32 %v1383_v61, %v1384_v34  ;;  %1911 = vmatprep.mubr.bf16.mxu0 %v6461_v58 }
 0x1a0   :  { %v5773_v54 = vmax.f32 %v1398_v43, %v1446_v56 }
 0x1a1   :  { %v1447_v38 = vrot.slane %v1400_v59, 1  ;;  %3773 = vmatmul.mubr.msk.bf16.gmra.mxu1 %vm1591_vm3, %v1531_v42 }
 0x1a2   :  { %v1487_v30 = vpack.c.bf16 %v5773_v54, %v5759_v6  ;;  %1705 = vmatprep.mubr.bf16.mxu1 %v6461_v58 }
 0x1a3   :  { %v1448_v37 = vsel %vm1417_vm2, %v1445_v60, %v1447_v38  ;;  %v5780_v24 = vmax.f32 %v1400_v59, %v1447_v38 }
 0x1a4   :  { %v5782_v51 = vmax.f32 %v1399_v55, %v1448_v37  ;;  %v1532_v47 = vrot.slane %v1487_v30, 1  ;;  %v2210_v19 = vrot.slane %v1487_v30, 3  ;;  %v1954_v25 = vrot.slane %v1487_v30, 2 }
 0x1a5   :  { %v3883_v55 = vcombine.low %v5699_v7, %v5699_v7  ;;  %v4333_v7 = vld [vmem:[%s6386_s3 + $0x1a0] ss:$8 sps:$4 sm:$0xff]  }
 0x1a6   :  { %v2184_v33 = vpack.c.bf16 %v5780_v24, %v5782_v51  ;;  %3796 = vmatmul.mubr.msk.bf16.gmra.mxu0 %vm1591_vm3, %v1487_v30  ;;  %v1533_v43 = vsel %vm1417_vm2, %v1530_v57, %v1532_v47  ;;  %v5790_v5 = vpack.c.bf16 %v5782_v51, %v5782_v51  ;;  %v2211_v41 = vsel %vm2198_vm4, %v2208_v21, %v2210_v19  ;;  %v4341_v57 = vld [vmem:[%s6386_s3 + $0x184] ss:$8 sps:$4 sm:$0xff]   ;;  %v4344_v21 = vld [vmem:[%s6386_s3 + $0x174] ss:$8 sps:$4 sm:$0xff]  }
 0x1a7   :  { %1921 = vmatprep.mubr.bf16.mxu0 %v6461_v58  ;;  %v5795_v32 = vsel %vm1942_vm5, %v1952_v49, %v1954_v25  ;;  %v2446_v2 = vpack.c.bf16 %v5782_v51, %v5773_v54  ;;  %v2540_v29 = vsel %vm1616_vm1, %v3883_v55, 0  ;;  %v4347_v49 = vld [vmem:[%s6386_s3 + $0x164] ss:$8 sps:$4 sm:$0xff]  }
 0x1a8   :  { %v5799_v17 = vrot.slane %v2184_v33, 3  ;;  %v1534_v62 = vrot.slane %v5790_v5, 1  ;;  %v1956_v9 = vrot.slane %v5790_v5, 2 }
 0x1a9   :  { %3774 = vmatmul.mubr.msk.bf16.gmra.mxu1 %vm1591_vm3, %v1533_v43 }
 0x1aa   :  { %1715 = vmatprep.mubr.bf16.mxu1 %v6461_v58  ;;  %v1535_v12 = vsel %vm1417_vm2, %v1532_v47, %v1534_v62  ;;  %v2213_v13 = vsel %vm2198_vm4, %v2210_v19, %v5799_v17  ;;  %v1957_v63 = vsel %vm1942_vm5, %v1954_v25, %v1956_v9 }
 0x1ae   :  { %3797 = vmatmul.mubr.msk.bf16.gmra.mxu0 %vm1591_vm3, %v5790_v5 }
 0x1af   :  { %2331 = vmatprep.mubr.bf16.mxu0 %v6461_v58 }
 0x1b1   :  { %3775 = vmatmul.mubr.msk.bf16.gmra.mxu1 %vm1591_vm3, %v1535_v12 }
 0x1b2   :  { %1725 = vmatprep.mubr.bf16.mxu1 %v6461_v58 }
 0x1b6   :  { %3854 = vmatmul.mubr.msk.bf16.vlgmr.msra.gmra.mxu0 %vm1591_vm3, %v5565_v52  ;;  %v4335_v52 = vld [vmem:[%s6386_s3 + $0x1a4] ss:$8 sps:$4 sm:$0xff]  }
 0x1b7   :  { %2341 = vmatprep.mubr.bf16.mxu0 %v6461_v58 }
 0x1b9   :  { %3776 = vmatmul.mubr.msk.bf16.gmra.mxu1 %vm1591_vm3, %v1534_v62 }
 0x1ba   :  { %2075 = vmatprep.mubr.bf16.mxu1 %v6461_v58 }
 0x1be   :  { %3855 = vmatmul.mubr.msk.bf16.gmra.mxu0 %vm1591_vm3, %v5640_v28  ;;  %v4338_v28 = vld [vmem:[%s6386_s3 + $0x194] ss:$8 sps:$4 sm:$0xff]  }
 0x1bf   :  { %2351 = vmatprep.mubr.bf16.mxu0 %v6461_v58 }
 0x1c1   :  { %3822 = vmatmul.mubr.msk.bf16.vlgmr.msra.gmra.mxu1 %vm1591_vm3, %v5587_v45  ;;  %v4336_v45 = vld [vmem:[%s6386_s3 + $0x190] ss:$8 sps:$4 sm:$0xff]  }
 0x1c2   :  { %2085 = vmatprep.mubr.bf16.mxu1 %v6461_v58  ;;  %2550 = vmatpush1.bf16.msra.mxu1 %v2540_v29 }
 0x1c3   :  { %2551 = vmatprep.subr.bf16.mxu1 %v4335_v52 }
 0x1c6   :  { %3856 = vmatmul.mubr.msk.bf16.gmra.mxu0 %vm1591_vm3, %v5709_v48  ;;  %2552 = vmatpush1.bf16.msra.mxu1 %v4333_v7  ;;  %v4339_v48 = vld [vmem:[%s6386_s3 + $0x180] ss:$8 sps:$4 sm:$0xff]  }
 0x1c7   :  { %2361 = vmatprep.mubr.bf16.mxu0 %v6461_v58  ;;  %2553 = vmatprep.subr.bf16.mxu1 %v4338_v28 }
 0x1c9   :  { %3823 = vmatmul.mubr.msk.bf16.gmra.mxu1 %vm1591_vm3, %v5659_v15  ;;  %v4342_v15 = vld [vmem:[%s6386_s3 + $0x170] ss:$8 sps:$4 sm:$0xff]  }
 0x1ca   :  { %2095 = vmatprep.mubr.bf16.mxu1 %v6461_v58  ;;  %2554 = vmatpush1.bf16.msra.mxu1 %v4336_v45 }
 0x1cb   :  { %2555 = vmatprep.subr.bf16.mxu1 %v4341_v57 }
 0x1ce   :  { %3857 = vmatmul.mubr.msk.bf16.gmra.mxu0 %vm1591_vm3, %v5738_v14  ;;  %2556 = vmatpush1.bf16.msra.mxu1 %v4339_v48  ;;  %v4345_v14 = vld [vmem:[%s6386_s3 + $0x160] ss:$8 sps:$4 sm:$0xff]  }
 0x1cf   :  { %2371 = vmatprep.mubr.bf16.mxu0 %v6461_v58  ;;  %2557 = vmatprep.subr.bf16.mxu1 %v4344_v21 }
 0x1d1   :  { %3824 = vmatmul.mubr.msk.bf16.gmra.mxu1 %vm1591_vm3, %v5732_v31 }
 0x1d2   :  { %2105 = vmatprep.mubr.bf16.mxu1 %v6461_v58  ;;  %2558 = vmatpush1.bf16.msra.mxu1 %v4342_v15 }
 0x1d3   :  { %2559 = vmatprep.subr.bf16.mxu1 %v4347_v49 }
 0x1d6   :  { %3858 = vmatmul.mubr.msk.bf16.gmra.mxu0 %vm1591_vm3, %v5764_v36  ;;  %2560 = vmatpush1.bf16.msra.mxu1 %v4345_v14 }
 0x1d7   :  { %2381 = vmatprep.mubr.bf16.mxu0 %v6461_v58 }
 0x1d9   :  { %3825 = vmatmul.mubr.msk.bf16.gmra.mxu1 %vm1591_vm3, %v5747_v35 }
 0x1da   :  { %2115 = vmatprep.mubr.bf16.mxu1 %v6461_v58 }
 0x1de   :  { %3859 = vmatmul.mubr.msk.bf16.gmra.mxu0 %vm1591_vm3, %v2211_v41 }
 0x1df   :  { %2391 = vmatprep.mubr.bf16.mxu0 %v6461_v58 }
 0x1e1   :  { %3826 = vmatmul.mubr.msk.bf16.gmra.mxu1 %vm1591_vm3, %v5767_v27 }
 0x1e2   :  { %2125 = vmatprep.mubr.bf16.mxu1 %v6461_v58 }
 0x1e6   :  { %3860 = vmatmul.mubr.msk.bf16.gmra.mxu0 %vm1591_vm3, %v2213_v13 }
 0x1e7   :  { %2401 = vmatprep.mubr.bf16.mxu0 %v6461_v58 }
 0x1e9   :  { %3827 = vmatmul.mubr.msk.bf16.gmra.mxu1 %vm1591_vm3, %v5795_v32 }
 0x1ea   :  { %2135 = vmatprep.mubr.bf16.mxu1 %v6461_v58 }
 0x1ee   :  { %3861 = vmatmul.mubr.msk.bf16.gmra.mxu0 %vm1591_vm3, %v5799_v17 }
 0x1f1   :  { %3828 = vmatmul.mubr.msk.bf16.gmra.mxu1 %vm1591_vm3, %v1957_v63 }
 0x1f2   :  { %2145 = vmatprep.mubr.bf16.mxu1 %v6461_v58 }
 0x1f9   :  { %3829 = vmatmul.mubr.msk.bf16.gmra.mxu1 %vm1591_vm3, %v1956_v9 }
 0x1fa   :  { %2577 = vmatprep.mubr.bf16.mxu1 %v6461_v58 }
 0x201   :  { %3886 = vmatmul.mubr.msk.bf16.vlgmr.msra.gmra.mxu1 %vm1591_vm3, %v2440_v16  ;;  %v2447_v16 = vpack.c.bf16 %v5780_v24, %v5780_v24 }
 0x202   :  { %2587 = vmatprep.mubr.bf16.mxu1 %v6461_v58 }
 0x209   :  { %3887 = vmatmul.mubr.msk.bf16.gmra.mxu1 %vm1591_vm3, %v2441_v22 }
 0x20a   :  { %2597 = vmatprep.mubr.bf16.mxu1 %v6461_v58 }
 0x211   :  { %3888 = vmatmul.mubr.msk.bf16.gmra.mxu1 %vm1591_vm3, %v2442_v10 }
 0x212   :  { %2607 = vmatprep.mubr.bf16.mxu1 %v6461_v58 }
 0x219   :  { %3889 = vmatmul.mubr.msk.bf16.gmra.mxu1 %vm1591_vm3, %v2443_v53 }
 0x21a   :  { %2617 = vmatprep.mubr.bf16.mxu1 %v6461_v58 }
 0x221   :  { %3890 = vmatmul.mubr.msk.bf16.gmra.mxu1 %vm1591_vm3, %v2444_v23 }
 0x222   :  { %2627 = vmatprep.mubr.bf16.mxu1 %v6461_v58 }
 0x229   :  { %3891 = vmatmul.mubr.msk.bf16.gmra.mxu1 %vm1591_vm3, %v2445_v8 }
 0x22a   :  { %2637 = vmatprep.mubr.bf16.mxu1 %v6461_v58 }
 0x231   :  { %3892 = vmatmul.mubr.msk.bf16.gmra.mxu1 %vm1591_vm3, %v2446_v2 }
 0x232   :  { %2647 = vmatprep.mubr.bf16.mxu1 %v6461_v58 }
 0x234   :  { %v1853_v18 = vpop.f32.mrf.mxu0 }
 0x236   :  { %v1855_v20 = vpop.f32.mrf.mxu0 }
 0x238   :  { %v1857_v39 = vpop.f32.mrf.mxu0 }
 0x239   :  { %3893 = vmatmul.mubr.msk.bf16.gmra.mxu1 %vm1591_vm3, %v2447_v16 }
 0x23a   :  { %v1859_v1 = vpop.f32.mrf.mxu0 }
 0x23e   :  { %v1863_v22 = vpop.f32.mrf.mxu0 }
 0x240   :  { %v1865_v40 = vpop.f32.mrf.mxu0 }
 0x241   :  { %v1657_v50 = vpop.f32.mrf.mxu1 }
 0x242   :  { %v5934_v10 = vadd.f32 %v1853_v18, %v1657_v50  ;;  %v1867_v3 = vpop.f32.mrf.mxu0 }
 0x243   :  { %v1659_v44 = vpop.f32.mrf.mxu1 }
 0x244   :  { %v5936_v53 = vadd.f32 %v1855_v20, %v1659_v44  ;;  %v1869_v4 = vpop.f32.mrf.mxu0 }
 0x245   :  { %v1661_v0 = vpop.f32.mrf.mxu1 }
 0x246   :  { %v5938_v31 = vadd.f32 %v1857_v39, %v1661_v0  ;;  %v1873_v46 = vpop.f32.mrf.mxu0 }
 0x247   :  { %v1663_v35 = vpop.f32.mrf.mxu1 }
 0x248   :  { %v5940_v23 = vadd.f32 %v1859_v1, %v1663_v35  ;;  %v1875_v6 = vpop.f32.mrf.mxu0 }
 0x249   :  { %v1667_v60 = vpop.f32.mrf.mxu1 }
 0x24a   :  { %v5942_v61 = vadd.f32 %v1863_v22, %v1667_v60  ;;  %v1877_v34 = vpop.f32.mrf.mxu0 }
 0x24b   :  { %v1669_v42 = vpop.f32.mrf.mxu1 }
 0x24c   :  { %v5944_v36 = vadd.f32 %v1865_v40, %v1669_v42  ;;  %v1879_v27 = vpop.f32.mrf.mxu0 }
 0x24d   :  { %v1671_v8 = vpop.f32.mrf.mxu1 }
 0x24e   :  { %v5946_v56 = vadd.f32 %v1867_v3, %v1671_v8  ;;  %v1883_v59 = vpop.f32.mrf.mxu0 }
 0x24f   :  { %v1673_v54 = vpop.f32.mrf.mxu1 }
 0x250   :  { %v5948_v38 = vadd.f32 %v1869_v4, %v1673_v54  ;;  %v1885_v30 = vpop.f32.mrf.mxu0 }
 0x251   :  { %v1677_v37 = vpop.f32.mrf.mxu1 }
 0x252   :  { %v5950_v24 = vadd.f32 %v1873_v46, %v1677_v37  ;;  %v1887_v51 = vpop.f32.mrf.mxu0 }
 0x253   :  { %v1679_v47 = vpop.f32.mrf.mxu1 }
 0x254   :  { %v5952_v19 = vadd.f32 %v1875_v6, %v1679_v47  ;;  %v1889_v25 = vpop.f32.mrf.mxu0 }
 0x255   :  { %v1681_v33 = vpop.f32.mrf.mxu1 }
 0x256   :  { %v5954_v43 = vadd.f32 %v1877_v34, %v1681_v33  ;;  %v1893_v5 = vpop.f32.mrf.mxu0 }
 0x257   :  { %v1683_v41 = vpop.f32.mrf.mxu1 }
 0x258   :  { %v5956_v32 = vadd.f32 %v1879_v27, %v1683_v41  ;;  %v1895_v2 = vpop.f32.mrf.mxu0 }
 0x259   :  { %v1687_v17 = vpop.f32.mrf.mxu1 }
 0x25a   :  { %v5958_v62 = vadd.f32 %v1883_v59, %v1687_v17  ;;  %v1897_v9 = vpop.f32.mrf.mxu0 }
 0x25b   :  { %v1689_v12 = vpop.f32.mrf.mxu1 }
 0x25c   :  { %v5960_v13 = vadd.f32 %v1885_v30, %v1689_v12  ;;  %v1899_v63 = vpop.f32.mrf.mxu0 }
 0x25d   :  { %v1691_v55 = vpop.f32.mrf.mxu1 }
 0x25e   :  { %v5962_v29 = vadd.f32 %v1887_v51, %v1691_v55  ;;  %v1903_v52 = vpop.f32.mrf.mxu0 }
 0x25f   :  { %v1693_v7 = vpop.f32.mrf.mxu1 }
 0x260   :  { %v5964_v28 = vadd.f32 %v1889_v25, %v1693_v7  ;;  %v1905_v45 = vpop.f32.mrf.mxu0 }
 0x261   :  { %v1697_v57 = vpop.f32.mrf.mxu1 }
 0x262   :  { %v5966_v48 = vadd.f32 %v1893_v5, %v1697_v57  ;;  %v1907_v21 = vpop.f32.mrf.mxu0 }
 0x263   :  { %v1699_v15 = vpop.f32.mrf.mxu1 }
 0x264   :  { %v5968_v49 = vadd.f32 %v1895_v2, %v1699_v15  ;;  %v1909_v14 = vpop.f32.mrf.mxu0 }
 0x265   :  { %v1701_v18 = vpop.f32.mrf.mxu1 }
 0x266   :  { %v5970_v20 = vadd.f32 %v1897_v9, %v1701_v18  ;;  %v1913_v16 = vpop.f32.mrf.mxu0 }
 0x267   :  { %v1703_v39 = vpop.f32.mrf.mxu1 }
 0x268   :  { %v5972_v1 = vadd.f32 %v1899_v63, %v1703_v39  ;;  %v1915_v22 = vpop.f32.mrf.mxu0 }
 0x269   :  { %v1707_v40 = vpop.f32.mrf.mxu1 }
 0x26a   :  { %v5974_v50 = vadd.f32 %v1903_v52, %v1707_v40  ;;  %v1917_v3 = vpop.f32.mrf.mxu0 }
 0x26b   :  { %v1709_v44 = vpop.f32.mrf.mxu1 }
 0x26c   :  { %v5976_v4 = vadd.f32 %v1905_v45, %v1709_v44  ;;  %v1919_v0 = vpop.f32.mrf.mxu0 }
 0x26d   :  { %v1711_v46 = vpop.f32.mrf.mxu1 }
 0x26e   :  { %v5978_v35 = vadd.f32 %v1907_v21, %v1711_v46  ;;  %v1923_v6 = vpop.f32.mrf.mxu0 }
 0x26f   :  { %v1713_v60 = vpop.f32.mrf.mxu1 }
 0x270   :  { %v5980_v34 = vadd.f32 %v1909_v14, %v1713_v60  ;;  %v1925_v42 = vpop.f32.mrf.mxu0 }
 0x271   :  { %v1717_v27 = vpop.f32.mrf.mxu1 }
 0x272   :  { %v5982_v8 = vadd.f32 %v1913_v16, %v1717_v27  ;;  %v1927_v59 = vpop.f32.mrf.mxu0 }
 0x273   :  { %v1719_v54 = vpop.f32.mrf.mxu1 }
 0x274   :  { %v5984_v30 = vadd.f32 %v1915_v22, %v1719_v54  ;;  %v1928_v37 = vpop.f32.mrf.mxu0 }
 0x275   :  { %v1721_v51 = vpop.f32.mrf.mxu1 }
 0x276   :  { %v5986_v47 = vadd.f32 %v1917_v3, %v1721_v51  ;;  %v2333_v25 = vpop.f32.mrf.mxu0 }
 0x277   :  { %v1723_v33 = vpop.f32.mrf.mxu1 }
 0x278   :  { %v5988_v5 = vadd.f32 %v1919_v0, %v1723_v33  ;;  %v2335_v41 = vpop.f32.mrf.mxu0 }
 0x279   :  { %v1727_v2 = vpop.f32.mrf.mxu1 }
 0x27a   :  { %v5990_v17 = vadd.f32 %v1923_v6, %v1727_v2  ;;  %v2337_v9 = vpop.f32.mrf.mxu0 }
 0x27b   :  { %v1729_v12 = vpop.f32.mrf.mxu1 }
 0x27c   :  { %v5992_v63 = vadd.f32 %v1925_v42, %v1729_v12  ;;  %v2339_v55 = vpop.f32.mrf.mxu0 }
 0x27d   :  { %v1731_v52 = vpop.f32.mrf.mxu1 }
 0x27e   :  { %v2343_v7 = vpop.f32.mrf.mxu0 }
 0x27f   :  { %v1732_v45 = vpop.f32.mrf.mxu1 }
 0x280   :  { %v2345_v57 = vpop.f32.mrf.mxu0 }
 0x281   :  { %v2077_v21 = vpop.f32.mrf.mxu1 }
 0x282   :  { %v2154_v15 = vadd.f32 %v2077_v21, %v5934_v10  ;;  %v2347_v14 = vpop.f32.mrf.mxu0 }
 0x283   :  { %v2079_v18 = vpop.f32.mrf.mxu1 }
 0x284   :  { %v2155_v16 = vadd.f32 %v2079_v18, %v5936_v53  ;;  %v2349_v39 = vpop.f32.mrf.mxu0  ;;  %v5996_v22 = vadd.f32 %v2333_v25, %v2154_v15 }
 0x285   :  { %v2081_v40 = vpop.f32.mrf.mxu1 }
 0x286   :  { %v2156_v3 = vadd.f32 %v2081_v40, %v5938_v31  ;;  %v2353_v44 = vpop.f32.mrf.mxu0  ;;  %v5999_v0 = vadd.f32 %v2335_v41, %v2155_v16 }
 0x287   :  { %v2083_v46 = vpop.f32.mrf.mxu1 }
 0x288   :  { %v2157_v6 = vadd.f32 %v2083_v46, %v5940_v23  ;;  %v2355_v60 = vpop.f32.mrf.mxu0  ;;  %v6002_v42 = vadd.f32 %v2337_v9, %v2156_v3 }
 0x289   :  { %v2087_v10 = vpop.f32.mrf.mxu1 }
 0x28a   :  { %v2158_v27 = vadd.f32 %v2087_v10, %v5942_v61  ;;  %v2357_v59 = vpop.f32.mrf.mxu0  ;;  %v6005_v53 = vadd.f32 %v2339_v55, %v2157_v6 }
 0x28b   :  { %v2089_v54 = vpop.f32.mrf.mxu1 }
 0x28c   :  { %v2159_v37 = vadd.f32 %v2089_v54, %v5944_v36  ;;  %v2359_v51 = vpop.f32.mrf.mxu0  ;;  %v6008_v31 = vadd.f32 %v2343_v7, %v2158_v27 }
 0x28d   :  { %v2091_v25 = vpop.f32.mrf.mxu1 }
 0x28e   :  { %v2160_v33 = vadd.f32 %v2091_v25, %v5946_v56  ;;  %v2363_v41 = vpop.f32.mrf.mxu0  ;;  %v6011_v23 = vadd.f32 %v2345_v57, %v2159_v37 }
 0x28f   :  { %v2093_v2 = vpop.f32.mrf.mxu1 }
 0x290   :  { %v2161_v9 = vadd.f32 %v2093_v2, %v5948_v38  ;;  %v2365_v12 = vpop.f32.mrf.mxu0  ;;  %v6014_v61 = vadd.f32 %v2347_v14, %v2160_v33 }
 0x291   :  { %v2097_v55 = vpop.f32.mrf.mxu1 }
 0x292   :  { %v2162_v52 = vadd.f32 %v2097_v55, %v5950_v24  ;;  %v2367_v45 = vpop.f32.mrf.mxu0  ;;  %v6017_v36 = vadd.f32 %v2349_v39, %v2161_v9 }
 0x293   :  { %v2099_v7 = vpop.f32.mrf.mxu1 }
 0x294   :  { %v2163_v21 = vadd.f32 %v2099_v7, %v5952_v19  ;;  %v2369_v15 = vpop.f32.mrf.mxu0  ;;  %v6020_v56 = vadd.f32 %v2353_v44, %v2162_v52 }
 0x295   :  { %v2101_v57 = vpop.f32.mrf.mxu1 }
 0x296   :  { %v2164_v18 = vadd.f32 %v2101_v57, %v5954_v43  ;;  %v2373_v16 = vpop.f32.mrf.mxu0  ;;  %v6023_v38 = vadd.f32 %v2355_v60, %v2163_v21 }
 0x297   :  { %v2103_v14 = vpop.f32.mrf.mxu1 }
 0x298   :  { %v2165_v40 = vadd.f32 %v2103_v14, %v5956_v32  ;;  %v2375_v3 = vpop.f32.mrf.mxu0  ;;  %v6026_v24 = vadd.f32 %v2357_v59, %v2164_v18 }
 0x299   :  { %v2107_v39 = vpop.f32.mrf.mxu1 }
 0x29a   :  { %v2166_v46 = vadd.f32 %v2107_v39, %v5958_v62  ;;  %v2377_v6 = vpop.f32.mrf.mxu0  ;;  %v6029_v19 = vadd.f32 %v2359_v51, %v2165_v40 }
 0x29b   :  { %v2109_v44 = vpop.f32.mrf.mxu1 }
 0x29c   :  { %v2167_v10 = vadd.f32 %v2109_v44, %v5960_v13  ;;  %v2379_v27 = vpop.f32.mrf.mxu0  ;;  %v6032_v43 = vadd.f32 %v2363_v41, %v2166_v46  ;;  %v4350_v46 = vld [vmem:[%s6389_s6 + $0x48] sm:$0xff]   ;;  %v4412_v44 = vmov 0.0  }
 0x29d   :  { %v2111_v60 = vpop.f32.mrf.mxu1  ;;  %4063 = vmatprep.subr.bf16.mxu1 %v4412_v44  ;;  %4073 = vmatprep.mubr.msk.bf16.mxu1 %vm4413_vm8, %v4412_v44 }
 0x29e   :  { %v2168_v54 = vadd.f32 %v2111_v60, %v5962_v29  ;;  %v2383_v37 = vpop.f32.mrf.mxu0  ;;  %v6035_v32 = vadd.f32 %v2365_v12, %v2167_v10  ;;  %4064 = vmatpush3.bf16.msra.mxu1 %v4350_v46  ;;  %v6469_v46 = vsub.s32 1, %v5270_v26 }
 0x29f   :  { %v2113_v59 = vpop.f32.mrf.mxu1  ;;  %4065 = vmatprep.subr.bf16.mxu1 %v4412_v44 }
 0x2a0   :  { %v2169_v25 = vadd.f32 %v2113_v59, %v5964_v28  ;;  %v2385_v33 = vpop.f32.mrf.mxu0  ;;  %v6038_v62 = vadd.f32 %v2367_v45, %v2168_v54 }
 0x2a1   :  { %v2117_v51 = vpop.f32.mrf.mxu1 }
 0x2a2   :  { %v2170_v2 = vadd.f32 %v2117_v51, %v5966_v48  ;;  %v2387_v9 = vpop.f32.mrf.mxu0  ;;  %v6041_v13 = vadd.f32 %v2369_v15, %v2169_v25 }
 0x2a3   :  { %v2119_v41 = vpop.f32.mrf.mxu1 }
 0x2a4   :  { %v2171_v55 = vadd.f32 %v2119_v41, %v5968_v49  ;;  %v2389_v52 = vpop.f32.mrf.mxu0  ;;  %v6044_v29 = vadd.f32 %v2373_v16, %v2170_v2  ;;  %v4348_v49 = vld [vmem:[%s6388_s5] sm:$0xff]  }
 0x2a5   :  { %v2121_v12 = vpop.f32.mrf.mxu1  ;;  %4059 = vmatprep.mubr.msk.bf16.mxu0 %vm2867_vm6, %v4348_v49 }
 0x2a6   :  { %v2172_v7 = vadd.f32 %v2121_v12, %v5970_v20  ;;  %v2393_v21 = vpop.f32.mrf.mxu0  ;;  %v6047_v28 = vadd.f32 %v2375_v3, %v2171_v55 }
 0x2a7   :  { %v2123_v45 = vpop.f32.mrf.mxu1 }
 0x2a8   :  { %v2173_v57 = vadd.f32 %v2123_v45, %v5972_v1  ;;  %v2395_v18 = vpop.f32.mrf.mxu0  ;;  %v6050_v48 = vadd.f32 %v2377_v6, %v2172_v7 }
 0x2a9   :  { %v2127_v15 = vpop.f32.mrf.mxu1 }
 0x2aa   :  { %v2174_v16 = vadd.f32 %v2127_v15, %v5974_v50  ;;  %v2397_v14 = vpop.f32.mrf.mxu0  ;;  %v6056_v40 = vadd.f32 %v2379_v27, %v2173_v57 }
 0x2ab   :  { %v2129_v20 = vpop.f32.mrf.mxu1 }
 0x2ac   :  { %v2175_v3 = vadd.f32 %v2129_v20, %v5976_v4  ;;  %v2399_v1 = vpop.f32.mrf.mxu0  ;;  %v6060_v39 = vadd.f32 %v2383_v37, %v2174_v16  ;;  %v4351_v4 = vld [vmem:[%s6389_s6 + $0x40] sm:$0xff]  }
 0x2ad   :  { %v2131_v6 = vpop.f32.mrf.mxu1  ;;  %4066 = vmatpush3.bf16.msra.mxu1 %v4351_v4 }
 0x2ae   :  { %v2176_v50 = vadd.f32 %v2131_v6, %v5978_v35  ;;  %v2403_v10 = vpop.f32.mrf.mxu0  ;;  %v6067_v27 = vadd.f32 %v2385_v33, %v2175_v3  ;;  %v4354_v33 = vld [vmem:[%s6389_s6 + $0x38] sm:$0xff]   ;;  %4067 = vmatprep.subr.bf16.mxu1 %v4412_v44 }
 0x2af   :  { %v2133_v60 = vpop.f32.mrf.mxu1 }
 0x2b0   :  { %v2177_v54 = vadd.f32 %v2133_v60, %v5980_v34  ;;  %v2405_v37 = vpop.f32.mrf.mxu0  ;;  %v6074_v59 = vadd.f32 %v2387_v9, %v2176_v50 }
 0x2b1   :  { %v2137_v25 = vpop.f32.mrf.mxu1  ;;  %4068 = vmatpush3.bf16.msra.mxu1 %v4354_v33 }
 0x2b2   :  { %v2178_v51 = vadd.f32 %v2137_v25, %v5982_v8  ;;  %v2407_v35 = vpop.f32.mrf.mxu0  ;;  %v6077_v2 = vadd.f32 %v2389_v52, %v2177_v54  ;;  %4069 = vmatprep.subr.bf16.mxu1 %v4412_v44 }
 0x2b3   :  { %v2139_v41 = vpop.f32.mrf.mxu1 }
 0x2b4   :  { %v2179_v55 = vadd.f32 %v2139_v41, %v5984_v30  ;;  %v2408_v34 = vpop.f32.mrf.mxu0  ;;  %v6084_v12 = vadd.f32 %v2393_v21, %v2178_v51 }
 0x2b5   :  { %v2141_v9 = vpop.f32.mrf.mxu1 }
 0x2b6   :  { %v2180_v7 = vadd.f32 %v2141_v9, %v5986_v47  ;;  %v6087_v8 = vadd.f32 %v2395_v18, %v2179_v55  ;;  %v2686_v18 = vld [vmem:[%s6387_s4] sm:$0x3] }
 0x2b7   :  { %v2143_v52 = vpop.f32.mrf.mxu1 }
 0x2b8   :  { %v2181_v45 = vadd.f32 %v2143_v52, %v5988_v5  ;;  %v6091_v57 = vadd.f32 %v2397_v14, %v2180_v7  ;;  %v6106_v14 = vrot.slane %v2686_v18, %v1313_v11 }
 0x2b9   :  { %v2147_v15 = vpop.f32.mrf.mxu1 }
 0x2ba   :  { %v2182_v49 = vadd.f32 %v2147_v15, %v5990_v17  ;;  %v6094_v30 = vadd.f32 %v2399_v1, %v2181_v45 }
 0x2bb   :  { %v2149_v21 = vpop.f32.mrf.mxu1 }
 0x2bc   :  { %v2183_v16 = vadd.f32 %v2149_v21, %v5992_v63  ;;  %v6097_v20 = vadd.f32 %v2403_v10, %v2182_v49  ;;  %v6111_v63 = vrot.slane %v2686_v18, %v6469_v46 }
 0x2bd   :  { %v2151_v47 = vpop.f32.mrf.mxu1 }
 0x2be   :  { %v6102_v3 = vadd.f32 %v2405_v37, %v2183_v16 }
 0x2bf   :  { %v2152_v5 = vpop.f32.mrf.mxu1 }
 0x2c1   :  { %v2579_v17 = vpop.f32.mrf.mxu1 }
 0x2c2   :  { %v2656_v1 = vadd.f32 %v2579_v17, %v5996_v22 }
 0x2c3   :  { %v2581_v6 = vpop.f32.mrf.mxu1 }
 0x2c4   :  { %v2698_v50 = vadd.f32 %v6106_v14, %v2656_v1  ;;  %v2657_v10 = vadd.f32 %v2581_v6, %v5999_v0 }
 0x2c5   :  { %v2583_v4 = vpop.f32.mrf.mxu1 }
 0x2c6   :  { %v2699_v60 = vadd.f32 %v6111_v63, %v2657_v10  ;;  %v2658_v54 = vadd.f32 %v2583_v4, %v6002_v42  ;;  %v2728_v11 = vmax.f32 %v2698_v50, 0.0 }
 0x2c7   :  { %v2585_v37 = vpop.f32.mrf.mxu1 }
 0x2c8   :  { %v2729_v25 = vmax.f32 %v2699_v60, 0.0  ;;  %v2700_v51 = vadd.f32 %v6106_v14, %v2658_v54  ;;  %v2659_v22 = vadd.f32 %v2585_v37, %v6005_v53 }
 0x2c9   :  { %v2589_v26 = vpop.f32.mrf.mxu1 }
 0x2ca   :  { %v2758_v35 = vmax.f32 %v2728_v11, %v2729_v25  ;;  %v2701_v33 = vadd.f32 %v6111_v63, %v2659_v22  ;;  %v2660_v41 = vadd.f32 %v2589_v26, %v6008_v31  ;;  %v2730_v0 = vmax.f32 %v2700_v51, 0.0 }
 0x2cb   :  { %v2591_v55 = vpop.f32.mrf.mxu1 }
 0x2cc   :  { %v2731_v34 = vmax.f32 %v2701_v33, 0.0  ;;  %v2702_v9 = vadd.f32 %v6106_v14, %v2660_v41  ;;  %v2661_v42 = vadd.f32 %v2591_v55, %v6011_v23  ;;  %v2789_v18 = vrot.slane %v2758_v35, 2 }
 0x2cd   :  { %v2593_v7 = vpop.f32.mrf.mxu1 }
 0x2ce   :  { %v2759_v52 = vmax.f32 %v2730_v0, %v2731_v34  ;;  %v2703_v45 = vadd.f32 %v6111_v63, %v2661_v42  ;;  %v2662_v15 = vadd.f32 %v2593_v7, %v6014_v61  ;;  %v2732_v53 = vmax.f32 %v2702_v9, 0.0 }
 0x2cf   :  { %v2595_v49 = vpop.f32.mrf.mxu1 }
 0x2d0   :  { %v2790_v21 = vrot.slane %v2759_v52, 2  ;;  %v2733_v16 = vmax.f32 %v2703_v45, 0.0  ;;  %v2704_v47 = vadd.f32 %v6106_v14, %v2662_v15  ;;  %v2663_v31 = vadd.f32 %v2595_v49, %v6017_v36 }
 0x2d1   :  { %v2599_v5 = vpop.f32.mrf.mxu1 }
 0x2d2   :  { %v2760_v17 = vmax.f32 %v2732_v53, %v2733_v16  ;;  %v2705_v1 = vadd.f32 %v6111_v63, %v2663_v31  ;;  %v2664_v23 = vadd.f32 %v2599_v5, %v6020_v56  ;;  %v2734_v46 = vmax.f32 %v2704_v47, 0.0 }
 0x2d3   :  { %v2601_v6 = vpop.f32.mrf.mxu1  ;;  %v2791_v50 = vsel %vm1942_vm5, %v2789_v18, %v2790_v21 }
 0x2d4   :  { %v2792_v61 = vrot.slane %v2760_v17, 2  ;;  %v2735_v10 = vmax.f32 %v2705_v1, 0.0  ;;  %v2706_v4 = vadd.f32 %v6106_v14, %v2664_v23  ;;  %v2665_v60 = vadd.f32 %v2601_v6, %v6023_v38 }
 0x2d5   :  { %v2603_v54 = vpop.f32.mrf.mxu1  ;;  %v2833_v37 = vmax.f32 %v2758_v35, %v2791_v50 }
 0x2d6   :  { %v2761_v36 = vmax.f32 %v2734_v46, %v2735_v10  ;;  %v2707_v11 = vadd.f32 %v6111_v63, %v2665_v60  ;;  %v2666_v25 = vadd.f32 %v2603_v54, %v6026_v24  ;;  %v2736_v51 = vmax.f32 %v2706_v4, 0.0 }
 0x2d7   :  { %v2605_v22 = vpop.f32.mrf.mxu1  ;;  %v2793_v56 = vsel %vm1942_vm5, %v2790_v21, %v2792_v61 }
 0x2d8   :  { %v2794_v26 = vrot.slane %v2761_v36, 2  ;;  %v2737_v33 = vmax.f32 %v2707_v11, 0.0  ;;  %v2708_v41 = vadd.f32 %v6106_v14, %v2666_v25  ;;  %v2667_v55 = vadd.f32 %v2605_v22, %v6029_v19 }
 0x2d9   :  { %v2609_v0 = vpop.f32.mrf.mxu1  ;;  %v2834_v34 = vmax.f32 %v2759_v52, %v2793_v56 }
 0x2da   :  { %v2762_v38 = vmax.f32 %v2736_v51, %v2737_v33  ;;  %v2709_v35 = vadd.f32 %v6111_v63, %v2667_v55  ;;  %v2668_v9 = vadd.f32 %v2609_v0, %v6032_v43  ;;  %v2738_v42 = vmax.f32 %v2708_v41, 0.0 }
 0x2db   :  { %v2611_v7 = vpop.f32.mrf.mxu1  ;;  %v2795_v24 = vsel %vm1942_vm5, %v2792_v61, %v2794_v26  ;;  %v6140_v45 = vpack.c.bf16 %v2834_v34, %v2833_v37 }
 0x2dc   :  { %v2796_v15 = vrot.slane %v2762_v38, 2  ;;  %v2739_v53 = vmax.f32 %v2709_v35, 0.0  ;;  %v2710_v49 = vadd.f32 %v6106_v14, %v2668_v9  ;;  %v2669_v21 = vadd.f32 %v2611_v7, %v6035_v32 }
 0x2dd   :  { %v2613_v19 = vpop.f32.mrf.mxu1  ;;  %v2835_v16 = vmax.f32 %v2760_v17, %v2795_v24 }
 0x2de   :  { %v2763_v52 = vmax.f32 %v2738_v42, %v2739_v53  ;;  %v2711_v47 = vadd.f32 %v6111_v63, %v2669_v21  ;;  %v2670_v31 = vadd.f32 %v2613_v19, %v6038_v62  ;;  %v2740_v43 = vmax.f32 %v2710_v49, 0.0 }
 0x2df   :  { %v2615_v18 = vpop.f32.mrf.mxu1  ;;  %v2797_v5 = vsel %vm1942_vm5, %v2794_v26, %v2796_v15 }
 0x2e0   :  { %v2798_v1 = vrot.slane %v2763_v52, 2  ;;  %v2741_v23 = vmax.f32 %v2711_v47, 0.0  ;;  %v2712_v46 = vadd.f32 %v6106_v14, %v2670_v31  ;;  %v2671_v6 = vadd.f32 %v2615_v18, %v6041_v13 }
 0x2e1   :  { %v2619_v50 = vpop.f32.mrf.mxu1  ;;  %v2836_v61 = vmax.f32 %v2761_v36, %v2797_v5 }
 0x2e2   :  { %v2764_v32 = vmax.f32 %v2740_v43, %v2741_v23  ;;  %v2713_v17 = vadd.f32 %v6111_v63, %v2671_v6  ;;  %v2672_v10 = vadd.f32 %v2619_v50, %v6044_v29  ;;  %v2742_v4 = vmax.f32 %v2712_v46, 0.0 }
 0x2e3   :  { %v2621_v60 = vpop.f32.mrf.mxu1  ;;  %v2799_v62 = vsel %vm1942_vm5, %v2796_v15, %v2798_v1  ;;  %v6152_v54 = vpack.c.bf16 %v2836_v61, %v2835_v16 }
 0x2e4   :  { %v2800_v37 = vrot.slane %v2764_v32, 2  ;;  %v2743_v11 = vmax.f32 %v2713_v17, 0.0  ;;  %v2714_v25 = vadd.f32 %v6106_v14, %v2672_v10  ;;  %v2673_v51 = vadd.f32 %v2621_v60, %v6047_v28 }
 0x2e5   :  { %v2623_v13 = vpop.f32.mrf.mxu1  ;;  %v2837_v22 = vmax.f32 %v2762_v38, %v2799_v62 }
 0x2e6   :  { %v2765_v36 = vmax.f32 %v2742_v4, %v2743_v11  ;;  %v2715_v56 = vadd.f32 %v6111_v63, %v2673_v51  ;;  %v2674_v26 = vadd.f32 %v2623_v13, %v6050_v48  ;;  %v2744_v29 = vmax.f32 %v2714_v25, 0.0 }
 0x2e7   :  { %v2625_v33 = vpop.f32.mrf.mxu1  ;;  %v2801_v41 = vsel %vm1942_vm5, %v2798_v1, %v2800_v37 }
 0x2e8   :  { %v2802_v55 = vrot.slane %v2765_v36, 2  ;;  %v2745_v0 = vmax.f32 %v2715_v56, 0.0  ;;  %v2716_v34 = vadd.f32 %v6106_v14, %v2674_v26  ;;  %v2675_v35 = vadd.f32 %v2625_v33, %v6056_v40 }
 0x2e9   :  { %v2629_v9 = vpop.f32.mrf.mxu1  ;;  %v2838_v42 = vmax.f32 %v2763_v52, %v2801_v41 }
 0x2ea   :  { %v2766_v28 = vmax.f32 %v2744_v29, %v2745_v0  ;;  %v2717_v38 = vadd.f32 %v6111_v63, %v2675_v35  ;;  %v2676_v7 = vadd.f32 %v2629_v9, %v6060_v39  ;;  %v2746_v24 = vmax.f32 %v2716_v34, 0.0 }
 0x2eb   :  { %v2631_v15 = vpop.f32.mrf.mxu1  ;;  %v2803_v48 = vsel %vm1942_vm5, %v2800_v37, %v2802_v55  ;;  %v6164_v53 = vpack.c.bf16 %v2838_v42, %v2837_v22 }
 0x2ec   :  { %v2804_v49 = vrot.slane %v2766_v28, 2  ;;  %v2747_v21 = vmax.f32 %v2717_v38, 0.0  ;;  %v2718_v19 = vadd.f32 %v6106_v14, %v2676_v7  ;;  %v2677_v16 = vadd.f32 %v2631_v15, %v6067_v27 }
 0x2ed   :  { %v2633_v40 = vpop.f32.mrf.mxu1  ;;  %v2839_v47 = vmax.f32 %v2764_v32, %v2803_v48 }
 0x2ee   :  { %v2767_v52 = vmax.f32 %v2746_v24, %v2747_v21  ;;  %v2719_v31 = vadd.f32 %v6111_v63, %v2677_v16  ;;  %v2678_v43 = vadd.f32 %v2633_v40, %v6074_v59  ;;  %v2748_v39 = vmax.f32 %v2718_v19, 0.0 }
 0x2ef   :  { %v2635_v18 = vpop.f32.mrf.mxu1  ;;  %v2805_v5 = vsel %vm1942_vm5, %v2802_v55, %v2804_v49 }
 0x2f0   :  { %v2806_v1 = vrot.slane %v2767_v52, 2  ;;  %v2749_v23 = vmax.f32 %v2719_v31, 0.0  ;;  %v2720_v46 = vadd.f32 %v6106_v14, %v2678_v43  ;;  %v2679_v6 = vadd.f32 %v2635_v18, %v6077_v2 }
 0x2f1   :  { %v2639_v50 = vpop.f32.mrf.mxu1  ;;  %v2840_v61 = vmax.f32 %v2765_v36, %v2805_v5 }
 0x2f2   :  { %v2768_v27 = vmax.f32 %v2748_v39, %v2749_v23  ;;  %v2721_v32 = vadd.f32 %v6111_v63, %v2679_v6  ;;  %v2680_v17 = vadd.f32 %v2639_v50, %v6084_v12  ;;  %v2750_v10 = vmax.f32 %v2720_v46, 0.0 }
 0x2f3   :  { %v2641_v4 = vpop.f32.mrf.mxu1  ;;  %v2807_v59 = vsel %vm1942_vm5, %v2804_v49, %v2806_v1  ;;  %v2854_v60 = vpack.c.bf16 %v2840_v61, %v2839_v47  ;;  %v2876_v23 = vsel %vm2874_vm7, 65535, %v6461_v58  ;;  %v4349_v58 = vld [vmem:[%s6388_s5 + $0x8] ss:$0 sps:$4 sm:$0x33]   ;;  %v4352_v61 = vld [vmem:[%s6389_s6 + $0x20] sm:$0xff]  }
 0x2f4   :  { %v2808_v62 = vrot.slane %v2768_v27, 2  ;;  %v2751_v37 = vmax.f32 %v2721_v32, 0.0  ;;  %v2722_v11 = vadd.f32 %v6106_v14, %v2680_v17  ;;  %v2681_v25 = vadd.f32 %v2641_v4, %v6087_v8  ;;  %v4359_v32 = vld [vmem:[%s6389_s6] sm:$0xff]   ;;  %v4358_v17 = vld [vmem:[%s6389_s6 + $0x28] sm:$0xff]  }
 0x2f5   :  { %v2643_v51 = vpop.f32.mrf.mxu1  ;;  %v2841_v2 = vmax.f32 %v2766_v28, %v2807_v59 }
 0x2f6   :  { %v2769_v13 = vmax.f32 %v2750_v10, %v2751_v37  ;;  %v2723_v22 = vadd.f32 %v6111_v63, %v2681_v25  ;;  %v2682_v36 = vadd.f32 %v2643_v51, %v6091_v57  ;;  %v2752_v56 = vmax.f32 %v2722_v11, 0.0  ;;  %v4360_v11 = vld [vmem:[%s6389_s6 + $0x70] sm:$0xff]  }
 0x2f7   :  { %v2645_v12 = vpop.f32.mrf.mxu1  ;;  %v2809_v26 = vsel %vm1942_vm5, %v2806_v1, %v2808_v62  ;;  %v4363_v51 = vld [vmem:[%s6389_s6 + $0x90] sm:$0xff]  }
 0x2f8   :  { %v2810_v29 = vrot.slane %v2769_v13, 2  ;;  %v2753_v33 = vmax.f32 %v2723_v22, 0.0  ;;  %v2724_v41 = vadd.f32 %v6106_v14, %v2682_v36  ;;  %v2683_v55 = vadd.f32 %v2645_v12, %v6094_v30  ;;  %v4364_v22 = vld [vmem:[%s6389_s6 + $0x60] sm:$0xff]   ;;  %v4369_v12 = vld [vmem:[%s6389_s6 + $0x78] sm:$0xff]  }
 0x2f9   :  { %v2649_v0 = vpop.f32.mrf.mxu1  ;;  %v2842_v34 = vmax.f32 %v2767_v52, %v2809_v26  ;;  %v4367_v36 = vld [vmem:[%s6389_s6 + $0x80] sm:$0xff]   ;;  %v4368_v26 = vld [vmem:[%s6389_s6 + $0x50] sm:$0xff]  }
 0x2fa   :  { %v2770_v8 = vmax.f32 %v2752_v56, %v2753_v33  ;;  %v2725_v35 = vadd.f32 %v6111_v63, %v2683_v55  ;;  %v2684_v9 = vadd.f32 %v2649_v0, %v6097_v20  ;;  %v2754_v42 = vmax.f32 %v2724_v41, 0.0  ;;  %v4366_v56 = vld [vmem:[%s6389_s6 + $0x58] sm:$0xff]   ;;  %v4370_v33 = vld [vmem:[%s6389_s6 + $0xc0] sm:$0xff]   ;;  %v4372_v0 = vld [vmem:[%s6389_s6 + $0xb0] sm:$0xff]  }
 0x2fb   :  { %v2651_v28 = vpop.f32.mrf.mxu1  ;;  %v2811_v57 = vsel %vm1942_vm5, %v2808_v62, %v2810_v29  ;;  %v2855_v38 = vpack.c.bf16 %v2842_v34, %v2841_v2  ;;  %v4361_v62 = vld [vmem:[%s6389_s6 + $0x98] sm:$0xff]   ;;  %v4362_v2 = vld [vmem:[%s6389_s6 + $0x68] sm:$0xff]  }
 0x2fc   :  { %v2812_v7 = vrot.slane %v2770_v8, 2  ;;  %v2755_v24 = vmax.f32 %v2725_v35, 0.0  ;;  %v2726_v15 = vadd.f32 %v6106_v14, %v2684_v9  ;;  %v2685_v48 = vadd.f32 %v2651_v28, %v6102_v3  ;;  %v4371_v55 = vld [vmem:[%s6389_s6 + $0xb8] sm:$0xff]   ;;  %v4373_v34 = vld [vmem:[%s6389_s6 + $0xa8] sm:$0xff]   ;;  %v4376_v28 = vld [vmem:[%s6391_s8 + $0x30] sm:$0xff]  }
 0x2fd   :  { %v2653_v49 = vpop.f32.mrf.mxu1  ;;  %v2843_v30 = vmax.f32 %v2768_v27, %v2811_v57  ;;  %v4357_v27 = vld [vmem:[%s6389_s6 + $0x8] sm:$0xff]   ;;  %v4375_v9 = vld [vmem:[%s6391_s8 + $0x38] ss:$0 sps:$4 sm:$0xff]  }
 0x2fe   :  { %v2771_v21 = vmax.f32 %v2754_v42, %v2755_v24  ;;  %v2727_v19 = vadd.f32 %v6111_v63, %v2685_v48  ;;  %v2813_v16 = vsel %vm1942_vm5, %v2810_v29, %v2812_v7  ;;  %v2756_v52 = vmax.f32 %v2726_v15, 0.0  ;;  %v4377_v57 = vld [vmem:[%s6391_s8 + $0x28] sm:$0xff]   ;;  %v4380_v24 = vld [vmem:[%s6391_s8 + $0x10] sm:$0xff]   ;;  %v4382_v48 = vld [vmem:[%s6391_s8] sm:$0xff]  }
 0x2ff   :  { %v2654_v40 = vpop.f32.mrf.mxu1  ;;  %v2844_v20 = vmax.f32 %v2769_v13, %v2813_v16  ;;  %v4365_v13 = vld [vmem:[%s6389_s6 + $0x88] sm:$0xff]   ;;  %v3440_v42 = vsel %vm3438_vm10, %v4375_v9, 0  ;;  %v4386_v16 = vld [vmem:[%s6393_s10 + $0x10] sm:$0xff]  }
 0x300   :  { %v2814_v47 = vrot.slane %v2771_v21, 2  ;;  %v2757_v31 = vmax.f32 %v2727_v19, 0.0  ;;  %v4381_v15 = vld [vmem:[%s6391_s8 + $0x8] sm:$0xff]   ;;  %v4385_v19 = vld [vmem:[%s6393_s10 + $0x18] sm:$0xff]  }
 0x301   :  { %v2856_v43 = vpack.c.bf16 %v2844_v20, %v2843_v30  ;;  %v4383_v49 = vld [vmem:[%s6393_s10 + $0x28] ss:$0 sps:$4 sm:$0x33]  }
 0x302   :  { %v2772_v39 = vmax.f32 %v2756_v52, %v2757_v31  ;;  %v2815_v18 = vsel %vm1942_vm5, %v2812_v7, %v2814_v47  ;;  %v4379_v7 = vld [vmem:[%s6391_s8 + $0x18] sm:$0xff]   ;;  %v3539_v30 = vsel %vm1616_vm1, %v4383_v49, 0 }
 0x303   :  { %v2845_v5 = vmax.f32 %v2770_v8, %v2815_v18  ;;  %v4374_v8 = vld [vmem:[%s6389_s6 + $0xa0] sm:$0xff]  }
 0x304   :  { %v2816_v14 = vrot.slane %v2772_v39, 2 }
 0x306   :  { %v2847_v3 = vmax.f32 %v2772_v39, %v2816_v14  ;;  %v2817_v1 = vsel %vm1942_vm5, %v2814_v47, %v2816_v14 }
 0x307   :  { %v2846_v63 = vmax.f32 %v2771_v21, %v2817_v1  ;;  %v4384_v21 = vld [vmem:[%s6393_s10 + $0x20] sm:$0xff]  }
 0x308   :  { %v2858_v46 = vpack.c.bf16 %v2847_v3, %v2847_v3 }
 0x309   :  { %v2857_v6 = vpack.c.bf16 %v2846_v63, %v2845_v5 }
 0x30a   :  { %v2878_v50 = vand.u32 %v2876_v23, %v2858_v46 }
 0x30c   :  { %4043 = vmatprep.subr.bf16.mxu0 %v2878_v50 }
 0x30d   :  { %4044 = vmatpush3.bf16.msra.mxu0 %v2878_v50 }
 0x30e   :  { %4045 = vmatprep.subr.bf16.mxu0 %v2857_v6 }
 0x311   :  { %4046 = vmatpush3.bf16.msra.mxu0 %v2857_v6 }
 0x312   :  { %4047 = vmatprep.subr.bf16.mxu0 %v2856_v43 }
 0x315   :  { %4048 = vmatpush3.bf16.msra.mxu0 %v2856_v43 }
 0x316   :  { %4049 = vmatprep.subr.bf16.mxu0 %v2855_v38 }
 0x319   :  { %4050 = vmatpush3.bf16.msra.mxu0 %v2855_v38  ;;  %v4378_v38 = vld [vmem:[%s6391_s8 + $0x20] sm:$0xff]  }
 0x31a   :  { %4051 = vmatprep.subr.bf16.mxu0 %v2854_v60 }
 0x31d   :  { %4052 = vmatpush3.bf16.msra.mxu0 %v2854_v60 }
 0x31e   :  { %4053 = vmatprep.subr.bf16.mxu0 %v6164_v53 }
 0x321   :  { %4054 = vmatpush3.bf16.msra.mxu0 %v6164_v53  ;;  %v4356_v53 = vld [vmem:[%s6389_s6 + $0x30] sm:$0xff]  }
 0x322   :  { %4055 = vmatprep.subr.bf16.mxu0 %v6152_v54  ;;  %4070 = vmatpush3.bf16.msra.mxu1 %v4356_v53 }
 0x323   :  { %4071 = vmatprep.subr.bf16.mxu1 %v4412_v44 }
 0x325   :  { %4056 = vmatpush3.bf16.msra.mxu0 %v6152_v54  ;;  %v4353_v54 = vld [vmem:[%s6389_s6 + $0x18] sm:$0xff]  }
 0x326   :  { %4057 = vmatprep.subr.bf16.mxu0 %v6140_v45  ;;  %4072 = vmatpush3.bf16.msra.mxu1 %v4358_v17 }
 0x327   :  { %4091 = vmatprep.subr.bf16.mxu1 %v4412_v44 }
 0x329   :  { %4058 = vmatpush3.bf16.msra.mxu0 %v6140_v45  ;;  %v4355_v45 = vld [vmem:[%s6389_s6 + $0x10] sm:$0xff]  }
 0x32a   :  { %4077 = vmatprep.subr.bf16.mxu0 %v4412_v44 }
 0x32c   :  { %4060 = vmatmul.mubr.msk.bf16.vlgmr.msra.gmra.mxu0 %vm2867_vm6, %v4349_v58 }
 0x32d   :  { %4078 = vmatpush3.bf16.msra.mxu0 %v4352_v61  ;;  %4087 = vmatprep.mubr.msk.bf16.mxu0 %vm4413_vm8, %v4412_v44 }
 0x32e   :  { %4079 = vmatprep.subr.bf16.mxu0 %v4412_v44 }
 0x331   :  { %4080 = vmatpush3.bf16.msra.mxu0 %v4353_v54 }
 0x332   :  { %4081 = vmatprep.subr.bf16.mxu0 %v4412_v44 }
 0x335   :  { %4082 = vmatpush3.bf16.msra.mxu0 %v4355_v45  ;;  %v3968_v45 = vld [vmem:[%s6390_s7] ss:$0 sm:$0xff] }
 0x336   :  { %4083 = vmatprep.subr.bf16.mxu0 %v4412_v44 }
 0x339   :  { %4084 = vmatpush3.bf16.msra.mxu0 %v4357_v27 }
 0x33a   :  { %4085 = vmatprep.subr.bf16.mxu0 %v4412_v44 }
 0x33d   :  { %4086 = vmatpush3.bf16.msra.mxu0 %v4359_v32 }
 0x33e   :  { %4105 = vmatprep.subr.bf16.mxu0 %v4412_v44 }
 0x3ec   :  { %v6236_v10 = vpop.f32.mrf.mxu0 }
 0x3ed   :  { %v2929_v35 = vpack.c.bf16 %v6236_v10, %v6236_v10 }
 0x3ee   :  { %v2914_v4 = vpop.f32.mrf.mxu0 }
 0x3f0   :  { %v4062_v59 = vpop.f32.mrf.mxu0 }
 0x3f2   :  { %v2917_v60 = vpop.f32.mrf.mxu0 }
 0x3f3   :  { %v2928_v37 = vpack.c.bf16 %v2917_v60, %v2914_v4  ;;  %v4387_v60 = vld [vmem:[%s6393_s10 + $0x8] sm:$0xff]  }
 0x3f5   :  { %v2952_v25 = vrot.slane %v2928_v37, 2  ;;  %4088 = vmatmul.mubr.msk.bf16.vlgmr.msra.gmra.mxu0 %vm2983_vm9, %v2928_v37  ;;  %v3197_v29 = vrot.slane %v2928_v37, 6  ;;  %v3111_v41 = vrot.slane %v2928_v37, 4  ;;  %v3969_v37 = vld [vmem:[%s6392_s9] ss:$0 sm:$0xff] }
 0x3f6   :  { %4106 = vmatpush3.bf16.msra.mxu0 %v4361_v62  ;;  %4115 = vmatprep.mubr.msk.bf16.mxu0 %vm4413_vm8, %v4412_v44  ;;  %v4388_v62 = vld [vmem:[%s6393_s10] sm:$0xff]   ;;  %s3589_s10 = sshll.u32 %s4414_s27, 4  ;;  %s3590_s10 = int_to_ptr.vmem [resolvable:$true] %s3589_s10 }
 0x3f7   :  { %4074 = vmatmul.mubr.msk.bf16.vlgmr.msra.gmra.mxu1 %vm2983_vm9, %v2952_v25  ;;  %4107 = vmatprep.subr.bf16.mxu0 %v4412_v44  ;;  %s4389_s9 = scalar_lea.vmem %s3590_s10, 64  ;;  %p4394_p1 = scmp.lt.s32.totalorder %s3590_s10, %s3590_s10 }
 0x3f8   :  { %4092 = vmatpush3.bf16.msra.mxu1 %v4360_v11  ;;  %4101 = vmatprep.mubr.msk.bf16.mxu1 %vm4413_vm8, %v4412_v44  ;;  %p4390_p0 = scmp.ne.s32.totalorder %s3590_s10, %s4389_s9  ;;  %p4395_p2 = scmp.lt.s32.totalorder %s4389_s9, %s4389_s9 }
 0x3f9   :  { %4093 = vmatprep.subr.bf16.mxu1 %v4412_v44 }
 0x3fa   :  { %4108 = vmatpush3.bf16.msra.mxu0 %v4363_v51  ;;  %p4396_p3 = por %p4395_p2, %p4394_p1 }
 0x3fb   :  { %4109 = vmatprep.subr.bf16.mxu0 %v4412_v44 }
 0x3fc   :  { %4094 = vmatpush3.bf16.msra.mxu1 %v4362_v2  ;;  %p4397_p4 = pnand %p4396_p3, %p4390_p0 }
 0x3fd   :  { %4095 = vmatprep.subr.bf16.mxu1 %v4412_v44 }
 0x3fe   :  { %4110 = vmatpush3.bf16.msra.mxu0 %v4365_v13 }
 0x3ff   :  { %4111 = vmatprep.subr.bf16.mxu0 %v4412_v44 }
 0x400   :  { %4096 = vmatpush3.bf16.msra.mxu1 %v4364_v22 }
 0x401   :  { %4097 = vmatprep.subr.bf16.mxu1 %v4412_v44 }
 0x402   :  { %4112 = vmatpush3.bf16.msra.mxu0 %v4367_v36 }
 0x403   :  { %4113 = vmatprep.subr.bf16.mxu0 %v4412_v44 }
 0x404   :  { %4098 = vmatpush3.bf16.msra.mxu1 %v4366_v56 }
 0x405   :  { %4099 = vmatprep.subr.bf16.mxu1 %v4412_v44 }
 0x406   :  { %4114 = vmatpush3.bf16.msra.mxu0 %v4369_v12 }
 0x407   :  { %4133 = vmatprep.subr.bf16.mxu0 %v4412_v44 }
 0x408   :  { %4100 = vmatpush3.bf16.msra.mxu1 %v4368_v26 }
 0x409   :  { %4119 = vmatprep.subr.bf16.mxu1 %v4412_v44  ;;  %4116 = vmatmul.mubr.msk.bf16.vlgmr.msra.gmra.mxu0 %vm2983_vm9, %v3197_v29 }
 0x40a   :  { %4149 = vmatprep.mubr.msk.bf16.mxu0 %vm4413_vm8, %v4412_v44  ;;  %4134 = vmatpush3.bf16.msra.mxu0 %v3440_v42 }
 0x40b   :  { %4102 = vmatmul.mubr.msk.bf16.vlgmr.msra.gmra.mxu1 %vm2983_vm9, %v3111_v41  ;;  %4135 = vmatprep.subr.bf16.mxu0 %v4412_v44 }
 0x40c   :  { %4120 = vmatpush3.bf16.msra.mxu1 %v4370_v33  ;;  %4129 = vmatprep.mubr.msk.bf16.mxu1 %vm4413_vm8, %v4412_v44 }
 0x40d   :  { %4121 = vmatprep.subr.bf16.mxu1 %v4412_v44 }
 0x40e   :  { %4136 = vmatpush3.bf16.msra.mxu0 %v4376_v28 }
 0x40f   :  { %4137 = vmatprep.subr.bf16.mxu0 %v4412_v44 }
 0x410   :  { %4122 = vmatpush3.bf16.msra.mxu1 %v4371_v55 }
 0x411   :  { %4123 = vmatprep.subr.bf16.mxu1 %v4412_v44 }
 0x412   :  { %4138 = vmatpush3.bf16.msra.mxu0 %v4377_v57 }
 0x413   :  { %4139 = vmatprep.subr.bf16.mxu0 %v4412_v44 }
 0x414   :  { %4124 = vmatpush3.bf16.msra.mxu1 %v4372_v0 }
 0x415   :  { %4125 = vmatprep.subr.bf16.mxu1 %v4412_v44 }
 0x416   :  { %4140 = vmatpush3.bf16.msra.mxu0 %v4378_v38 }
 0x417   :  { %4141 = vmatprep.subr.bf16.mxu0 %v4412_v44 }
 0x418   :  { %4126 = vmatpush3.bf16.msra.mxu1 %v4373_v34 }
 0x419   :  { %4127 = vmatprep.subr.bf16.mxu1 %v4412_v44 }
 0x41a   :  { %4142 = vmatpush3.bf16.msra.mxu0 %v4379_v7 }
 0x41b   :  { %4143 = vmatprep.subr.bf16.mxu0 %v4412_v44 }
 0x41c   :  { %4128 = vmatpush3.bf16.msra.mxu1 %v4374_v8 }
 0x41d   :  { %4153 = vmatprep.subr.bf16.mxu1 %v4412_v44 }
 0x41e   :  { %4144 = vmatpush3.bf16.msra.mxu0 %v4380_v24 }
 0x41f   :  { %4130 = vmatmul.mubr.msk.bf16.vlgmr.msra.gmra.mxu1 %vm2983_vm9, %v2929_v35  ;;  %4145 = vmatprep.subr.bf16.mxu0 %v4412_v44 }
 0x420   :  { %4165 = vmatprep.mubr.msk.bf16.mxu1 %vm4413_vm8, %v4412_v44  ;;  %4154 = vmatpush3.bf16.msra.mxu1 %v3539_v30 }
 0x421   :  { %4155 = vmatprep.subr.bf16.mxu1 %v4412_v44 }
 0x422   :  { %4146 = vmatpush3.bf16.msra.mxu0 %v4381_v15 }
 0x423   :  { %4147 = vmatprep.subr.bf16.mxu0 %v4412_v44 }
 0x424   :  { %4156 = vmatpush3.bf16.msra.mxu1 %v4384_v21 }
 0x425   :  { %4157 = vmatprep.subr.bf16.mxu1 %v4412_v44 }
 0x426   :  { %4148 = vmatpush3.bf16.msra.mxu0 %v4382_v48 }
 0x428   :  { %4158 = vmatpush3.bf16.msra.mxu1 %v4385_v19 }
 0x429   :  { %4159 = vmatprep.subr.bf16.mxu1 %v4412_v44 }
 0x42c   :  { %4160 = vmatpush3.bf16.msra.mxu1 %v4386_v16 }
 0x42d   :  { %4161 = vmatprep.subr.bf16.mxu1 %v4412_v44 }
 0x430   :  { %4162 = vmatpush3.bf16.msra.mxu1 %v4387_v60 }
 0x431   :  { %4163 = vmatprep.subr.bf16.mxu1 %v4412_v44  ;;  %v3979_v44 = vld [vmem:[%s6394_s11] ss:$0 sm:$0xff] }
 0x434   :  { %4164 = vmatpush3.bf16.msra.mxu1 %v4388_v62 }
 0x4b5   :  { %v3094_v40 = vpop.f32.mrf.mxu0 }
 0x4b7   :  { %v3021_v20 = vpop.f32.mrf.mxu1  ;;  %v4089_v47 = vpop.f32.mrf.mxu0 }
 0x4b8   :  { %v3095_v50 = vadd.f32 %v3094_v40, %v3021_v20 }
 0x4b9   :  { %v4075_v52 = vpop.f32.mrf.mxu1  ;;  %v3097_v31 = vpop.f32.mrf.mxu0 }
 0x4bb   :  { %v3024_v43 = vpop.f32.mrf.mxu1  ;;  %v4090_v39 = vpop.f32.mrf.mxu0 }
 0x4bd   :  { %v4076_v18 = vpop.f32.mrf.mxu1 }
 0x4c9   :  { %v3265_v5 = vpop.f32.mrf.mxu0 }
 0x4cb   :  { %v3179_v14 = vpop.f32.mrf.mxu1  ;;  %v4117_v3 = vpop.f32.mrf.mxu0 }
 0x4cc   :  { %v3185_v58 = vadd.f32 %v3179_v14, %v3095_v50 }
 0x4cd   :  { %v4103_v1 = vpop.f32.mrf.mxu1  ;;  %v3268_v23 = vpop.f32.mrf.mxu0 }
 0x4ce   :  { %v3271_v61 = vadd.f32 %v3265_v5, %v3185_v58 }
 0x4cf   :  { %v3182_v63 = vpop.f32.mrf.mxu1  ;;  %v4118_v46 = vpop.f32.mrf.mxu0 }
 0x4d1   :  { %v4104_v6 = vpop.f32.mrf.mxu1 }
 0x4df   :  { %v3350_v54 = vpop.f32.mrf.mxu1 }
 0x4e0   :  { %v3356_v53 = vadd.f32 %v3350_v54, %v3271_v61 }
 0x4e1   :  { %v4131_v27 = vpop.f32.mrf.mxu1 }
 0x4e2   :  { %v3364_v32 = vadd.f32 %v3968_v45, %v3356_v53 }
 0x4e3   :  { %v3353_v17 = vpop.f32.mrf.mxu1 }
 0x4e4   :  { %v3365_v10 = vmax.f32 %v3364_v32, 0.0 }
 0x4e5   :  { %v4132_v4 = vpop.f32.mrf.mxu1 }
 0x4e6   :  { %v3366_v59 = vpack.c.bf16 %v3365_v10, %v3365_v10 }
 0x4e8   :  { %4150 = vmatmul.mubr.msk.bf16.vlgmr.msra.gmra.mxu0 %vm3434_vm11, %v3366_v59 }
 0x5a8   :  { %v3476_v11 = vpop.f32.mrf.mxu0 }
 0x5a9   :  { %v3477_v25 = vadd.f32 %v3969_v37, %v3476_v11 }
 0x5aa   :  { %v4151_v51 = vpop.f32.mrf.mxu0 }
 0x5ab   :  { %v3482_v2 = vmax.f32 %v3477_v25, 0.0 }
 0x5ac   :  { %v3479_v13 = vpop.f32.mrf.mxu0 }
 0x5ad   :  { %v3483_v22 = vpack.c.bf16 %v3482_v2, %v3482_v2 }
 0x5ae   :  { %v4152_v36 = vpop.f32.mrf.mxu0 }
 0x5af   :  { %4166 = vmatmul.mubr.msk.bf16.vlgmr.msra.gmra.mxu1 %vm1591_vm3, %v3483_v22 }
 0x66f   :  { %v3575_v56 = vpop.f32.mrf.mxu1 }
 0x670   :  { %v3576_v12 = vadd.f32 %v3979_v44, %v3575_v56 }
 0x671   :  { %v4167_v26 = vpop.f32.mrf.mxu1 }
 0x672   :  { %3582 = vst.msk [vmem:[#allocation2] sm:$0xf] %vm3581_vm12, %v3576_v12 }
 0x673   :  { %v3578_v29 = vpop.f32.mrf.mxu1 }
 0x674   :  { %4400 = shalt.err (!%p4397_p4)
}
 0x675   :  { %3592 = dma.vmem_to_hbm [thread:$0]  %s3590_s10, 64, %s6395_s12, [#allocation3]   ;;  %v4168_v33 = vpop.f32.mrf.mxu1 }
 0x676   :  { %4409 = dma.done.wait [#allocation3], 64  }
 0x677   :  { %4410 = vsyncadd [#allocation3], 4294967232 }
 0x678   :  { %3596 = vsyncpa [#allocation3], 1 }

</bundles_post_ra>
